<compile_context>
chip_gen: v7x
topology: tpu7x:2x2x1
jax: 0.10.0
libtpu: 0.0.40
codegen_flags: <defaults>
</compile_context>

<pallas_src>
import math

import jax
import jax.numpy as jnp
from jax import lax
from jax.experimental import pallas as pl
from jax.experimental.pallas import tpu as pltpu

D_MODEL = 136
N_HEAD = 4
HEAD_DIM = D_MODEL // N_HEAD      # 34 (real head width)
HEAD_PAD = 64                     # lane-friendly padded head width
D_PAD = N_HEAD * HEAD_PAD         # 256 = padded model width
D_FF = 2048                       # nn.TransformerEncoderLayer default
N_LAYERS = 6
D_OUT = 512
LN_EPS = 1e-5
BN_EPS = 1e-5


# ----------------------------------------------------------------------------
# Kernel 1: BatchNorm1d (channel axis = T) fused with positional-encoding add
# ----------------------------------------------------------------------------
def _bn_pe_kernel(x_ref, g_ref, b_ref, pe_ref, o_ref):
    # x: (T, N, D_PAD) f32, lanes >= 136 are zero on input.
    x = x_ref[...]
    n = x.shape[1]
    inv = 1.0 / (n * D_MODEL)
    s1 = jnp.sum(x, axis=2, keepdims=True)
    mean = jnp.sum(s1, axis=1, keepdims=True) * inv           # (T,1,1)
    s2 = jnp.sum(x * x, axis=2, keepdims=True)
    ex2 = jnp.sum(s2, axis=1, keepdims=True) * inv
    var = ex2 - mean * mean                                   # biased (PyTorch BN)
    xn = (x - mean) * lax.rsqrt(var + BN_EPS) * g_ref[...] + b_ref[...]
    xn = xn + pe_ref[...]
    # Re-zero the padded lanes so the encoder's padding invariant holds.
    lane = lax.broadcasted_iota(jnp.int32, x.shape, 2)
    o_ref[...] = jnp.where(lane < D_MODEL, xn, 0.0).astype(o_ref.dtype)


def bn_positional(xt, gamma, beta, pe):
    t, n, dp = xt.shape
    return pl.pallas_call(
        _bn_pe_kernel,
        out_shape=jax.ShapeDtypeStruct((t, n, dp), jnp.float32),
        grid=(1,),
        in_specs=[
            pl.BlockSpec((t, n, dp), lambda i: (0, 0, 0)),
            pl.BlockSpec((t, 1, 1), lambda i: (0, 0, 0)),
            pl.BlockSpec((t, 1, 1), lambda i: (0, 0, 0)),
            pl.BlockSpec((1, n, dp), lambda i: (0, 0, 0)),
        ],
        out_specs=pl.BlockSpec((t, n, dp), lambda i: (0, 0, 0)),
    )(xt, gamma, beta, pe)


# ----------------------------------------------------------------------------
# Kernel 2: full 6-layer transformer encoder stack + final linear, fused
# ----------------------------------------------------------------------------
def _encoder_stack_kernel(x_ref, bias_ref, w_in_ref, b_in_ref, w_out_ref,
                          b_out_ref, ln1_g_ref, ln1_b_ref, w1_ref, b1_ref,
                          w2_ref, b2_ref, ln2_g_ref, ln2_b_ref,
                          w_lin_ref, b_lin_ref, o_ref, x_scr):
    layer = pl.program_id(1)

    @pl.when(layer == 0)
    def _():
        x_scr[...] = x_ref[...]

    x = x_scr[...]                                    # (mb, 256) f32; padded lanes == 0
    mb = x.shape[0]

    def layer_norm(v, g, b):
        # Padded lanes of v are exactly zero, so sums over 256 lanes == sums
        # over the 136 real dims; divide by the real width.
        mean = jnp.sum(v, axis=-1, keepdims=True) * (1.0 / D_MODEL)
        ex2 = jnp.sum(v * v, axis=-1, keepdims=True) * (1.0 / D_MODEL)
        var = ex2 - mean * mean
        return (v - mean) * lax.rsqrt(var + LN_EPS) * g + b   # padded g/b are 0

    # ---- multi-head self-attention (heads padded 34->64, block-diag mask) ----
    qkv = jnp.dot(x.astype(jnp.bfloat16), w_in_ref[0],
                  preferred_element_type=jnp.float32) + b_in_ref[0]   # (mb, 768)
    qkv_b = qkv.astype(jnp.bfloat16)
    w_out = w_out_ref[0]                                              # (256, 256) bf16
    bias = bias_ref[...]                                              # 0 / -1e30
    scale = 1.0 / math.sqrt(HEAD_DIM)

    attn = jnp.zeros((mb, D_PAD), jnp.float32)
    for h in range(N_HEAD):
        qh = qkv_b[:, h * HEAD_PAD:(h + 1) * HEAD_PAD]
        kh = qkv_b[:, D_PAD + h * HEAD_PAD:D_PAD + (h + 1) * HEAD_PAD]
        vh = qkv_b[:, 2 * D_PAD + h * HEAD_PAD:2 * D_PAD + (h + 1) * HEAD_PAD]
        s = lax.dot_general(qh, kh, (((1,), (1,)), ((), ())),
                            preferred_element_type=jnp.float32) * scale + bias
        s = s - jnp.max(s, axis=-1, keepdims=True)
        p = jnp.exp(s)
        p = p * pl.reciprocal(jnp.sum(p, axis=-1, keepdims=True), approx=True)
        ctx = jnp.dot(p.astype(jnp.bfloat16), vh,
                      preferred_element_type=jnp.float32)             # (mb, 64)
        attn = attn + jnp.dot(ctx.astype(jnp.bfloat16),
                              w_out[h * HEAD_PAD:(h + 1) * HEAD_PAD, :],
                              preferred_element_type=jnp.float32)
    attn = attn + b_out_ref[0]

    x = layer_norm(x + attn, ln1_g_ref[0], ln1_b_ref[0])

    # ---- feed-forward: the (mb, 2048) intermediate never leaves VMEM ----
    h1 = jnp.dot(x.astype(jnp.bfloat16), w1_ref[0],
                 preferred_element_type=jnp.float32) + b1_ref[0]
    h1 = jnp.maximum(h1, 0.0)
    h2 = jnp.dot(h1.astype(jnp.bfloat16), w2_ref[0],
                 preferred_element_type=jnp.float32) + b2_ref[0]
    x = layer_norm(x + h2, ln2_g_ref[0], ln2_b_ref[0])
    x_scr[...] = x

    # ---- fused final 136(256)->512 linear, last layer only ----
    @pl.when(layer == pl.num_programs(1) - 1)
    def _():
        y = jnp.dot(x.astype(jnp.bfloat16), w_lin_ref[...],
                    preferred_element_type=jnp.float32) + b_lin_ref[...]
        o_ref[...] = y.astype(o_ref.dtype)


def transformer_encoder(x2, attn_bias, layers, w_lin, b_lin, *, batch_blocks):
    m, dp = x2.shape
    mb = m // batch_blocks

    row_map = lambda c, l: (c, 0)
    lay_map = lambda c, l: (l, 0, 0)
    fix_map = lambda c, l: (0, 0)

    in_specs = [
        pl.BlockSpec((mb, dp), row_map),                 # x
        pl.BlockSpec((mb, mb), fix_map),                 # attention bias (0 / -1e30)
        pl.BlockSpec((1, dp, 3 * dp), lay_map),          # w_in
        pl.BlockSpec((1, 1, 3 * dp), lay_map),           # b_in
        pl.BlockSpec((1, dp, dp), lay_map),              # w_out
        pl.BlockSpec((1, 1, dp), lay_map),               # b_out
        pl.BlockSpec((1, 1, dp), lay_map),               # ln1_g
        pl.BlockSpec((1, 1, dp), lay_map),               # ln1_b
        pl.BlockSpec((1, dp, D_FF), lay_map),            # w1
        pl.BlockSpec((1, 1, D_FF), lay_map),             # b1
        pl.BlockSpec((1, D_FF, dp), lay_map),            # w2
        pl.BlockSpec((1, 1, dp), lay_map),               # b2
        pl.BlockSpec((1, 1, dp), lay_map),               # ln2_g
        pl.BlockSpec((1, 1, dp), lay_map),               # ln2_b
        pl.BlockSpec((dp, D_OUT), fix_map),              # w_lin
        pl.BlockSpec((1, D_OUT), fix_map),               # b_lin
    ]
    return pl.pallas_call(
        _encoder_stack_kernel,
        out_shape=jax.ShapeDtypeStruct((m, D_OUT), jnp.float32),
        grid=(batch_blocks, N_LAYERS),
        in_specs=in_specs,
        out_specs=pl.BlockSpec((mb, D_OUT), row_map),
        scratch_shapes=[pltpu.VMEM((mb, dp), jnp.float32)],
        compiler_params=pltpu.CompilerParams(
            dimension_semantics=("parallel", "arbitrary")),
    )(x2, attn_bias,
      layers["w_in"], layers["b_in"], layers["w_out"], layers["b_out"],
      layers["ln1_g"], layers["ln1_b"], layers["w1"], layers["b1"],
      layers["w2"], layers["b2"], layers["ln2_g"], layers["ln2_b"],
      w_lin, b_lin)


# ----------------------------------------------------------------------------
# Model wrapper (layout plumbing only; all hot math lives in the two kernels)
# ----------------------------------------------------------------------------
def video_transformer(x, params):
    n, t, d = x.shape
    # Transformer treats axis0 = sequence (N), axis1 = batch (T); reorder to
    # batch-major rows so attention groups are contiguous inside a row block.
    xt = jnp.transpose(x, (1, 0, 2))                          # (T, N, 136)
    xt = jnp.pad(xt, ((0, 0), (0, 0), (0, D_PAD - d)))        # lane-pad to 256
    pe = params["pe"][:n].reshape(1, n, D_PAD)                # pe[:x.size(0)]
    xb = bn_positional(xt, params["bn_g"].reshape(t, 1, 1),
                       params["bn_b"].reshape(t, 1, 1), pe)   # (T, N, 256)
    x2 = xb.reshape(t * n, D_PAD)                             # rows = (t, n)

    # Split the T (batch) axis across two grid blocks when legal -> megacore.
    bb = 2 if (t % 2 == 0 and ((t // 2) * n) % 8 == 0) else 1
    mb = (t * n) // bb
    gid = jnp.arange(mb, dtype=jnp.int32) // n                # batch-group per row
    attn_bias = jnp.where(gid[:, None] == gid[None, :], 0.0, -1e30).astype(jnp.float32)

    y = transformer_encoder(x2, attn_bias, params["layers"],
                            params["w_lin"], params["b_lin"], batch_blocks=bb)
    return jnp.transpose(y.reshape(t, n, D_OUT), (1, 0, 2))   # (N, T, 512)


# ----------------------------------------------------------------------------
# Deterministic parameter / positional-encoding setup (with lane padding)
# ----------------------------------------------------------------------------
def make_positional_encoding(max_len, d_model):
    pos = jnp.arange(max_len, dtype=jnp.float32)[:, None]
    div = jnp.exp(jnp.arange(0, d_model, 2, dtype=jnp.float32)
                  * (-math.log(10000.0) / d_model))
    pe = jnp.zeros((max_len, d_model), jnp.float32)
    pe = pe.at[:, 0::2].set(jnp.sin(pos * div))
    pe = pe.at[:, 1::2].set(jnp.cos(pos * div))
    return pe


def _pad_in_proj(w, b):
    # w: (136, 408), columns = [Q | K | V], each head 34 wide -> (256, 768).
    wp = jnp.zeros((D_PAD, 3 * D_PAD), jnp.float32)
    bp = jnp.zeros((3 * D_PAD,), jnp.float32)
    for blk in range(3):
        for h in range(N_HEAD):
            src = blk * D_MODEL + h * HEAD_DIM
            dst = blk * D_PAD + h * HEAD_PAD
            wp = wp.at[:D_MODEL, dst:dst + HEAD_DIM].set(w[:, src:src + HEAD_DIM])
            bp = bp.at[dst:dst + HEAD_DIM].set(b[src:src + HEAD_DIM])
    return wp, bp


def _pad_out_proj(w, b):
    # w: (136, 136), rows = concatenated head outputs -> (256, 256).
    wp = jnp.zeros((D_PAD, D_PAD), jnp.float32)
    for h in range(N_HEAD):
        wp = wp.at[h * HEAD_PAD:h * HEAD_PAD + HEAD_DIM, :D_MODEL].set(
            w[h * HEAD_DIM:(h + 1) * HEAD_DIM, :])
    bp = jnp.zeros((D_PAD,), jnp.float32).at[:D_MODEL].set(b)
    return wp, bp


def init_params(key, t_len, max_len=5000):
    def rnd(k, shape, scale=0.02):
        return scale * jax.random.normal(k, shape, jnp.float32)

    keys = jax.random.split(key, N_LAYERS + 1)
    acc = {name: [] for name in
           ("w_in", "b_in", "w_out", "b_out", "ln1_g", "ln1_b",
            "w1", "b1", "w2", "b2", "ln2_g", "ln2_b")}
    ln_gamma = jnp.zeros((D_PAD,), jnp.float32).at[:D_MODEL].set(1.0)
    ln_beta = jnp.zeros((D_PAD,), jnp.float32)   # padded lanes stay zero
    for i in range(N_LAYERS):
        k0, k1, k2, k3 = jax.random.split(keys[i], 4)
        w_in, b_in = _pad_in_proj(rnd(k0, (D_MODEL, 3 * D_MODEL)),
                                  jnp.zeros((3 * D_MODEL,), jnp.float32))
        w_out, b_out = _pad_out_proj(rnd(k1, (D_MODEL, D_MODEL)),
                                     jnp.zeros((D_MODEL,), jnp.float32))
        w1 = jnp.zeros((D_PAD, D_FF), jnp.float32).at[:D_MODEL, :].set(
            rnd(k2, (D_MODEL, D_FF)))
        w2 = jnp.zeros((D_FF, D_PAD), jnp.float32).at[:, :D_MODEL].set(
            rnd(k3, (D_FF, D_MODEL)))
        acc["w_in"].append(w_in); acc["b_in"].append(b_in)
        acc["w_out"].append(w_out); acc["b_out"].append(b_out)
        acc["ln1_g"].append(ln_gamma); acc["ln1_b"].append(ln_beta)
        acc["w1"].append(w1); acc["b1"].append(jnp.zeros((D_FF,), jnp.float32))
        acc["w2"].append(w2); acc["b2"].append(jnp.zeros((D_PAD,), jnp.float32))
        acc["ln2_g"].append(ln_gamma); acc["ln2_b"].append(ln_beta)

    def stack_w(name):   # bf16 MXU operands
        return jnp.stack(acc[name]).astype(jnp.bfloat16)

    def stack_v(name):   # f32 row vectors, shape (L, 1, C)
        return jnp.stack(acc[name])[:, None, :]

    layers = dict(
        w_in=stack_w("w_in"), b_in=stack_v("b_in"),
        w_out=stack_w("w_out"), b_out=stack_v("b_out"),
        ln1_g=stack_v("ln1_g"), ln1_b=stack_v("ln1_b"),
        w1=stack_w("w1"), b1=stack_v("b1"),
        w2=stack_w("w2"), b2=stack_v("b2"),
        ln2_g=stack_v("ln2_g"), ln2_b=stack_v("ln2_b"),
    )
    w_lin = jnp.zeros((D_PAD, D_OUT), jnp.float32).at[:D_MODEL, :].set(
        rnd(keys[-1], (D_MODEL, D_OUT)))
    pe = jnp.zeros((max_len, D_PAD), jnp.float32).at[:, :D_MODEL].set(
        make_positional_encoding(max_len, D_MODEL))
    return dict(
        bn_g=jnp.ones((t_len,), jnp.float32),
        bn_b=jnp.zeros((t_len,), jnp.float32),
        pe=pe,
        layers=layers,
        w_lin=w_lin.astype(jnp.bfloat16),
        b_lin=jnp.zeros((1, D_OUT), jnp.float32),
    )


if __name__ == "__main__":
    key = jax.random.PRNGKey(0)
    kx, kp = jax.random.split(key)

    batch, t_len = 2, 8
    x = jax.random.normal(kx, (batch, t_len, D_MODEL), jnp.float32)
    params = init_params(kp, t_len)

    y = jax.jit(video_transformer)(x, params)
    jax.block_until_ready(y)

    assert y.shape == (batch, t_len, D_OUT), y.shape
    assert bool(jnp.all(jnp.isfinite(y)))
    print("KERNEL_OK")
</pallas_src>

<mosaic_0001>
module attributes {stable_mosaic.version = 11 : i64} {
  func.func @_bn_pe_kernel(%arg0: i32, %arg1: memref<8x2x256xf32, #tpu.memory_space<vmem>>, %arg2: memref<8x1x1xf32, #tpu.memory_space<vmem>>, %arg3: memref<8x1x1xf32, #tpu.memory_space<vmem>>, %arg4: memref<1x2x256xf32, #tpu.memory_space<vmem>>, %arg5: memref<8x2x256xf32, #tpu.memory_space<vmem>>) attributes {dimension_semantics = [#tpu.dimension_semantics<arbitrary>], iteration_bounds = array<i64: 1>, scalar_prefetch = 0 : i64, scratch_operands = 0 : i64, tpu.core_type = #tpu.core_type<tc>, window_params = [{pipeline_mode = #tpu.pipeline_mode<synchronous>, transform_indices = @transform_0, window_bounds = array<i64: 8, 2, 256>}, {pipeline_mode = #tpu.pipeline_mode<synchronous>, transform_indices = @transform_1, window_bounds = array<i64: 8, 1, 1>}, {pipeline_mode = #tpu.pipeline_mode<synchronous>, transform_indices = @transform_2, window_bounds = array<i64: 8, 1, 1>}, {pipeline_mode = #tpu.pipeline_mode<synchronous>, transform_indices = @transform_3, window_bounds = array<i64: 1, 2, 256>}, {pipeline_mode = #tpu.pipeline_mode<synchronous>, transform_indices = @transform_4, window_bounds = array<i64: 8, 2, 256>}]} {
    %c0 = arith.constant 0 : index
    %c0_0 = arith.constant 0 : index
    %c0_1 = arith.constant 0 : index
    %0 = vector.load %arg1[%c0, %c0_0, %c0_1] : memref<8x2x256xf32, #tpu.memory_space<vmem>>, vector<8x2x256xf32>
    %cst = arith.constant dense<0.000000e+00> : vector<8x2xf32>
    %1 = vector.multi_reduction <add>, %0, %cst [2] : vector<8x2x256xf32> to vector<8x2xf32>
    %2 = vector.shape_cast %1 : vector<8x2xf32> to vector<8x2x1xf32>
    %cst_2 = arith.constant dense<0.000000e+00> : vector<8x1xf32>
    %3 = vector.multi_reduction <add>, %2, %cst_2 [1] : vector<8x2x1xf32> to vector<8x1xf32>
    %4 = vector.shape_cast %3 : vector<8x1xf32> to vector<8x1x1xf32>
    %cst_3 = arith.constant 0.0036764706 : f32
    %5 = vector.broadcast %cst_3 : f32 to vector<8x1x1xf32>
    %6 = arith.mulf %4, %5 : vector<8x1x1xf32>
    %7 = arith.mulf %0, %0 : vector<8x2x256xf32>
    %cst_4 = arith.constant dense<0.000000e+00> : vector<8x2xf32>
    %8 = vector.multi_reduction <add>, %7, %cst_4 [2] : vector<8x2x256xf32> to vector<8x2xf32>
    %9 = vector.shape_cast %8 : vector<8x2xf32> to vector<8x2x1xf32>
    %cst_5 = arith.constant dense<0.000000e+00> : vector<8x1xf32>
    %10 = vector.multi_reduction <add>, %9, %cst_5 [1] : vector<8x2x1xf32> to vector<8x1xf32>
    %11 = vector.shape_cast %10 : vector<8x1xf32> to vector<8x1x1xf32>
    %cst_6 = arith.constant 0.0036764706 : f32
    %12 = vector.broadcast %cst_6 : f32 to vector<8x1x1xf32>
    %13 = arith.mulf %11, %12 : vector<8x1x1xf32>
    %14 = arith.mulf %6, %6 : vector<8x1x1xf32>
    %15 = arith.subf %13, %14 : vector<8x1x1xf32>
    %16 = vector.broadcast %6 : vector<8x1x1xf32> to vector<8x2x256xf32>
    %17 = arith.subf %0, %16 : vector<8x2x256xf32>
    %cst_7 = arith.constant 9.99999974E-6 : f32
    %18 = vector.broadcast %cst_7 : f32 to vector<8x1x1xf32>
    %19 = arith.addf %15, %18 : vector<8x1x1xf32>
    %20 = math.rsqrt %19 : vector<8x1x1xf32>
    %21 = vector.broadcast %20 : vector<8x1x1xf32> to vector<8x2x256xf32>
    %22 = arith.mulf %17, %21 : vector<8x2x256xf32>
    %c0_8 = arith.constant 0 : index
    %c0_9 = arith.constant 0 : index
    %c0_10 = arith.constant 0 : index
    %23 = vector.load %arg2[%c0_8, %c0_9, %c0_10] : memref<8x1x1xf32, #tpu.memory_space<vmem>>, vector<8x1x1xf32>
    %24 = vector.broadcast %23 : vector<8x1x1xf32> to vector<8x2x256xf32>
    %25 = arith.mulf %22, %24 : vector<8x2x256xf32>
    %c0_11 = arith.constant 0 : index
    %c0_12 = arith.constant 0 : index
    %c0_13 = arith.constant 0 : index
    %26 = vector.load %arg3[%c0_11, %c0_12, %c0_13] : memref<8x1x1xf32, #tpu.memory_space<vmem>>, vector<8x1x1xf32>
    %27 = vector.broadcast %26 : vector<8x1x1xf32> to vector<8x2x256xf32>
    %28 = arith.addf %25, %27 : vector<8x2x256xf32>
    %c0_14 = arith.constant 0 : index
    %c0_15 = arith.constant 0 : index
    %c0_16 = arith.constant 0 : index
    %29 = vector.load %arg4[%c0_14, %c0_15, %c0_16] : memref<1x2x256xf32, #tpu.memory_space<vmem>>, vector<1x2x256xf32>
    %30 = vector.broadcast %29 : vector<1x2x256xf32> to vector<8x2x256xf32>
    %31 = arith.addf %28, %30 : vector<8x2x256xf32>
    %32 = tpu.iota {dimensions = array<i32: 2>} : vector<8x2x256xi32>
    %c136_i32 = arith.constant 136 : i32
    %33 = vector.broadcast %c136_i32 : i32 to vector<8x2x256xi32>
    %34 = arith.cmpi slt, %32, %33 : vector<8x2x256xi32>
    %cst_17 = arith.constant 0.000000e+00 : f32
    %35 = vector.broadcast %cst_17 : f32 to vector<8x2x256xf32>
    %36 = arith.select %34, %31, %35 : vector<8x2x256xi1>, vector<8x2x256xf32>
    %c0_18 = arith.constant 0 : index
    %c0_19 = arith.constant 0 : index
    %c0_20 = arith.constant 0 : index
    %37 = vector.load %arg5[%c0_18, %c0_19, %c0_20] : memref<8x2x256xf32, #tpu.memory_space<vmem>>, vector<8x2x256xf32>
    tpu.vector_store %arg5[%c0_18, %c0_19, %c0_20], %36 {strides = array<i32>} : memref<8x2x256xf32, #tpu.memory_space<vmem>>, vector<8x2x256xf32>,
    return
  }
  func.func @transform_0(%arg0: i32) -> (i32, i32, i32) {
    %c0_i32 = arith.constant 0 : i32
    %c0_i32_0 = arith.constant 0 : i32
    %c0_i32_1 = arith.constant 0 : i32
    %c0_i32_2 = arith.constant 0 : i32
    return %c0_i32, %c0_i32_0, %c0_i32_1 : i32, i32, i32
  }
  func.func @transform_1(%arg0: i32) -> (i32, i32, i32) {
    %c0_i32 = arith.constant 0 : i32
    %c0_i32_0 = arith.constant 0 : i32
    %c0_i32_1 = arith.constant 0 : i32
    %c0_i32_2 = arith.constant 0 : i32
    return %c0_i32, %c0_i32_0, %c0_i32_1 : i32, i32, i32
  }
  func.func @transform_2(%arg0: i32) -> (i32, i32, i32) {
    %c0_i32 = arith.constant 0 : i32
    %c0_i32_0 = arith.constant 0 : i32
    %c0_i32_1 = arith.constant 0 : i32
    %c0_i32_2 = arith.constant 0 : i32
    return %c0_i32, %c0_i32_0, %c0_i32_1 : i32, i32, i32
  }
  func.func @transform_3(%arg0: i32) -> (i32, i32, i32) {
    %c0_i32 = arith.constant 0 : i32
    %c0_i32_0 = arith.constant 0 : i32
    %c0_i32_1 = arith.constant 0 : i32
    %c0_i32_2 = arith.constant 0 : i32
    return %c0_i32, %c0_i32_0, %c0_i32_1 : i32, i32, i32
  }
  func.func @transform_4(%arg0: i32) -> (i32, i32, i32) {
    %c0_i32 = arith.constant 0 : i32
    %c0_i32_0 = arith.constant 0 : i32
    %c0_i32_1 = arith.constant 0 : i32
    %c0_i32_2 = arith.constant 0 : i32
    return %c0_i32, %c0_i32_0, %c0_i32_1 : i32, i32, i32
  }
}

module attributes {stable_mosaic.version = 11 : i64} {
  func.func @_encoder_stack_kernel(%arg0: i32, %arg1: i32, %arg2: memref<8x256xf32, #tpu.memory_space<vmem>>, %arg3: memref<8x8xf32, #tpu.memory_space<vmem>>, %arg4: memref<1x256x768xbf16, #tpu.memory_space<vmem>>, %arg5: memref<1x1x768xf32, #tpu.memory_space<vmem>>, %arg6: memref<1x256x256xbf16, #tpu.memory_space<vmem>>, %arg7: memref<1x1x256xf32, #tpu.memory_space<vmem>>, %arg8: memref<1x1x256xf32, #tpu.memory_space<vmem>>, %arg9: memref<1x1x256xf32, #tpu.memory_space<vmem>>, %arg10: memref<1x256x2048xbf16, #tpu.memory_space<vmem>>, %arg11: memref<1x1x2048xf32, #tpu.memory_space<vmem>>, %arg12: memref<1x2048x256xbf16, #tpu.memory_space<vmem>>, %arg13: memref<1x1x256xf32, #tpu.memory_space<vmem>>, %arg14: memref<1x1x256xf32, #tpu.memory_space<vmem>>, %arg15: memref<1x1x256xf32, #tpu.memory_space<vmem>>, %arg16: memref<256x512xbf16, #tpu.memory_space<vmem>>, %arg17: memref<1x512xf32, #tpu.memory_space<vmem>>, %arg18: memref<8x512xf32, #tpu.memory_space<vmem>>, %arg19: memref<8x256xf32, #tpu.memory_space<vmem>>) attributes {dimension_semantics = [#tpu.dimension_semantics<parallel>, #tpu.dimension_semantics<arbitrary>], iteration_bounds = array<i64: 2, 6>, scalar_prefetch = 0 : i64, scratch_operands = 1 : i64, tpu.core_type = #tpu.core_type<tc>, window_params = [{transform_indices = @transform_0, window_bounds = array<i64: 8, 256>}, {pipeline_mode = #tpu.pipeline_mode<synchronous>, transform_indices = @transform_1, window_bounds = array<i64: 8, 8>}, {transform_indices = @transform_2, window_bounds = array<i64: 1, 256, 768>}, {transform_indices = @transform_3, window_bounds = array<i64: 1, 1, 768>}, {transform_indices = @transform_4, window_bounds = array<i64: 1, 256, 256>}, {transform_indices = @transform_5, window_bounds = array<i64: 1, 1, 256>}, {transform_indices = @transform_6, window_bounds = array<i64: 1, 1, 256>}, {transform_indices = @transform_7, window_bounds = array<i64: 1, 1, 256>}, {transform_indices = @transform_8, window_bounds = array<i64: 1, 256, 2048>}, {transform_indices = @transform_9, window_bounds = array<i64: 1, 1, 2048>}, {transform_indices = @transform_10, window_bounds = array<i64: 1, 2048, 256>}, {transform_indices = @transform_11, window_bounds = array<i64: 1, 1, 256>}, {transform_indices = @transform_12, window_bounds = array<i64: 1, 1, 256>}, {transform_indices = @transform_13, window_bounds = array<i64: 1, 1, 256>}, {pipeline_mode = #tpu.pipeline_mode<synchronous>, transform_indices = @transform_14, window_bounds = array<i64: 256, 512>}, {pipeline_mode = #tpu.pipeline_mode<synchronous>, transform_indices = @transform_15, window_bounds = array<i64: 1, 512>}, {transform_indices = @transform_16, window_bounds = array<i64: 8, 512>}]} {
    %c0_i32 = arith.constant 0 : i32
    %0 = arith.cmpi eq, %arg1, %c0_i32 : i32
    %1 = arith.extui %0 : i1 to i32
    %c0_i32_0 = arith.constant 0 : i32
    %2 = arith.cmpi ne, %1, %c0_i32_0 : i32
    scf.if %2 {
      %c0_81 = arith.constant 0 : index
      %c0_82 = arith.constant 0 : index
      %189 = vector.load %arg2[%c0_81, %c0_82] : memref<8x256xf32, #tpu.memory_space<vmem>>, vector<8x256xf32>
      %c0_83 = arith.constant 0 : index
      %c0_84 = arith.constant 0 : index
      %190 = vector.load %arg19[%c0_83, %c0_84] : memref<8x256xf32, #tpu.memory_space<vmem>>, vector<8x256xf32>
      tpu.vector_store %arg19[%c0_83, %c0_84], %189 {strides = array<i32>} : memref<8x256xf32, #tpu.memory_space<vmem>>, vector<8x256xf32>,
    } else {
    }
    %c0 = arith.constant 0 : index
    %c0_1 = arith.constant 0 : index
    %3 = vector.load %arg19[%c0, %c0_1] : memref<8x256xf32, #tpu.memory_space<vmem>>, vector<8x256xf32>
    %4 = arith.truncf %3 : vector<8x256xf32> to vector<8x256xbf16>
    %c0_2 = arith.constant 0 : index
    %c0_3 = arith.constant 0 : index
    %c0_4 = arith.constant 0 : index
    %5 = vector.load %arg4[%c0_2, %c0_3, %c0_4] : memref<1x256x768xbf16, #tpu.memory_space<vmem>>, vector<1x256x768xbf16>
    %6 = vector.shape_cast %5 : vector<1x256x768xbf16> to vector<256x768xbf16>
    %cst = arith.constant dense<0.000000e+00> : vector<8x768xf32>
    %7 = tpu.matmul %4, %6, %cst {dimension_numbers = #tpu.dot_dimension_numbers<[1], [0], [0], [1], [0, 0, 1, 1], [], []>} : vector<8x256xbf16>, vector<256x768xbf16>, vector<8x768xf32> -> vector<8x768xf32>
    %c0_5 = arith.constant 0 : index
    %c0_6 = arith.constant 0 : index
    %c0_7 = arith.constant 0 : index
    %8 = vector.load %arg5[%c0_5, %c0_6, %c0_7] : memref<1x1x768xf32, #tpu.memory_space<vmem>>, vector<1x1x768xf32>
    %9 = vector.shape_cast %8 : vector<1x1x768xf32> to vector<1x768xf32>
    %10 = vector.broadcast %9 : vector<1x768xf32> to vector<8x768xf32>
    %11 = arith.addf %7, %10 : vector<8x768xf32>
    %12 = arith.truncf %11 : vector<8x768xf32> to vector<8x768xbf16>
    %c0_8 = arith.constant 0 : index
    %c0_9 = arith.constant 0 : index
    %c0_10 = arith.constant 0 : index
    %13 = vector.load %arg6[%c0_8, %c0_9, %c0_10] : memref<1x256x256xbf16, #tpu.memory_space<vmem>>, vector<1x256x256xbf16>
    %14 = vector.shape_cast %13 : vector<1x256x256xbf16> to vector<256x256xbf16>
    %c0_11 = arith.constant 0 : index
    %c0_12 = arith.constant 0 : index
    %15 = vector.load %arg3[%c0_11, %c0_12] : memref<8x8xf32, #tpu.memory_space<vmem>>, vector<8x8xf32>
    %cst_13 = arith.constant 0.000000e+00 : f32
    %16 = vector.broadcast %cst_13 : f32 to vector<8x256xf32>
    %17 = vector.extract_strided_slice %12 {offsets = [0, 0], sizes = [8, 64], strides = [1, 1]} : vector<8x768xbf16> to vector<8x64xbf16>
    %18 = vector.extract_strided_slice %12 {offsets = [0, 256], sizes = [8, 64], strides = [1, 1]} : vector<8x768xbf16> to vector<8x64xbf16>
    %19 = vector.extract_strided_slice %12 {offsets = [0, 512], sizes = [8, 64], strides = [1, 1]} : vector<8x768xbf16> to vector<8x64xbf16>
    %cst_14 = arith.constant dense<0.000000e+00> : vector<8x8xf32>
    %20 = tpu.matmul %17, %18, %cst_14 {dimension_numbers = #tpu.dot_dimension_numbers<[1], [1], [0], [0], [0, 0, 1, 0], [], []>} : vector<8x64xbf16>, vector<8x64xbf16>, vector<8x8xf32> -> vector<8x8xf32>
    %cst_15 = arith.constant 0.171498582 : f32
    %21 = vector.broadcast %cst_15 : f32 to vector<8x8xf32>
    %22 = arith.mulf %20, %21 : vector<8x8xf32>
    %23 = arith.addf %22, %15 : vector<8x8xf32>
    %cst_16 = arith.constant dense<0xFF800000> : vector<8xf32>
    %24 = vector.multi_reduction <maximumf>, %23, %cst_16 [1] : vector<8x8xf32> to vector<8xf32>
    %25 = vector.shape_cast %24 : vector<8xf32> to vector<8x1xf32>
    %26 = vector.broadcast %25 : vector<8x1xf32> to vector<8x8xf32>
    %27 = arith.subf %23, %26 : vector<8x8xf32>
    %28 = math.exp %27 : vector<8x8xf32>
    %cst_17 = arith.constant dense<0.000000e+00> : vector<8xf32>
    %29 = vector.multi_reduction <add>, %28, %cst_17 [1] : vector<8x8xf32> to vector<8xf32>
    %30 = vector.shape_cast %29 : vector<8xf32> to vector<8x1xf32>
    %31 = tpu.reciprocal %30 {approx = true} : vector<8x1xf32> -> vector<8x1xf32>
    %32 = vector.broadcast %31 : vector<8x1xf32> to vector<8x8xf32>
    %33 = arith.mulf %28, %32 : vector<8x8xf32>
    %34 = arith.truncf %33 : vector<8x8xf32> to vector<8x8xbf16>
    %cst_18 = arith.constant dense<0.000000e+00> : vector<8x64xf32>
    %35 = tpu.matmul %34, %19, %cst_18 {dimension_numbers = #tpu.dot_dimension_numbers<[1], [0], [0], [1], [0, 0, 1, 1], [], []>} : vector<8x8xbf16>, vector<8x64xbf16>, vector<8x64xf32> -> vector<8x64xf32>
    %36 = arith.truncf %35 : vector<8x64xf32> to vector<8x64xbf16>
    %37 = vector.extract_strided_slice %14 {offsets = [0, 0], sizes = [64, 256], strides = [1, 1]} : vector<256x256xbf16> to vector<64x256xbf16>
    %cst_19 = arith.constant dense<0.000000e+00> : vector<8x256xf32>
    %38 = tpu.matmul %36, %37, %cst_19 {dimension_numbers = #tpu.dot_dimension_numbers<[1], [0], [0], [1], [0, 0, 1, 1], [], []>} : vector<8x64xbf16>, vector<64x256xbf16>, vector<8x256xf32> -> vector<8x256xf32>
    %39 = arith.addf %16, %38 : vector<8x256xf32>
    %40 = vector.extract_strided_slice %12 {offsets = [0, 64], sizes = [8, 64], strides = [1, 1]} : vector<8x768xbf16> to vector<8x64xbf16>
    %41 = vector.extract_strided_slice %12 {offsets = [0, 320], sizes = [8, 64], strides = [1, 1]} : vector<8x768xbf16> to vector<8x64xbf16>
    %42 = vector.extract_strided_slice %12 {offsets = [0, 576], sizes = [8, 64], strides = [1, 1]} : vector<8x768xbf16> to vector<8x64xbf16>
    %cst_20 = arith.constant dense<0.000000e+00> : vector<8x8xf32>
    %43 = tpu.matmul %40, %41, %cst_20 {dimension_numbers = #tpu.dot_dimension_numbers<[1], [1], [0], [0], [0, 0, 1, 0], [], []>} : vector<8x64xbf16>, vector<8x64xbf16>, vector<8x8xf32> -> vector<8x8xf32>
    %cst_21 = arith.constant 0.171498582 : f32
    %44 = vector.broadcast %cst_21 : f32 to vector<8x8xf32>
    %45 = arith.mulf %43, %44 : vector<8x8xf32>
    %46 = arith.addf %45, %15 : vector<8x8xf32>
    %cst_22 = arith.constant dense<0xFF800000> : vector<8xf32>
    %47 = vector.multi_reduction <maximumf>, %46, %cst_22 [1] : vector<8x8xf32> to vector<8xf32>
    %48 = vector.shape_cast %47 : vector<8xf32> to vector<8x1xf32>
    %49 = vector.broadcast %48 : vector<8x1xf32> to vector<8x8xf32>
    %50 = arith.subf %46, %49 : vector<8x8xf32>
    %51 = math.exp %50 : vector<8x8xf32>
    %cst_23 = arith.constant dense<0.000000e+00> : vector<8xf32>
    %52 = vector.multi_reduction <add>, %51, %cst_23 [1] : vector<8x8xf32> to vector<8xf32>
    %53 = vector.shape_cast %52 : vector<8xf32> to vector<8x1xf32>
    %54 = tpu.reciprocal %53 {approx = true} : vector<8x1xf32> -> vector<8x1xf32>
    %55 = vector.broadcast %54 : vector<8x1xf32> to vector<8x8xf32>
    %56 = arith.mulf %51, %55 : vector<8x8xf32>
    %57 = arith.truncf %56 : vector<8x8xf32> to vector<8x8xbf16>
    %cst_24 = arith.constant dense<0.000000e+00> : vector<8x64xf32>
    %58 = tpu.matmul %57, %42, %cst_24 {dimension_numbers = #tpu.dot_dimension_numbers<[1], [0], [0], [1], [0, 0, 1, 1], [], []>} : vector<8x8xbf16>, vector<8x64xbf16>, vector<8x64xf32> -> vector<8x64xf32>
    %59 = arith.truncf %58 : vector<8x64xf32> to vector<8x64xbf16>
    %60 = vector.extract_strided_slice %14 {offsets = [64, 0], sizes = [64, 256], strides = [1, 1]} : vector<256x256xbf16> to vector<64x256xbf16>
    %cst_25 = arith.constant dense<0.000000e+00> : vector<8x256xf32>
    %61 = tpu.matmul %59, %60, %cst_25 {dimension_numbers = #tpu.dot_dimension_numbers<[1], [0], [0], [1], [0, 0, 1, 1], [], []>} : vector<8x64xbf16>, vector<64x256xbf16>, vector<8x256xf32> -> vector<8x256xf32>
    %62 = arith.addf %39, %61 : vector<8x256xf32>
    %63 = vector.extract_strided_slice %12 {offsets = [0, 128], sizes = [8, 64], strides = [1, 1]} : vector<8x768xbf16> to vector<8x64xbf16>
    %64 = vector.extract_strided_slice %12 {offsets = [0, 384], sizes = [8, 64], strides = [1, 1]} : vector<8x768xbf16> to vector<8x64xbf16>
    %65 = vector.extract_strided_slice %12 {offsets = [0, 640], sizes = [8, 64], strides = [1, 1]} : vector<8x768xbf16> to vector<8x64xbf16>
    %cst_26 = arith.constant dense<0.000000e+00> : vector<8x8xf32>
    %66 = tpu.matmul %63, %64, %cst_26 {dimension_numbers = #tpu.dot_dimension_numbers<[1], [1], [0], [0], [0, 0, 1, 0], [], []>} : vector<8x64xbf16>, vector<8x64xbf16>, vector<8x8xf32> -> vector<8x8xf32>
    %cst_27 = arith.constant 0.171498582 : f32
    %67 = vector.broadcast %cst_27 : f32 to vector<8x8xf32>
    %68 = arith.mulf %66, %67 : vector<8x8xf32>
    %69 = arith.addf %68, %15 : vector<8x8xf32>
    %cst_28 = arith.constant dense<0xFF800000> : vector<8xf32>
    %70 = vector.multi_reduction <maximumf>, %69, %cst_28 [1] : vector<8x8xf32> to vector<8xf32>
    %71 = vector.shape_cast %70 : vector<8xf32> to vector<8x1xf32>
    %72 = vector.broadcast %71 : vector<8x1xf32> to vector<8x8xf32>
    %73 = arith.subf %69, %72 : vector<8x8xf32>
    %74 = math.exp %73 : vector<8x8xf32>
    %cst_29 = arith.constant dense<0.000000e+00> : vector<8xf32>
    %75 = vector.multi_reduction <add>, %74, %cst_29 [1] : vector<8x8xf32> to vector<8xf32>
    %76 = vector.shape_cast %75 : vector<8xf32> to vector<8x1xf32>
    %77 = tpu.reciprocal %76 {approx = true} : vector<8x1xf32> -> vector<8x1xf32>
    %78 = vector.broadcast %77 : vector<8x1xf32> to vector<8x8xf32>
    %79 = arith.mulf %74, %78 : vector<8x8xf32>
    %80 = arith.truncf %79 : vector<8x8xf32> to vector<8x8xbf16>
    %cst_30 = arith.constant dense<0.000000e+00> : vector<8x64xf32>
    %81 = tpu.matmul %80, %65, %cst_30 {dimension_numbers = #tpu.dot_dimension_numbers<[1], [0], [0], [1], [0, 0, 1, 1], [], []>} : vector<8x8xbf16>, vector<8x64xbf16>, vector<8x64xf32> -> vector<8x64xf32>
    %82 = arith.truncf %81 : vector<8x64xf32> to vector<8x64xbf16>
    %83 = vector.extract_strided_slice %14 {offsets = [128, 0], sizes = [64, 256], strides = [1, 1]} : vector<256x256xbf16> to vector<64x256xbf16>
    %cst_31 = arith.constant dense<0.000000e+00> : vector<8x256xf32>
    %84 = tpu.matmul %82, %83, %cst_31 {dimension_numbers = #tpu.dot_dimension_numbers<[1], [0], [0], [1], [0, 0, 1, 1], [], []>} : vector<8x64xbf16>, vector<64x256xbf16>, vector<8x256xf32> -> vector<8x256xf32>
    %85 = arith.addf %62, %84 : vector<8x256xf32>
    %86 = vector.extract_strided_slice %12 {offsets = [0, 192], sizes = [8, 64], strides = [1, 1]} : vector<8x768xbf16> to vector<8x64xbf16>
    %87 = vector.extract_strided_slice %12 {offsets = [0, 448], sizes = [8, 64], strides = [1, 1]} : vector<8x768xbf16> to vector<8x64xbf16>
    %88 = vector.extract_strided_slice %12 {offsets = [0, 704], sizes = [8, 64], strides = [1, 1]} : vector<8x768xbf16> to vector<8x64xbf16>
    %cst_32 = arith.constant dense<0.000000e+00> : vector<8x8xf32>
    %89 = tpu.matmul %86, %87, %cst_32 {dimension_numbers = #tpu.dot_dimension_numbers<[1], [1], [0], [0], [0, 0, 1, 0], [], []>} : vector<8x64xbf16>, vector<8x64xbf16>, vector<8x8xf32> -> vector<8x8xf32>
    %cst_33 = arith.constant 0.171498582 : f32
    %90 = vector.broadcast %cst_33 : f32 to vector<8x8xf32>
    %91 = arith.mulf %89, %90 : vector<8x8xf32>
    %92 = arith.addf %91, %15 : vector<8x8xf32>
    %cst_34 = arith.constant dense<0xFF800000> : vector<8xf32>
    %93 = vector.multi_reduction <maximumf>, %92, %cst_34 [1] : vector<8x8xf32> to vector<8xf32>
    %94 = vector.shape_cast %93 : vector<8xf32> to vector<8x1xf32>
    %95 = vector.broadcast %94 : vector<8x1xf32> to vector<8x8xf32>
    %96 = arith.subf %92, %95 : vector<8x8xf32>
    %97 = math.exp %96 : vector<8x8xf32>
    %cst_35 = arith.constant dense<0.000000e+00> : vector<8xf32>
    %98 = vector.multi_reduction <add>, %97, %cst_35 [1] : vector<8x8xf32> to vector<8xf32>
    %99 = vector.shape_cast %98 : vector<8xf32> to vector<8x1xf32>
    %100 = tpu.reciprocal %99 {approx = true} : vector<8x1xf32> -> vector<8x1xf32>
    %101 = vector.broadcast %100 : vector<8x1xf32> to vector<8x8xf32>
    %102 = arith.mulf %97, %101 : vector<8x8xf32>
    %103 = arith.truncf %102 : vector<8x8xf32> to vector<8x8xbf16>
    %cst_36 = arith.constant dense<0.000000e+00> : vector<8x64xf32>
    %104 = tpu.matmul %103, %88, %cst_36 {dimension_numbers = #tpu.dot_dimension_numbers<[1], [0], [0], [1], [0, 0, 1, 1], [], []>} : vector<8x8xbf16>, vector<8x64xbf16>, vector<8x64xf32> -> vector<8x64xf32>
    %105 = arith.truncf %104 : vector<8x64xf32> to vector<8x64xbf16>
    %106 = vector.extract_strided_slice %14 {offsets = [192, 0], sizes = [64, 256], strides = [1, 1]} : vector<256x256xbf16> to vector<64x256xbf16>
    %cst_37 = arith.constant dense<0.000000e+00> : vector<8x256xf32>
    %107 = tpu.matmul %105, %106, %cst_37 {dimension_numbers = #tpu.dot_dimension_numbers<[1], [0], [0], [1], [0, 0, 1, 1], [], []>} : vector<8x64xbf16>, vector<64x256xbf16>, vector<8x256xf32> -> vector<8x256xf32>
    %108 = arith.addf %85, %107 : vector<8x256xf32>
    %c0_38 = arith.constant 0 : index
    %c0_39 = arith.constant 0 : index
    %c0_40 = arith.constant 0 : index
    %109 = vector.load %arg7[%c0_38, %c0_39, %c0_40] : memref<1x1x256xf32, #tpu.memory_space<vmem>>, vector<1x1x256xf32>
    %110 = vector.shape_cast %109 : vector<1x1x256xf32> to vector<1x256xf32>
    %111 = vector.broadcast %110 : vector<1x256xf32> to vector<8x256xf32>
    %112 = arith.addf %108, %111 : vector<8x256xf32>
    %113 = arith.addf %3, %112 : vector<8x256xf32>
    %c0_41 = arith.constant 0 : index
    %c0_42 = arith.constant 0 : index
    %c0_43 = arith.constant 0 : index
    %114 = vector.load %arg8[%c0_41, %c0_42, %c0_43] : memref<1x1x256xf32, #tpu.memory_space<vmem>>, vector<1x1x256xf32>
    %115 = vector.shape_cast %114 : vector<1x1x256xf32> to vector<1x256xf32>
    %c0_44 = arith.constant 0 : index
    %c0_45 = arith.constant 0 : index
    %c0_46 = arith.constant 0 : index
    %116 = vector.load %arg9[%c0_44, %c0_45, %c0_46] : memref<1x1x256xf32, #tpu.memory_space<vmem>>, vector<1x1x256xf32>
    %117 = vector.shape_cast %116 : vector<1x1x256xf32> to vector<1x256xf32>
    %cst_47 = arith.constant dense<0.000000e+00> : vector<8xf32>
    %118 = vector.multi_reduction <add>, %113, %cst_47 [1] : vector<8x256xf32> to vector<8xf32>
    %119 = vector.shape_cast %118 : vector<8xf32> to vector<8x1xf32>
    %cst_48 = arith.constant 0.0073529412 : f32
    %120 = vector.broadcast %cst_48 : f32 to vector<8x1xf32>
    %121 = arith.mulf %119, %120 : vector<8x1xf32>
    %122 = arith.mulf %113, %113 : vector<8x256xf32>
    %cst_49 = arith.constant dense<0.000000e+00> : vector<8xf32>
    %123 = vector.multi_reduction <add>, %122, %cst_49 [1] : vector<8x256xf32> to vector<8xf32>
    %124 = vector.shape_cast %123 : vector<8xf32> to vector<8x1xf32>
    %cst_50 = arith.constant 0.0073529412 : f32
    %125 = vector.broadcast %cst_50 : f32 to vector<8x1xf32>
    %126 = arith.mulf %124, %125 : vector<8x1xf32>
    %127 = arith.mulf %121, %121 : vector<8x1xf32>
    %128 = arith.subf %126, %127 : vector<8x1xf32>
    %129 = vector.broadcast %121 : vector<8x1xf32> to vector<8x256xf32>
    %130 = arith.subf %113, %129 : vector<8x256xf32>
    %cst_51 = arith.constant 9.99999974E-6 : f32
    %131 = vector.broadcast %cst_51 : f32 to vector<8x1xf32>
    %132 = arith.addf %128, %131 : vector<8x1xf32>
    %133 = math.rsqrt %132 : vector<8x1xf32>
    %134 = vector.broadcast %133 : vector<8x1xf32> to vector<8x256xf32>
    %135 = arith.mulf %130, %134 : vector<8x256xf32>
    %136 = vector.broadcast %115 : vector<1x256xf32> to vector<8x256xf32>
    %137 = arith.mulf %135, %136 : vector<8x256xf32>
    %138 = vector.broadcast %117 : vector<1x256xf32> to vector<8x256xf32>
    %139 = arith.addf %137, %138 : vector<8x256xf32>
    %140 = arith.truncf %139 : vector<8x256xf32> to vector<8x256xbf16>
    %c0_52 = arith.constant 0 : index
    %c0_53 = arith.constant 0 : index
    %c0_54 = arith.constant 0 : index
    %141 = vector.load %arg10[%c0_52, %c0_53, %c0_54] : memref<1x256x2048xbf16, #tpu.memory_space<vmem>>, vector<1x256x2048xbf16>
    %142 = vector.shape_cast %141 : vector<1x256x2048xbf16> to vector<256x2048xbf16>
    %cst_55 = arith.constant dense<0.000000e+00> : vector<8x2048xf32>
    %143 = tpu.matmul %140, %142, %cst_55 {dimension_numbers = #tpu.dot_dimension_numbers<[1], [0], [0], [1], [0, 0, 1, 1], [], []>} : vector<8x256xbf16>, vector<256x2048xbf16>, vector<8x2048xf32> -> vector<8x2048xf32>
    %c0_56 = arith.constant 0 : index
    %c0_57 = arith.constant 0 : index
    %c0_58 = arith.constant 0 : index
    %144 = vector.load %arg11[%c0_56, %c0_57, %c0_58] : memref<1x1x2048xf32, #tpu.memory_space<vmem>>, vector<1x1x2048xf32>
    %145 = vector.shape_cast %144 : vector<1x1x2048xf32> to vector<1x2048xf32>
    %146 = vector.broadcast %145 : vector<1x2048xf32> to vector<8x2048xf32>
    %147 = arith.addf %143, %146 : vector<8x2048xf32>
    %cst_59 = arith.constant 0.000000e+00 : f32
    %148 = vector.broadcast %cst_59 : f32 to vector<8x2048xf32>
    %149 = arith.maximumf %147, %148 : vector<8x2048xf32>
    %150 = arith.truncf %149 : vector<8x2048xf32> to vector<8x2048xbf16>
    %c0_60 = arith.constant 0 : index
    %c0_61 = arith.constant 0 : index
    %c0_62 = arith.constant 0 : index
    %151 = vector.load %arg12[%c0_60, %c0_61, %c0_62] : memref<1x2048x256xbf16, #tpu.memory_space<vmem>>, vector<1x2048x256xbf16>
    %152 = vector.shape_cast %151 : vector<1x2048x256xbf16> to vector<2048x256xbf16>
    %cst_63 = arith.constant dense<0.000000e+00> : vector<8x256xf32>
    %153 = tpu.matmul %150, %152, %cst_63 {dimension_numbers = #tpu.dot_dimension_numbers<[1], [0], [0], [1], [0, 0, 1, 1], [], []>} : vector<8x2048xbf16>, vector<2048x256xbf16>, vector<8x256xf32> -> vector<8x256xf32>
    %c0_64 = arith.constant 0 : index
    %c0_65 = arith.constant 0 : index
    %c0_66 = arith.constant 0 : index
    %154 = vector.load %arg13[%c0_64, %c0_65, %c0_66] : memref<1x1x256xf32, #tpu.memory_space<vmem>>, vector<1x1x256xf32>
    %155 = vector.shape_cast %154 : vector<1x1x256xf32> to vector<1x256xf32>
    %156 = vector.broadcast %155 : vector<1x256xf32> to vector<8x256xf32>
    %157 = arith.addf %153, %156 : vector<8x256xf32>
    %158 = arith.addf %139, %157 : vector<8x256xf32>
    %c0_67 = arith.constant 0 : index
    %c0_68 = arith.constant 0 : index
    %c0_69 = arith.constant 0 : index
    %159 = vector.load %arg14[%c0_67, %c0_68, %c0_69] : memref<1x1x256xf32, #tpu.memory_space<vmem>>, vector<1x1x256xf32>
    %160 = vector.shape_cast %159 : vector<1x1x256xf32> to vector<1x256xf32>
    %c0_70 = arith.constant 0 : index
    %c0_71 = arith.constant 0 : index
    %c0_72 = arith.constant 0 : index
    %161 = vector.load %arg15[%c0_70, %c0_71, %c0_72] : memref<1x1x256xf32, #tpu.memory_space<vmem>>, vector<1x1x256xf32>
    %162 = vector.shape_cast %161 : vector<1x1x256xf32> to vector<1x256xf32>
    %cst_73 = arith.constant dense<0.000000e+00> : vector<8xf32>
    %163 = vector.multi_reduction <add>, %158, %cst_73 [1] : vector<8x256xf32> to vector<8xf32>
    %164 = vector.shape_cast %163 : vector<8xf32> to vector<8x1xf32>
    %cst_74 = arith.constant 0.0073529412 : f32
    %165 = vector.broadcast %cst_74 : f32 to vector<8x1xf32>
    %166 = arith.mulf %164, %165 : vector<8x1xf32>
    %167 = arith.mulf %158, %158 : vector<8x256xf32>
    %cst_75 = arith.constant dense<0.000000e+00> : vector<8xf32>
    %168 = vector.multi_reduction <add>, %167, %cst_75 [1] : vector<8x256xf32> to vector<8xf32>
    %169 = vector.shape_cast %168 : vector<8xf32> to vector<8x1xf32>
    %cst_76 = arith.constant 0.0073529412 : f32
    %170 = vector.broadcast %cst_76 : f32 to vector<8x1xf32>
    %171 = arith.mulf %169, %170 : vector<8x1xf32>
    %172 = arith.mulf %166, %166 : vector<8x1xf32>
    %173 = arith.subf %171, %172 : vector<8x1xf32>
    %174 = vector.broadcast %166 : vector<8x1xf32> to vector<8x256xf32>
    %175 = arith.subf %158, %174 : vector<8x256xf32>
    %cst_77 = arith.constant 9.99999974E-6 : f32
    %176 = vector.broadcast %cst_77 : f32 to vector<8x1xf32>
    %177 = arith.addf %173, %176 : vector<8x1xf32>
    %178 = math.rsqrt %177 : vector<8x1xf32>
    %179 = vector.broadcast %178 : vector<8x1xf32> to vector<8x256xf32>
    %180 = arith.mulf %175, %179 : vector<8x256xf32>
    %181 = vector.broadcast %160 : vector<1x256xf32> to vector<8x256xf32>
    %182 = arith.mulf %180, %181 : vector<8x256xf32>
    %183 = vector.broadcast %162 : vector<1x256xf32> to vector<8x256xf32>
    %184 = arith.addf %182, %183 : vector<8x256xf32>
    %c0_78 = arith.constant 0 : index
    %c0_79 = arith.constant 0 : index
    %185 = vector.load %arg19[%c0_78, %c0_79] : memref<8x256xf32, #tpu.memory_space<vmem>>, vector<8x256xf32>
    tpu.vector_store %arg19[%c0_78, %c0_79], %184 {strides = array<i32>} : memref<8x256xf32, #tpu.memory_space<vmem>>, vector<8x256xf32>,
    %c5_i32 = arith.constant 5 : i32
    %186 = arith.cmpi eq, %arg1, %c5_i32 : i32
    %187 = arith.extui %186 : i1 to i32
    %c0_i32_80 = arith.constant 0 : i32
    %188 = arith.cmpi ne, %187, %c0_i32_80 : i32
    scf.if %188 {
      %189 = arith.truncf %184 : vector<8x256xf32> to vector<8x256xbf16>
      %c0_81 = arith.constant 0 : index
      %c0_82 = arith.constant 0 : index
      %190 = vector.load %arg16[%c0_81, %c0_82] : memref<256x512xbf16, #tpu.memory_space<vmem>>, vector<256x512xbf16>
      %cst_83 = arith.constant dense<0.000000e+00> : vector<8x512xf32>
      %191 = tpu.matmul %189, %190, %cst_83 {dimension_numbers = #tpu.dot_dimension_numbers<[1], [0], [0], [1], [0, 0, 1, 1], [], []>} : vector<8x256xbf16>, vector<256x512xbf16>, vector<8x512xf32> -> vector<8x512xf32>
      %c0_84 = arith.constant 0 : index
      %c0_85 = arith.constant 0 : index
      %192 = vector.load %arg17[%c0_84, %c0_85] : memref<1x512xf32, #tpu.memory_space<vmem>>, vector<1x512xf32>
      %193 = vector.broadcast %192 : vector<1x512xf32> to vector<8x512xf32>
      %194 = arith.addf %191, %193 : vector<8x512xf32>
      %c0_86 = arith.constant 0 : index
      %c0_87 = arith.constant 0 : index
      %195 = vector.load %arg18[%c0_86, %c0_87] : memref<8x512xf32, #tpu.memory_space<vmem>>, vector<8x512xf32>
      tpu.vector_store %arg18[%c0_86, %c0_87], %194 {strides = array<i32>} : memref<8x512xf32, #tpu.memory_space<vmem>>, vector<8x512xf32>,
    } else {
    }
    return
  }
  func.func @transform_0(%arg0: i32, %arg1: i32) -> (i32, i32) {
    %c0_i32 = arith.constant 0 : i32
    %c0_i32_0 = arith.constant 0 : i32
    return %arg0, %c0_i32 : i32, i32
  }
  func.func @transform_1(%arg0: i32, %arg1: i32) -> (i32, i32) {
    %c0_i32 = arith.constant 0 : i32
    %c0_i32_0 = arith.constant 0 : i32
    %c0_i32_1 = arith.constant 0 : i32
    return %c0_i32, %c0_i32_0 : i32, i32
  }
  func.func @transform_2(%arg0: i32, %arg1: i32) -> (i32, i32, i32) {
    %c0_i32 = arith.constant 0 : i32
    %c0_i32_0 = arith.constant 0 : i32
    %c0_i32_1 = arith.constant 0 : i32
    return %arg1, %c0_i32, %c0_i32_0 : i32, i32, i32
  }
  func.func @transform_3(%arg0: i32, %arg1: i32) -> (i32, i32, i32) {
    %c0_i32 = arith.constant 0 : i32
    %c0_i32_0 = arith.constant 0 : i32
    %c0_i32_1 = arith.constant 0 : i32
    return %arg1, %c0_i32, %c0_i32_0 : i32, i32, i32
  }
  func.func @transform_4(%arg0: i32, %arg1: i32) -> (i32, i32, i32) {
    %c0_i32 = arith.constant 0 : i32
    %c0_i32_0 = arith.constant 0 : i32
    %c0_i32_1 = arith.constant 0 : i32
    return %arg1, %c0_i32, %c0_i32_0 : i32, i32, i32
  }
  func.func @transform_5(%arg0: i32, %arg1: i32) -> (i32, i32, i32) {
    %c0_i32 = arith.constant 0 : i32
    %c0_i32_0 = arith.constant 0 : i32
    %c0_i32_1 = arith.constant 0 : i32
    return %arg1, %c0_i32, %c0_i32_0 : i32, i32, i32
  }
  func.func @transform_6(%arg0: i32, %arg1: i32) -> (i32, i32, i32) {
    %c0_i32 = arith.constant 0 : i32
    %c0_i32_0 = arith.constant 0 : i32
    %c0_i32_1 = arith.constant 0 : i32
    return %arg1, %c0_i32, %c0_i32_0 : i32, i32, i32
  }
  func.func @transform_7(%arg0: i32, %arg1: i32) -> (i32, i32, i32) {
    %c0_i32 = arith.constant 0 : i32
    %c0_i32_0 = arith.constant 0 : i32
    %c0_i32_1 = arith.constant 0 : i32
    return %arg1, %c0_i32, %c0_i32_0 : i32, i32, i32
  }
  func.func @transform_8(%arg0: i32, %arg1: i32) -> (i32, i32, i32) {
    %c0_i32 = arith.constant 0 : i32
    %c0_i32_0 = arith.constant 0 : i32
    %c0_i32_1 = arith.constant 0 : i32
    return %arg1, %c0_i32, %c0_i32_0 : i32, i32, i32
  }
  func.func @transform_9(%arg0: i32, %arg1: i32) -> (i32, i32, i32) {
    %c0_i32 = arith.constant 0 : i32
    %c0_i32_0 = arith.constant 0 : i32
    %c0_i32_1 = arith.constant 0 : i32
    return %arg1, %c0_i32, %c0_i32_0 : i32, i32, i32
  }
  func.func @transform_10(%arg0: i32, %arg1: i32) -> (i32, i32, i32) {
    %c0_i32 = arith.constant 0 : i32
    %c0_i32_0 = arith.constant 0 : i32
    %c0_i32_1 = arith.constant 0 : i32
    return %arg1, %c0_i32, %c0_i32_0 : i32, i32, i32
  }
  func.func @transform_11(%arg0: i32, %arg1: i32) -> (i32, i32, i32) {
    %c0_i32 = arith.constant 0 : i32
    %c0_i32_0 = arith.constant 0 : i32
    %c0_i32_1 = arith.constant 0 : i32
    return %arg1, %c0_i32, %c0_i32_0 : i32, i32, i32
  }
  func.func @transform_12(%arg0: i32, %arg1: i32) -> (i32, i32, i32) {
    %c0_i32 = arith.constant 0 : i32
    %c0_i32_0 = arith.constant 0 : i32
    %c0_i32_1 = arith.constant 0 : i32
    return %arg1, %c0_i32, %c0_i32_0 : i32, i32, i32
  }
  func.func @transform_13(%arg0: i32, %arg1: i32) -> (i32, i32, i32) {
    %c0_i32 = arith.constant 0 : i32
    %c0_i32_0 = arith.constant 0 : i32
    %c0_i32_1 = arith.constant 0 : i32
    return %arg1, %c0_i32, %c0_i32_0 : i32, i32, i32
  }
  func.func @transform_14(%arg0: i32, %arg1: i32) -> (i32, i32) {
    %c0_i32 = arith.constant 0 : i32
    %c0_i32_0 = arith.constant 0 : i32
    %c0_i32_1 = arith.constant 0 : i32
    return %c0_i32, %c0_i32_0 : i32, i32
  }
  func.func @transform_15(%arg0: i32, %arg1: i32) -> (i32, i32) {
    %c0_i32 = arith.constant 0 : i32
    %c0_i32_0 = arith.constant 0 : i32
    %c0_i32_1 = arith.constant 0 : i32
    return %c0_i32, %c0_i32_0 : i32, i32
  }
  func.func @transform_16(%arg0: i32, %arg1: i32) -> (i32, i32) {
    %c0_i32 = arith.constant 0 : i32
    %c0_i32_0 = arith.constant 0 : i32
    return %arg0, %c0_i32 : i32, i32
  }
}

</mosaic_0001>

<bundles_post_ra>
// kernel: video_transformer.2
= control target key start
LH: loop header
LB: loop body
LE: loop exit
PB: predicated region body
PF: predicated region fallthrough
CT: control target
= control target key end

     0   :  { %v36_v0 = vlaneseq  ;;  %v904_v1 = vmov 1983009808   ;;  %v905_v3 = vmov 0   ;;  %vm113_vm0 = vcmask 1041408   ;;  %s1244_s0 = inlined_call_operand.vmem [shape: f32[8,2,256], index: 0, kind: input, shape index: {}]   ;;  %s1245_s1 = inlined_call_operand.vmem [shape: f32[8,1,1], index: 1, kind: input, shape index: {}]   ;;  %s1246_s2 = inlined_call_operand.vmem [shape: f32[8,1,1], index: 2, kind: input, shape index: {}]   ;;  %s1247_s3 = inlined_call_operand.vmem [shape: f32[1,2,256], index: 3, kind: input, shape index: {}]   ;;  %s1248_s4 = inlined_call_operand.vmem [shape: f32[8,2,256], index: 4, kind: output, shape index: {}]  }
   0x1   :  { %v34_v2 = vunpack.c.l.s4 %v904_v1  ;;  %887 = vset.pattern.permute.xlu1 %v905_v3  ;;  %886 = vset.pattern.permute.xlu0 %v905_v3  ;;  %v935_v5 = vld [vmem:[%s1244_s0 + $0x8] sm:$0xf]  ;;  %v940_v7 = vld [vmem:[%s1244_s0] sm:$0xf]  ;;  %v945_v8 = vld [vmem:[%s1244_s0 + $0xc] sm:$0xf] }
   0x2   :  { %v37_v4 = vshrl.u32 %v36_v0, 7  ;;  %v950_v9 = vld [vmem:[%s1244_s0 + $0x4] sm:$0xf]  ;;  %v957_v11 = vld [vmem:[%s1244_s0 + $0x14] sm:$0xf]  ;;  %v218_v14 = vmul.f32 %v940_v7, %v940_v7  ;;  %v221_v42 = vmul.f32 %v945_v8, %v945_v8  ;;  %v220_v43 = vmul.f32 %v935_v5, %v935_v5 }
   0x3   :  { %v35_v6 = vunpack.c.0.s8 %v34_v2  ;;  %v962_v12 = vld [vmem:[%s1244_s0 + $0x10] sm:$0xf]  ;;  %v967_v13 = vld [vmem:[%s1244_s0 + $0x1c] sm:$0xf]  ;;  %v982_v19 = vld [vmem:[%s1244_s0 + $0x18] sm:$0xf]  ;;  %v219_v23 = vmul.f32 %v950_v9, %v950_v9  ;;  %v223_v55 = vmul.f32 %v957_v11, %v957_v11 }
   0x4   :  { %v222_v56 = vmul.f32 %v962_v12, %v962_v12 }
   0x5   :  { %v952_v10 = vsub.s32 %v35_v6, %v37_v4  ;;  %v225_v4 = vmul.f32 %v967_v13, %v967_v13  ;;  %v224_v6 = vmul.f32 %v982_v19, %v982_v19 }
   0x7   :  { %v55_v15 = vrot.slane %v935_v5, %v952_v10  ;;  %v39_v16 = vrot.slane %v940_v7, %v952_v10  ;;  %v63_v17 = vrot.slane %v945_v8, %v952_v10  ;;  %v47_v18 = vrot.slane %v950_v9, %v952_v10 }
   0x8   :  { %v79_v20 = vrot.slane %v957_v11, %v952_v10  ;;  %v71_v21 = vrot.slane %v962_v12, %v952_v10  ;;  %v95_v22 = vrot.slane %v967_v13, %v952_v10  ;;  %v87_v31 = vrot.slane %v982_v19, %v952_v10 }
   0x9   :  { %v56_v24 = vcombine.high %v55_v15, %v55_v15  ;;  %v124_v25 = vsel %vm113_vm0, %v55_v15, 0.0  ;;  %v40_v26 = vcombine.high %v39_v16, %v39_v16  ;;  %v114_v27 = vsel %vm113_vm0, %v39_v16, 0.0 }
   0xa   :  { %v64_v28 = vcombine.high %v63_v17, %v63_v17  ;;  %v129_v29 = vsel %vm113_vm0, %v63_v17, 0.0  ;;  %v48_v30 = vcombine.high %v47_v18, %v47_v18  ;;  %v119_v34 = vsel %vm113_vm0, %v47_v18, 0.0 }
   0xb   :  { %v125_v32 = vsel %vm113_vm0, %v56_v24, 0.0  ;;  %v115_v33 = vsel %vm113_vm0, %v40_v26, 0.0  ;;  %v80_v35 = vcombine.high %v79_v20, %v79_v20  ;;  %v139_v40 = vsel %vm113_vm0, %v79_v20, 0.0 }
   0xc   :  { %v126_v36 = vadd.f32 %v125_v32, %v124_v25  ;;  %v116_v37 = vadd.f32 %v115_v33, %v114_v27  ;;  %v130_v38 = vsel %vm113_vm0, %v64_v28, 0.0  ;;  %v120_v39 = vsel %vm113_vm0, %v48_v30, 0.0 }
   0xd   :  { %v72_v41 = vcombine.high %v71_v21, %v71_v21  ;;  %v131_v44 = vadd.f32 %v130_v38, %v129_v29  ;;  %v121_v45 = vadd.f32 %v120_v39, %v119_v34  ;;  %v140_v46 = vsel %vm113_vm0, %v80_v35, 0.0 }
   0xe   :  { %127 = vadd.xlane.f32.xlu1 %v126_v36  ;;  %117 = vadd.xlane.f32.xlu0 %v116_v37  ;;  %v96_v47 = vcombine.high %v95_v22, %v95_v22  ;;  %v134_v48 = vsel %vm113_vm0, %v71_v21, 0.0  ;;  %v88_v50 = vcombine.high %v87_v31, %v87_v31  ;;  %v248_v51 = vrot.slane %v219_v23, %v952_v10 }
   0xf   :  { %v135_v49 = vsel %vm113_vm0, %v72_v41, 0.0  ;;  %v240_v52 = vrot.slane %v218_v14, %v952_v10  ;;  %v141_v53 = vadd.f32 %v140_v46, %v139_v40  ;;  %v149_v54 = vsel %vm113_vm0, %v95_v22, 0.0 }
  0x10   :  { %v136_v57 = vadd.f32 %v135_v49, %v134_v48  ;;  %v150_v58 = vsel %vm113_vm0, %v96_v47, 0.0  ;;  %v249_v59 = vcombine.high %v248_v51, %v248_v51  ;;  %v264_v60 = vrot.slane %v221_v42, %v952_v10  ;;  %v861_v49 = vld [vmem:[%s1245_s1 + $0x1] ss:$0 sm:$0xff] }
  0x11   :  { %v144_v61 = vsel %vm113_vm0, %v87_v31, 0.0  ;;  %v145_v62 = vsel %vm113_vm0, %v88_v50, 0.0  ;;  %v241_v63 = vcombine.high %v240_v52, %v240_v52  ;;  %v256_v1 = vrot.slane %v220_v43, %v952_v10  ;;  %v862_v50 = vld [vmem:[%s1245_s1 + $0x2] ss:$0 sm:$0xff] }
  0x12   :  { %132 = vadd.xlane.f32.xlu1 %v131_v44  ;;  %122 = vadd.xlane.f32.xlu0 %v121_v45  ;;  %v151_v2 = vadd.f32 %v150_v58, %v149_v54  ;;  %v319_v3 = vsel %vm113_vm0, %v248_v51, 0.0  ;;  %v146_v14 = vadd.f32 %v145_v62, %v144_v61  ;;  %v320_v15 = vsel %vm113_vm0, %v249_v59, 0.0  ;;  %v860_v51 = vld [vmem:[%s1245_s1] ss:$0 sm:$0xff]  ;;  %v864_v54 = vld [vmem:[%s1245_s1 + $0x4] ss:$0 sm:$0xff] }
  0x13   :  { %v265_v16 = vcombine.high %v264_v60, %v264_v60  ;;  %v280_v17 = vrot.slane %v223_v55, %v952_v10  ;;  %v314_v18 = vsel %vm113_vm0, %v240_v52, 0.0  ;;  %v315_v20 = vsel %vm113_vm0, %v241_v63, 0.0  ;;  %v863_v52 = vld [vmem:[%s1245_s1 + $0x3] ss:$0 sm:$0xff]  ;;  %v866_v58 = vld [vmem:[%s1245_s1 + $0x6] ss:$0 sm:$0xff] }
  0x14   :  { %v257_v21 = vcombine.high %v256_v1, %v256_v1  ;;  %v272_v22 = vrot.slane %v222_v56, %v952_v10  ;;  %v321_v23 = vadd.f32 %v320_v15, %v319_v3  ;;  %v329_v24 = vsel %vm113_vm0, %v264_v60, 0.0  ;;  %v871_v55 = vld [vmem:[%s1246_s2 + $0x3] ss:$0 sm:$0xff]  ;;  %v865_v56 = vld [vmem:[%s1245_s1 + $0x5] ss:$0 sm:$0xff] }
  0x15   :  { %v316_v25 = vadd.f32 %v315_v20, %v314_v18  ;;  %v330_v26 = vsel %vm113_vm0, %v265_v16, 0.0  ;;  %v324_v27 = vsel %vm113_vm0, %v256_v1, 0.0  ;;  %v281_v28 = vcombine.high %v280_v17, %v280_v17  ;;  %v875_v59 = vld [vmem:[%s1246_s2 + $0x7] ss:$0 sm:$0xff]  ;;  %v868_v61 = vld [vmem:[%s1246_s2] ss:$0 sm:$0xff] }
  0x16   :  { %142 = vadd.xlane.f32.xlu1 %v141_v53  ;;  %137 = vadd.xlane.f32.xlu0 %v136_v57  ;;  %v325_v29 = vsel %vm113_vm0, %v257_v21, 0.0  ;;  %v273_v30 = vcombine.high %v272_v22, %v272_v22  ;;  %v296_v31 = vrot.slane %v225_v4, %v952_v10  ;;  %v288_v32 = vrot.slane %v224_v6, %v952_v10  ;;  %v869_v53 = vld [vmem:[%s1246_s2 + $0x1] ss:$0 sm:$0xff]  ;;  %v873_v57 = vld [vmem:[%s1246_s2 + $0x5] ss:$0 sm:$0xff] }
  0x17   :  { %v331_v33 = vadd.f32 %v330_v26, %v329_v24  ;;  %v326_v34 = vadd.f32 %v325_v29, %v324_v27  ;;  %v339_v35 = vsel %vm113_vm0, %v280_v17, 0.0  ;;  %v334_v36 = vsel %vm113_vm0, %v272_v22, 0.0  ;;  %v867_v60 = vld [vmem:[%s1245_s1 + $0x7] ss:$0 sm:$0xff]  ;;  %v870_v62 = vld [vmem:[%s1246_s2 + $0x2] ss:$0 sm:$0xff] }
  0x18   :  { %v340_v37 = vsel %vm113_vm0, %v281_v28, 0.0  ;;  %v335_v38 = vsel %vm113_vm0, %v273_v30, 0.0  ;;  %v297_v39 = vcombine.high %v296_v31, %v296_v31  ;;  %v289_v40 = vcombine.high %v288_v32, %v288_v32  ;;  %v872_v63 = vld [vmem:[%s1246_s2 + $0x4] ss:$0 sm:$0xff]  ;;  %v874_v1 = vld [vmem:[%s1246_s2 + $0x6] ss:$0 sm:$0xff] }
  0x19   :  { %v341_v41 = vadd.f32 %v340_v37, %v339_v35  ;;  %v336_v42 = vadd.f32 %v335_v38, %v334_v36  ;;  %v349_v43 = vsel %vm113_vm0, %v296_v31, 0.0  ;;  %v344_v45 = vsel %vm113_vm0, %v288_v32, 0.0 }
  0x1a   :  { %152 = vadd.xlane.f32.xlu1 %v151_v2  ;;  %147 = vadd.xlane.f32.xlu0 %v146_v14  ;;  %v350_v44 = vsel %vm113_vm0, %v297_v39, 0.0  ;;  %v345_v46 = vsel %vm113_vm0, %v289_v40, 0.0 }
  0x1b   :  { %v351_v47 = vadd.f32 %v350_v44, %v349_v43  ;;  %v346_v48 = vadd.f32 %v345_v46, %v344_v45 }
  0x1e   :  { %322 = vadd.xlane.f32.xlu1 %v321_v23  ;;  %317 = vadd.xlane.f32.xlu0 %v316_v25 }
  0x22   :  { %332 = vadd.xlane.f32.xlu1 %v331_v33  ;;  %327 = vadd.xlane.f32.xlu0 %v326_v34 }
  0x26   :  { %342 = vadd.xlane.f32.xlu1 %v341_v41  ;;  %337 = vadd.xlane.f32.xlu0 %v336_v42 }
  0x2a   :  { %352 = vadd.xlane.f32.xlu1 %v351_v47  ;;  %347 = vadd.xlane.f32.xlu0 %v346_v48 }
  0x3b   :  { %519 = vperm.xlu1 %887, %v861_v49  }
  0x3f   :  { %523 = vperm.xlu1 %887, %v862_v50  }
  0x40   :  { %515 = vperm.xlu0 %886, %v860_v51  }
  0x43   :  { %527 = vperm.xlu1 %887, %v863_v52  }
  0x44   :  { %607 = vperm.xlu0 %886, %v869_v53  }
  0x47   :  { %531 = vperm.xlu1 %887, %v864_v54  }
  0x48   :  { %615 = vperm.xlu0 %886, %v871_v55  }
  0x4b   :  { %535 = vperm.xlu1 %887, %v865_v56  }
  0x4c   :  { %623 = vperm.xlu0 %886, %v873_v57  }
  0x4f   :  { %539 = vperm.xlu1 %887, %v866_v58  }
  0x50   :  { %631 = vperm.xlu0 %886, %v875_v59  }
  0x53   :  { %543 = vperm.xlu1 %887, %v867_v60  }
  0x57   :  { %603 = vperm.xlu1 %887, %v868_v61  }
  0x5b   :  { %611 = vperm.xlu1 %887, %v870_v62  }
  0x5f   :  { %619 = vperm.xlu1 %887, %v872_v63  }
  0x63   :  { %627 = vperm.xlu1 %887, %v874_v1  }
  0x9b   :  { %v128_v2 = vpop.xlane.xlu1 %127  ;;  %v118_v3 = vpop.xlane.xlu0 %117 }
  0x9c   :  { %v168_v4 = vsel %vm113_vm0, %v128_v2, 0.0  ;;  %v154_v6 = vsel %vm113_vm0, %v118_v3, 0.0 }
  0x9d   :  { %v169_v14 = vrot.slane %v168_v4, 4  ;;  %v155_v15 = vrot.slane %v154_v6, 4 }
  0x9f   :  { %v170_v16 = vadd.f32 %v169_v14, %v168_v4  ;;  %v156_v17 = vadd.f32 %v155_v15, %v154_v6  ;;  %v133_v18 = vpop.xlane.xlu1 %132  ;;  %v123_v20 = vpop.xlane.xlu0 %122 }
  0xa0   :  { %v175_v21 = vsel %vm113_vm0, %v133_v18, 0.0  ;;  %v161_v22 = vsel %vm113_vm0, %v123_v20, 0.0 }
  0xa1   :  { %v171_v23 = vrot.slane %v170_v16, 2  ;;  %v157_v24 = vrot.slane %v156_v17, 2  ;;  %v176_v25 = vrot.slane %v175_v21, 4  ;;  %v162_v26 = vrot.slane %v161_v22, 4 }
  0xa3   :  { %v172_v27 = vadd.f32 %v171_v23, %v170_v16  ;;  %v158_v28 = vadd.f32 %v157_v24, %v156_v17  ;;  %v177_v29 = vadd.f32 %v176_v25, %v175_v21  ;;  %v163_v30 = vadd.f32 %v162_v26, %v161_v22  ;;  %v143_v31 = vpop.xlane.xlu1 %142  ;;  %v138_v32 = vpop.xlane.xlu0 %137 }
  0xa4   :  { %v189_v33 = vsel %vm113_vm0, %v143_v31, 0.0  ;;  %v182_v34 = vsel %vm113_vm0, %v138_v32, 0.0 }
  0xa5   :  { %v173_v35 = vrot.slane %v172_v27, 1  ;;  %v159_v36 = vrot.slane %v158_v28, 1  ;;  %v178_v37 = vrot.slane %v177_v29, 2  ;;  %v164_v38 = vrot.slane %v163_v30, 2 }
  0xa6   :  { %v190_v39 = vrot.slane %v189_v33, 4  ;;  %v183_v40 = vrot.slane %v182_v34, 4 }
  0xa7   :  { %v179_v41 = vadd.f32 %v178_v37, %v177_v29  ;;  %v165_v42 = vadd.f32 %v164_v38, %v163_v30  ;;  %v153_v43 = vpop.xlane.xlu1 %152  ;;  %v148_v44 = vpop.xlane.xlu0 %147  ;;  %v174_v49 = vadd.f32 %v173_v35, %v172_v27  ;;  %v160_v50 = vadd.f32 %v159_v36, %v158_v28 }
  0xa8   :  { %v191_v45 = vadd.f32 %v190_v39, %v189_v33  ;;  %v184_v46 = vadd.f32 %v183_v40, %v182_v34  ;;  %v203_v47 = vsel %vm113_vm0, %v153_v43, 0.0  ;;  %v196_v48 = vsel %vm113_vm0, %v148_v44, 0.0 }
  0xa9   :  { %v180_v51 = vrot.slane %v179_v41, 1  ;;  %v166_v52 = vrot.slane %v165_v42, 1  ;;  %v204_v55 = vrot.slane %v203_v47, 4  ;;  %v197_v56 = vrot.slane %v196_v48, 4 }
  0xaa   :  { %v192_v53 = vrot.slane %v191_v45, 2  ;;  %v185_v54 = vrot.slane %v184_v46, 2  ;;  %v1102_v2 = vmul.f32 0.0036764706, %v174_v49  ;;  %v1106_v6 = vmul.f32 0.0036764706, %v160_v50 }
  0xab   :  { %v181_v57 = vadd.f32 %v180_v51, %v179_v41  ;;  %v167_v58 = vadd.f32 %v166_v52, %v165_v42  ;;  %v323_v59 = vpop.xlane.xlu1 %322  ;;  %v318_v60 = vpop.xlane.xlu0 %317  ;;  %v205_v63 = vadd.f32 %v204_v55, %v203_v47  ;;  %v198_v1 = vadd.f32 %v197_v56, %v196_v48 }
  0xac   :  { %v193_v61 = vadd.f32 %v192_v53, %v191_v45  ;;  %v186_v62 = vadd.f32 %v185_v54, %v184_v46  ;;  %v361_v3 = vsel %vm113_vm0, %v323_v59, 0.0  ;;  %v354_v4 = vsel %vm113_vm0, %v318_v60, 0.0 }
  0xad   :  { %v206_v16 = vrot.slane %v205_v63, 2  ;;  %v362_v17 = vrot.slane %v361_v3, 4  ;;  %v355_v18 = vrot.slane %v354_v4, 4  ;;  %v1108_v22 = vmul.f32 0.0036764706, %v181_v57 }
  0xae   :  { %v194_v14 = vrot.slane %v193_v61, 1  ;;  %v187_v15 = vrot.slane %v186_v62, 1  ;;  %v1110_v23 = vmul.f32 0.0036764706, %v167_v58  ;;  %v199_v25 = vrot.slane %v198_v1, 2 }
  0xaf   :  { %v333_v20 = vpop.xlane.xlu1 %332  ;;  %v328_v21 = vpop.xlane.xlu0 %327  ;;  %v363_v26 = vadd.f32 %v362_v17, %v361_v3  ;;  %v356_v27 = vadd.f32 %v355_v18, %v354_v4  ;;  %v1116_v30 = vmul.f32 %v1102_v2, %v1102_v2  ;;  %v418_v31 = vmul.f32 %v1106_v6, %v1106_v6 }
  0xb0   :  { %v195_v24 = vadd.f32 %v194_v14, %v193_v61  ;;  %v375_v28 = vsel %vm113_vm0, %v333_v20, 0.0  ;;  %v368_v29 = vsel %vm113_vm0, %v328_v21, 0.0  ;;  %v188_v32 = vadd.f32 %v187_v15, %v186_v62 }
  0xb1   :  { %v207_v33 = vadd.f32 %v206_v16, %v205_v63  ;;  %v364_v34 = vrot.slane %v363_v26, 2  ;;  %v357_v35 = vrot.slane %v356_v27, 2  ;;  %v376_v36 = vrot.slane %v375_v28, 4 }
  0xb2   :  { %v369_v37 = vrot.slane %v368_v29, 4  ;;  %v1122_v40 = vmul.f32 %v1108_v22, %v1108_v22  ;;  %v419_v41 = vmul.f32 %v1110_v23, %v1110_v23  ;;  %v1126_v42 = vmul.f32 0.0036764706, %v195_v24 }
  0xb3   :  { %v343_v38 = vpop.xlane.xlu1 %342  ;;  %v338_v39 = vpop.xlane.xlu0 %337  ;;  %v200_v43 = vadd.f32 %v199_v25, %v198_v1  ;;  %v365_v44 = vadd.f32 %v364_v34, %v363_v26  ;;  %v358_v45 = vadd.f32 %v357_v35, %v356_v27  ;;  %v377_v46 = vadd.f32 %v376_v36, %v375_v28 }
  0xb4   :  { %v370_v47 = vadd.f32 %v369_v37, %v368_v29  ;;  %v1128_v48 = vmul.f32 0.0036764706, %v188_v32  ;;  %v208_v49 = vrot.slane %v207_v33, 1  ;;  %v389_v50 = vsel %vm113_vm0, %v343_v38, 0.0 }
  0xb5   :  { %v382_v51 = vsel %vm113_vm0, %v338_v39, 0.0  ;;  %v366_v52 = vrot.slane %v365_v44, 1  ;;  %v359_v53 = vrot.slane %v358_v45, 1  ;;  %v378_v54 = vrot.slane %v377_v46, 2 }
  0xb6   :  { %v371_v55 = vrot.slane %v370_v47, 2  ;;  %v1134_v58 = vmul.f32 %v1126_v42, %v1126_v42  ;;  %v201_v59 = vrot.slane %v200_v43, 1  ;;  %v390_v60 = vrot.slane %v389_v50, 4 }
  0xb7   :  { %v353_v56 = vpop.xlane.xlu1 %352  ;;  %v348_v57 = vpop.xlane.xlu0 %347  ;;  %v383_v61 = vrot.slane %v382_v51, 4  ;;  %v367_v62 = vadd.f32 %v366_v52, %v365_v44  ;;  %v360_v63 = vadd.f32 %v359_v53, %v358_v45  ;;  %v379_v1 = vadd.f32 %v378_v54, %v377_v46 }
  0xb8   :  { %v372_v3 = vadd.f32 %v371_v55, %v370_v47  ;;  %v391_v4 = vadd.f32 %v390_v60, %v389_v50  ;;  %v403_v15 = vsel %vm113_vm0, %v353_v56, 0.0  ;;  %v396_v16 = vsel %vm113_vm0, %v348_v57, 0.0 }
  0xb9   :  { %v384_v14 = vadd.f32 %v383_v61, %v382_v51  ;;  %v411_v17 = vmul.f32 0.0036764706, %v367_v62  ;;  %v410_v18 = vmul.f32 0.0036764706, %v360_v63  ;;  %v380_v20 = vrot.slane %v379_v1, 1 }
  0xba   :  { %v373_v21 = vrot.slane %v372_v3, 1  ;;  %v392_v25 = vrot.slane %v391_v4, 2  ;;  %v404_v27 = vrot.slane %v403_v15, 4  ;;  %v397_v28 = vrot.slane %v396_v16, 4 }
  0xbb   :  { %v1138_v24 = vpop.permute.xlu1 %519  ;;  %v385_v26 = vrot.slane %v384_v14, 2  ;;  %v427_v29 = vsub.f32 %v411_v17, %v419_v41  ;;  %v426_v32 = vsub.f32 %v410_v18, %v418_v31  ;;  %v381_v34 = vadd.f32 %v380_v20, %v379_v1 }
  0xbc   :  { %v374_v35 = vadd.f32 %v373_v21, %v372_v3  ;;  %v393_v36 = vadd.f32 %v392_v25, %v391_v4  ;;  %v405_v38 = vadd.f32 %v404_v27, %v403_v15  ;;  %v398_v39 = vadd.f32 %v397_v28, %v396_v16 }
  0xbd   :  { %v386_v37 = vadd.f32 %v385_v26, %v384_v14  ;;  %v209_v44 = vadd.f32 %v208_v49, %v207_v33  ;;  %v443_v45 = vadd.f32 1e-05, %v427_v29  ;;  %v442_v46 = vadd.f32 1e-05, %v426_v32 }
  0xbe   :  { %v413_v47 = vmul.f32 0.0036764706, %v381_v34  ;;  %v412_v51 = vmul.f32 0.0036764706, %v374_v35  ;;  %v394_v52 = vrot.slane %v393_v36, 1  ;;  %v406_v54 = vrot.slane %v405_v38, 2 }
  0xbf   :  { %v1140_v50 = vpop.permute.xlu1 %523  ;;  %v387_v53 = vrot.slane %v386_v37, 1  ;;  %v202_v55 = vadd.f32 %v201_v59, %v200_v43  ;;  %888 = vrsqrt.f32 %v443_v45  ;;  %v399_v41 = vrot.slane %v398_v39, 2  ;;  %v516_v15 = vpop.permute.xlu0 %515 }
  0xc0   :  { %v429_v31 = vsub.f32 %v413_v47, %v1122_v40  ;;  %v422_v56 = vmul.f32 %v1128_v48, %v1128_v48  ;;  %v428_v57 = vsub.f32 %v412_v51, %v1116_v30  ;;  %v395_v33 = vadd.f32 %v394_v52, %v393_v36 }
  0xc1   :  { %v388_v49 = vadd.f32 %v387_v53, %v386_v37  ;;  %v1146_v60 = vmul.f32 0.0036764706, %v209_v44  ;;  %v407_v62 = vadd.f32 %v406_v54, %v405_v38  ;;  %v400_v63 = vadd.f32 %v399_v41, %v398_v39 }
  0xc2   :  { %v445_v61 = vadd.f32 1e-05, %v429_v31  ;;  %890 = vrsqrt.f32 %v442_v46  ;;  %v444_v3 = vadd.f32 1e-05, %v428_v57  ;;  %v415_v43 = vmul.f32 0.0036764706, %v395_v33 }
  0xc3   :  { %v528_v1 = vpop.permute.xlu1 %527  ;;  %v414_v59 = vmul.f32 0.0036764706, %v388_v49  ;;  %v1148_v4 = vmul.f32 0.0036764706, %v202_v55  ;;  %v408_v40 = vrot.slane %v407_v62, 1  ;;  %v401_v14 = vrot.slane %v400_v63, 1  ;;  %v608_v36 = vpop.permute.xlu0 %607 }
  0xc4   :  { %892 = vrsqrt.f32 %v445_v61  ;;  %v431_v30 = vsub.f32 %v415_v43, %v1134_v58  ;;  %v425_v21 = vmul.f32 %v1146_v60, %v1146_v60  ;;  %v435_v58 = vsub.f32 %v950_v9, %v1110_v23  ;;  %v1166_v9 = vld [vmem:[%s1247_s3] sm:$0xf] }
  0xc5   :  { %v430_v16 = vsub.f32 %v414_v59, %v422_v56  ;;  %v409_v17 = vadd.f32 %v408_v40, %v407_v62  ;;  %v402_v18 = vadd.f32 %v401_v14, %v400_v63  ;;  %894 = vrsqrt.f32 %v444_v3 }
  0xc6   :  { %v447_v25 = vadd.f32 1e-05, %v431_v30  ;;  %v424_v26 = vmul.f32 %v1148_v4, %v1148_v4  ;;  %v652_v45 = vand.u32 127, %v36_v0  ;;  %v437_v51 = vsub.f32 %v945_v8, %v1108_v22 }
  0xc7   :  { %v1151_v20 = vpop.permute.xlu1 %531  ;;  %v446_v27 = vadd.f32 1e-05, %v430_v16  ;;  %v417_v28 = vmul.f32 0.0036764706, %v409_v17  ;;  %v416_v29 = vmul.f32 0.0036764706, %v402_v18  ;;  %v434_v0 = vsub.f32 %v940_v7, %v1106_v6 }
  0xc8   :  { %896 = vrsqrt.f32 %v447_v25  ;;  %v1172_v55 = vadd.s32 128, %v652_v45  ;;  %v436_v56 = vsub.f32 %v935_v5, %v1102_v2  ;;  %v439_v57 = vsub.f32 %v957_v11, %v1126_v42 }
  0xc9   :  { %v889_v32 = vpop.eup %888  ;;  %v433_v34 = vsub.f32 %v417_v28, %v425_v21  ;;  %v432_v35 = vsub.f32 %v416_v29, %v424_v26  ;;  %898 = vrsqrt.f32 %v446_v27  ;;  %v438_v5 = vsub.f32 %v962_v12, %v1128_v48 }
  0xca   :  { %v459_v38 = vmul.f32 %v889_v32, %v435_v58  ;;  %vm655_vm1 = vcmp.lt.s32.totalorder %v1172_v55, 136  ;;  %v441_v14 = vsub.f32 %v967_v13, %v1146_v60  ;;  %v440_v27 = vsub.f32 %v982_v19, %v1148_v4 }
  0xcb   :  { %v536_v37 = vpop.permute.xlu1 %535  ;;  %v449_v39 = vadd.f32 1e-05, %v433_v34  ;;  %v448_v44 = vadd.f32 1e-05, %v432_v35 }
  0xcc   :  { %v891_v46 = vpop.eup %890  ;;  %v547_v47 = vmul.f32 %v1138_v24, %v459_v38  ;;  %v616_v24 = vpop.permute.xlu0 %615 }
  0xcd   :  { %900 = vrsqrt.f32 %v449_v39  ;;  %v458_v22 = vmul.f32 %v891_v46, %v434_v0 }
  0xce   :  { %v893_v52 = vpop.eup %892  ;;  %902 = vrsqrt.f32 %v448_v44  ;;  %v635_v54 = vadd.f32 %v608_v36, %v547_v47 }
  0xcf   :  { %v1168_v23 = vpop.permute.xlu1 %539  ;;  %v461_v53 = vmul.f32 %v893_v52, %v437_v51  ;;  %v895_v31 = vpop.eup %894  ;;  %v546_v63 = vmul.f32 %v516_v15, %v458_v22 }
  0xd0   :  { %v644_v41 = vadd.f32 %v1166_v9, %v635_v54  ;;  %v460_v6 = vmul.f32 %v895_v31, %v436_v56  ;;  %v624_v59 = vpop.permute.xlu0 %623 }
  0xd1   :  { %v549_v8 = vmul.f32 %v528_v1, %v461_v53 }
  0xd2   :  { %v897_v49 = vpop.eup %896  ;;  %v678_v61 = vrot.slane %v644_v41, %v952_v10  ;;  %v548_v16 = vmul.f32 %v1140_v50, %v460_v6 }
  0xd3   :  { %v544_v33 = vpop.permute.xlu1 %543  ;;  %v637_v7 = vadd.f32 %v616_v24, %v549_v8  ;;  %v463_v62 = vmul.f32 %v897_v49, %v439_v57  ;;  %v899_v43 = vpop.eup %898 }
  0xd4   :  { %v679_v1 = vcombine.high %v678_v61, %v678_v61  ;;  %v462_v25 = vmul.f32 %v899_v43, %v438_v5  ;;  %v632_v36 = vpop.permute.xlu0 %631 }
  0xd5   :  { %v646_v3 = vadd.f32 %v1166_v9, %v637_v7  ;;  %v551_v2 = vmul.f32 %v536_v37, %v463_v62 }
  0xd6   :  { %v747_v42 = vsel %vm655_vm1, %v679_v1, 0.0  ;;  %v550_v37 = vmul.f32 %v1151_v20, %v462_v25 }
  0xd7   :  { %v604_v11 = vpop.permute.xlu1 %603  ;;  %v694_v40 = vrot.slane %v646_v3, %v952_v10  ;;  %v901_v15 = vpop.eup %900  ;;  %v784_v17 = vcombine.low %v678_v61, %v747_v42  ;;  %v639_v18 = vadd.f32 %v624_v59, %v551_v2 }
  0xd8   :  { %v634_v30 = vadd.f32 %v604_v11, %v546_v63  ;;  %v903_v21 = vpop.eup %902  ;;  %v465_v48 = vmul.f32 %v901_v15, %v441_v14 }
  0xd9   :  { %v695_v12 = vcombine.high %v694_v40, %v694_v40  ;;  %877 = vst.sshfl [vmem:[%s1248_s4 + $0x4] sm:$0x33 pattern:$0x76325410] %v784_v17  ;;  %v648_v13 = vadd.f32 %v1166_v9, %v639_v18  ;;  %v464_v34 = vmul.f32 %v903_v21, %v440_v27 }
  0xda   :  { %v643_v26 = vadd.f32 %v1166_v9, %v634_v30  ;;  %v553_v28 = vmul.f32 %v544_v33, %v465_v48 }
  0xdb   :  { %v612_v60 = vpop.permute.xlu1 %611  ;;  %v751_v50 = vsel %vm655_vm1, %v695_v12, 0.0  ;;  %v710_v35 = vrot.slane %v648_v13, %v952_v10  ;;  %v552_v20 = vmul.f32 %v1168_v23, %v464_v34 }
  0xdc   :  { %v670_v29 = vrot.slane %v643_v26, %v952_v10  ;;  %v636_v58 = vadd.f32 %v612_v60, %v548_v16  ;;  %v800_v32 = vcombine.low %v694_v40, %v751_v50  ;;  %v641_v38 = vadd.f32 %v632_v36, %v553_v28 }
  0xdd   :  { %v711_v4 = vcombine.high %v710_v35, %v710_v35 }
  0xde   :  { %v671_v39 = vcombine.high %v670_v29, %v670_v29  ;;  %v645_v19 = vadd.f32 %v1166_v9, %v636_v58  ;;  %879 = vst.sshfl [vmem:[%s1248_s4 + $0xc] sm:$0x33 pattern:$0x76325410] %v800_v32  ;;  %v650_v45 = vadd.f32 %v1166_v9, %v641_v38 }
  0xdf   :  { %v620_v44 = vpop.permute.xlu1 %619  ;;  %v755_v52 = vsel %vm655_vm1, %v711_v4, 0.0 }
  0xe0   :  { %v745_v46 = vsel %vm655_vm1, %v671_v39, 0.0  ;;  %v686_v47 = vrot.slane %v645_v19, %v952_v10  ;;  %v638_v51 = vadd.f32 %v620_v44, %v550_v37  ;;  %v816_v0 = vcombine.low %v710_v35, %v755_v52 }
  0xe1   :  { %v776_v53 = vcombine.low %v670_v29, %v745_v46  ;;  %v726_v54 = vrot.slane %v650_v45, %v952_v10 }
  0xe2   :  { %v687_v24 = vcombine.high %v686_v47, %v686_v47  ;;  %v647_v31 = vadd.f32 %v1166_v9, %v638_v51  ;;  %881 = vst.sshfl [vmem:[%s1248_s4 + $0x14] sm:$0x33 pattern:$0x76325410] %v816_v0 }
  0xe3   :  { %876 = vst.sshfl [vmem:[%s1248_s4] sm:$0x33 pattern:$0x76325410] %v776_v53  ;;  %v628_v8 = vpop.permute.xlu1 %627  ;;  %v727_v23 = vcombine.high %v726_v54, %v726_v54 }
  0xe4   :  { %v749_v22 = vsel %vm655_vm1, %v687_v24, 0.0  ;;  %v702_v41 = vrot.slane %v647_v31, %v952_v10  ;;  %v640_v56 = vadd.f32 %v628_v8, %v552_v20 }
  0xe5   :  { %v792_v57 = vcombine.low %v686_v47, %v749_v22  ;;  %v759_v33 = vsel %vm655_vm1, %v727_v23, 0.0 }
  0xe6   :  { %v703_v49 = vcombine.high %v702_v41, %v702_v41  ;;  %v649_v61 = vadd.f32 %v1166_v9, %v640_v56  ;;  %v832_v7 = vcombine.low %v726_v54, %v759_v33 }
  0xe7   :  { %878 = vst.sshfl [vmem:[%s1248_s4 + $0x8] sm:$0x33 pattern:$0x76325410] %v792_v57 }
  0xe8   :  { %v753_v6 = vsel %vm655_vm1, %v703_v49, 0.0  ;;  %v718_v62 = vrot.slane %v649_v61, %v952_v10  ;;  %883 = vst.sshfl [vmem:[%s1248_s4 + $0x1c] sm:$0x33 pattern:$0x76325410] %v832_v7 }
  0xe9   :  { %v808_v63 = vcombine.low %v702_v41, %v753_v6 }
  0xea   :  { %v719_v1 = vcombine.high %v718_v62, %v718_v62 }
  0xeb   :  { %880 = vst.sshfl [vmem:[%s1248_s4 + $0x10] sm:$0x33 pattern:$0x76325410] %v808_v63 }
  0xec   :  { %v757_v9 = vsel %vm655_vm1, %v719_v1, 0.0 }
  0xed   :  { %v824_v3 = vcombine.low %v718_v62, %v757_v9 }
  0xef   :  { %882 = vst.sshfl [vmem:[%s1248_s4 + $0x18] sm:$0x33 pattern:$0x76325410] %v824_v3 }

// kernel: video_transformer.3
= control target key start
LH: loop header
LB: loop body
LE: loop exit
PB: predicated region body
PF: predicated region fallthrough
CT: control target
= control target key end

     0   :  { %s11285_s0 = inlined_call_operand.vmem [shape: f32[16,256], index: 0, kind: input, shape index: {}]   ;;  %s11286_s1 = inlined_call_operand.vmem [shape: f32[8,8], index: 1, kind: input, shape index: {}]   ;;  %s11287_s2 = inlined_call_operand.hbm [shape: bf16[6,256,768], index: 2, kind: input, shape index: {}]   ;;  %s11288_s3 = inlined_call_operand.hbm [shape: f32[6,1,768], index: 3, kind: input, shape index: {}]   ;;  %s11289_s4 = inlined_call_operand.hbm [shape: bf16[6,256,256], index: 4, kind: input, shape index: {}]   ;;  %s11290_s5 = inlined_call_operand.hbm [shape: f32[6,1,256], index: 5, kind: input, shape index: {}]   ;;  %s11291_s6 = inlined_call_operand.hbm [shape: f32[6,1,256], index: 6, kind: input, shape index: {}]   ;;  %s11292_s7 = inlined_call_operand.hbm [shape: f32[6,1,256], index: 7, kind: input, shape index: {}]   ;;  %s11293_s8 = inlined_call_operand.hbm [shape: bf16[6,256,2048], index: 8, kind: input, shape index: {}]   ;;  %s11294_s9 = inlined_call_operand.hbm [shape: f32[6,1,2048], index: 9, kind: input, shape index: {}]   ;;  %s11295_s10 = inlined_call_operand.hbm [shape: bf16[6,2048,256], index: 10, kind: input, shape index: {}]   ;;  %s11296_s11 = inlined_call_operand.hbm [shape: f32[6,1,256], index: 11, kind: input, shape index: {}]   ;;  %s11297_s12 = inlined_call_operand.hbm [shape: f32[6,1,256], index: 12, kind: input, shape index: {}]   ;;  %s11298_s13 = inlined_call_operand.hbm [shape: f32[6,1,256], index: 13, kind: input, shape index: {}]   ;;  %s11299_s14 = inlined_call_operand.hbm [shape: bf16[256,512], index: 14, kind: input, shape index: {}]   ;;  %s11300_s15 = inlined_call_operand.hbm [shape: f32[1,512], index: 15, kind: input, shape index: {}]   ;;  %s11301_s16 = inlined_call_operand.vmem [shape: f32[16,512], index: 16, kind: output, shape index: {}]  }
   0x1   :  { %11330 = sst [smem:[#allocation46_spill]] %s11285_s0 }
   0x2   :  { %11331 = sst [smem:[#allocation47_spill]] %s11286_s1 }
   0x3   :  { %11332 = sst [smem:[#allocation48_spill]] %s11288_s3 }
   0x4   :  { %11333 = sst [smem:[#allocation49_spill]] %s11290_s5 }
   0x5   :  { %11334 = sst [smem:[#allocation50_spill]] %s11292_s7 }
   0x6   :  { %11335 = sst [smem:[#allocation51_spill]] %s11299_s14 }
   0x7   :  { %11336 = sst [smem:[#allocation52_spill]] %s11301_s16 }
   0x8   :  { %21 = vsyncpa [#allocation4], 0 }
   0x9   :  { %23 = vsyncpa [#allocation4 + $0x1], 0 }
   0xa   :  { %24 = vsyncpa [#allocation6], 0 }
   0xb   :  { %26 = vsyncpa [#allocation6 + $0x1], 0 }
   0xc   :  { %27 = vsyncpa [#allocation9], 0 }
   0xd   :  { %29 = vsyncpa [#allocation9 + $0x1], 0 }
   0xe   :  { %30 = vsyncpa [#allocation12], 0 }
   0xf   :  { %32 = vsyncpa [#allocation12 + $0x1], 0 }
  0x10   :  { %33 = vsyncpa [#allocation15], 0 }
  0x11   :  { %35 = vsyncpa [#allocation15 + $0x1], 0 }
  0x12   :  { %36 = vsyncpa [#allocation18], 0 }
  0x13   :  { %38 = vsyncpa [#allocation18 + $0x1], 0 }
  0x14   :  { %39 = vsyncpa [#allocation21], 0 }
  0x15   :  { %41 = vsyncpa [#allocation21 + $0x1], 0 }
  0x16   :  { %42 = vsyncpa [#allocation24], 0  ;;  %s9734_s21 = smov 0   ;;  %s9736_s22 = smov 0  }
  0x17   :  { %s9738_s23 = smov 0   ;;  %s9740_s24 = smov 0  }
  0x18   :  { %s9742_s25 = smov 0   ;;  %s9744_s26 = smov 0  }
  0x19   :  { %s9746_s27 = smov 0   ;;  %s9748_s28 = smov 0  }
  0x1a LB: > { %11337 = sst [smem:[#allocation34_spill]] %s9597_s22  ;;  %s11302_s29 = sadd.s32 4294967295, %s9621_s28   ;;  %s9621_s28 = sphi %s9748_s28, %s48_s28   ;;  %s9617_s27 = sphi %s9746_s27, %s11409_s27   ;;  %s9613_s26 = sphi %s9744_s26, %s11411_s26   ;;  %s9609_s25 = sphi %s9742_s25, %s11407_s25   ;;  %s9605_s24 = sphi %s9740_s24, %s11410_s24   ;;  %s9601_s23 = sphi %s9738_s23, %s11406_s23   ;;  %s9597_s22 = sphi %s9736_s22, %s11405_s22   ;;  %s9593_s21 = sphi %s9734_s21, %s11404_s21  }
  0x1b   : > { %11338 = sst [smem:[#allocation35_spill]] %s9601_s23  ;;  %p121_p0 = scmp.ne.s32.totalorder %s9601_s23, %s9597_s22 }
  0x1c   : > { %11339 = sst [smem:[#allocation36_spill]] %s9605_s24  ;;  %p122_p1 = scmp.eq.s32.totalorder %s9621_s28, 0 }
  0x1d   : > { %11340 = sst [smem:[#allocation37_spill]] %s9609_s25  ;;  %p127_p2 = scmp.ne.s32.totalorder %s9597_s22, %s9593_s21 }
  0x1e   : > { %11341 = sst [smem:[#allocation38_spill]] %s9617_s27  ;;  %p9780_p3 = scmp.eq.s32.totalorder %s11302_s29, 0 }
  0x1f   : > { %11342 = sst [smem:[#allocation39_spill]] %s9621_s28  ;;  %p123_p4 = por %p122_p1, %p121_p0 }
  0x20   : > { %s11343_s0 = scalar_select %p9780_p3, 1, 0 }
  0x21   : > { %p7399_p5 = scmp.ge.s32.totalorder %s9621_s28, 1  ;;  %p9787_p6 = por %p9780_p3, %p127_p2 }
  0x22   : > { %11344 = sst [smem:[#allocation40_spill]] %s11343_s0  ;;  %p492_p7 = scmp.lt.s32.totalorder %s9621_s28, 13 }
  0x23   : > { %s11345_s17 = scalar_select %p9787_p6, 1, 0 }
  0x24   : > { %p9792_p8 = pnand %p7399_p5, %p492_p7  ;;  %s9623_s19 = smov [#allocation22]  }
  0x25   : > { %11346 = sst [smem:[#allocation41_spill]] %s11345_s17  ;;  %s507_s20 = sshll.u32 %s9623_s19, 4  ;;  %s508_s20 = int_to_ptr.vmem [resolvable:$true] %s507_s20 }
  0x26   : > { %s11347_s18 = scalar_select %p9792_p8, 1, 0 }
  0x27   : > { %p8286_p9 = pneg %p9792_p8  ;;  %p8332_p10 = scmp.lt.s32.totalorder %s9621_s28, 12 }
  0x28   : > { %11348 = sst [smem:[#allocation42_spill]] %s11347_s18  ;;  %s11351_s14 = sld [smem:[#allocation51_spill]] }
  0x29   : > { %p9801_p11 = pnand %p8286_p9, %p9780_p3  ;;  %p9805_p12 = pnand %p8332_p10, %p123_p4 }
  0x2b   : > { %s11349_s21 = scalar_select %p9801_p11, 1, 0 }
  0x2c   : > { %s11350_s29 = scalar_select %p9805_p12, 1, 0 }
  0x2d   : > { %p11318_p0 = pneg %p9801_p11 }
  0x2e   : > { %s9107_s24 = scalar_lea.hbm %s11351_s14, 8192 }
  0x2f   : > { %p9108_p13 = scmp.ne.s32.totalorder %s11351_s14, %s9107_s24  ;;  %p9114_p4 = scmp.lt.u32.totalorder %s9107_s24, %s11351_s14 }
  0x31   : > { %p9110_p1 = pnand %p11318_p0, %p9108_p13 }
  0x33   : > { %p9111_p2 = pneg %p9110_p1 }
  0x35   : > { %p9116_p5 = pnand %p9114_p4, %p9111_p2 }
  0x37   : > { %9119 = shalt.err (!%p9116_p5)
}
  0x38   : > { %s9120_s17 = scalar_lea.vmem %s508_s20, 8192  ;;  %p9128_p3 = scmp.lt.s32.totalorder %s508_s20, %s508_s20 }
  0x39   : > { %p9121_p7 = scmp.ne.s32.totalorder %s508_s20, %s9120_s17  ;;  %p9129_p6 = scmp.lt.s32.totalorder %s9120_s17, %s9120_s17 }
  0x3b   : > { %p9123_p9 = pnand %p9121_p7, %p11318_p0  ;;  %p9130_p8 = por %p9129_p6, %p9128_p3 }
  0x3d   : > { %p9124_p10 = pneg %p9123_p9 }
  0x3f   : > { %p9131_p12 = pnand %p9130_p8, %p9124_p10 }
  0x41   : > { %9134 = shalt.err (!%p9131_p12)
}
  0x42   : > { %s9624_s1 = smov 256   ;;  %s9625_s16 = smov 16  }
  0x43   : > { %8289 = dma.hbm_to_vmem [thread:$0]  (!%p9801_p11), %s11351_s14, 8192, %s508_s20, [#allocation21], %s9624_s1, %s9624_s1, %s9625_s16  }
  0x44   : > { %s57_s30 = sadd.s32 1, %s9613_s26  ;;  %s60_s0 = sadd.s32 1, %s9617_s27 }
  0x45   : > { %p58_p3 = scmp.ge.s32.totalorder %s57_s30, 6  ;;  %s9834_s17 = sand.u32 1, %s9601_s23  }
  0x46   : > { %s9837_s19 = sand.u32 1, %s9621_s28   ;;  %s8250_s22 = smul.u32 6, %s9834_s17 }
  0x47   : > { %s11413_s30 = smov (%p58_p3, %s57_s30), 0  ;;  %s11415_s0 = smov (!%p58_p3, %s60_s0), %s9617_s27 }
  0x48   : > { %11352 = sst [smem:[#allocation43_spill]] %s11413_s30  ;;  %s111_s18 = ssub.s32 %s9613_s26, %s11413_s30 }
  0x49   : > { %p62_p6 = scmp.ge.s32.totalorder %s11415_s0, 2  ;;  %p112_p8 = scmp.eq.s32.totalorder %s111_s18, 0 }
  0x4a   : > { %s8251_s24 = smul.u32 96, %s9613_s26  ;;  %s11354_s20 = sadd.s32 1, %s9601_s23 }
  0x4b   : > { %s11417_s0 = smov (%p62_p6, %s11415_s0), 0  ;;  %s11356_s3 = sld [smem:[#allocation48_spill]] }
  0x4c   : > { %11353 = sst [smem:[#allocation44_spill]] %s11417_s0  ;;  %s565_s28 = scalar_lea.vmem [#allocation5], %s8250_s22 }
  0x4d   : > { %s9851_s1 = scalar_select %p112_p8, %s9601_s23, %s11354_s20  }
  0x4e   : > { %s573_s27 = sshll.u32 %s565_s28, 4  ;;  %p11357_p13 = scmp.ne.s32.totalorder %s11350_s29, 0  ;;  %s9858_s27 = int_to_ptr.vmem [resolvable:$true] %s573_s27 }
  0x4f   : > { %11355 = sst [smem:[#allocation45_spill]] %s9851_s1 }
  0x50   : > { %p9865_p1 = pneg %p11357_p13 }
  0x51   : > { %s9856_s14 = scalar_lea.hbm %s11356_s3, %s8251_s24  ;;  %s9140_s25 = scalar_lea.hbm %s11356_s3, 576 }
  0x52   : > { %s9135_s30 = scalar_lea.hbm %s9856_s14, 96  ;;  %p9141_p5 = scmp.lt.u32.totalorder %s9856_s14, %s11356_s3 }
  0x53   : > { %p9136_p12 = scmp.ne.s32.totalorder %s9856_s14, %s9135_s30  ;;  %p9142_p7 = scmp.lt.u32.totalorder %s9140_s25, %s9135_s30 }
  0x54   : > { %s11358_s20 = scalar_select %p9865_p1, 1, 0 }
  0x55   : > { %p9138_p2 = pnand %p9865_p1, %p9136_p12  ;;  %p9143_p9 = por %p9142_p7, %p9141_p5 }
  0x56   : > { %p9144_p10 = scmp.lt.u32.totalorder %s9135_s30, %s9856_s14 }
  0x57   : > { %p9139_p4 = pneg %p9138_p2 }
  0x58   : > { %p9145_p3 = por %p9144_p10, %p9143_p9 }
  0x5a   : > { %p9146_p6 = pnand %p9145_p3, %p9139_p4 }
  0x5c   : > { %9149 = shalt.err (!%p9146_p6)
}
  0x5d   : > { %s9150_s18 = scalar_lea.vmem %s9858_s27, 96  ;;  %s9626_s24 = smov [#allocation5]  }
  0x5e   : > { %p9151_p8 = scmp.ne.s32.totalorder %s9858_s27, %s9150_s18  ;;  %s9155_s16 = sshll.u32 %s9626_s24, 4  ;;  %s9156_s16 = int_to_ptr.vmem [resolvable:$false] %s9155_s16 }
  0x5f   : > { %s9157_s22 = scalar_lea.vmem %s9156_s16, 192  ;;  %p9158_p0 = scmp.lt.s32.totalorder %s9858_s27, %s9156_s16 }
  0x60   : > { %p9153_p12 = pnand %p9151_p8, %p9865_p1  ;;  %p9159_p11 = scmp.lt.s32.totalorder %s9157_s22, %s9150_s18 }
  0x62   : > { %p9154_p2 = pneg %p9153_p12  ;;  %p9160_p5 = por %p9159_p11, %p9158_p0 }
  0x64   : > { %p9161_p7 = pnand %p9160_p5, %p9154_p2 }
  0x66   : > { %9164 = shalt.err (!%p9161_p7)
}
  0x67   : > { %s11359_s30 = scalar_lea.sflag [#allocation6], %s9837_s19  ;;  %s9891_s25 = sshll.u32 %s9834_s17, 1 }
  0x68   : > { %8299 = dma.hbm_to_vmem [thread:$0]  (!%p11357_p13), %s9856_s14, 96, %s9858_s27, %s11359_s30  }
  0x69   : > { %s9894_s28 = sshll.u32 %s9613_s26, 5  ;;  %s11360_s5 = sld [smem:[#allocation49_spill]] }
  0x6a   : > { %s605_s22 = scalar_lea.vmem [#allocation8], %s9891_s25 }
  0x6b   : > { %s613_s3 = sshll.u32 %s605_s22, 4  ;;  %s614_s3 = int_to_ptr.vmem [resolvable:$true] %s613_s3 }
  0x6f   : > { %s9900_s16 = scalar_lea.hbm %s11360_s5, %s9894_s28  ;;  %s9170_s1 = scalar_lea.hbm %s11360_s5, 192 }
  0x70   : > { %s9165_s14 = scalar_lea.hbm %s9900_s16, 32  ;;  %p9171_p9 = scmp.lt.u32.totalorder %s9900_s16, %s11360_s5 }
  0x71   : > { %p9166_p11 = scmp.ne.s32.totalorder %s9900_s16, %s9165_s14  ;;  %p9172_p10 = scmp.lt.u32.totalorder %s9170_s1, %s9165_s14 }
  0x72   : > { %p9174_p6 = scmp.lt.u32.totalorder %s9165_s14, %s9900_s16 }
  0x73   : > { %p9168_p0 = pnand %p9166_p11, %p9865_p1  ;;  %p9173_p3 = por %p9172_p10, %p9171_p9 }
  0x75   : > { %p9169_p4 = pneg %p9168_p0  ;;  %p9175_p8 = por %p9174_p6, %p9173_p3 }
  0x77   : > { %p9176_p12 = pnand %p9175_p8, %p9169_p4 }
  0x79   : > { %9179 = shalt.err (!%p9176_p12)
}
  0x7a   : > { %s9180_s22 = scalar_lea.vmem %s614_s3, 32  ;;  %s9627_s0 = smov [#allocation8]  }
  0x7b   : > { %p9181_p2 = scmp.ne.s32.totalorder %s614_s3, %s9180_s22  ;;  %s9185_s23 = sshll.u32 %s9627_s0, 4  ;;  %s9186_s23 = int_to_ptr.vmem [resolvable:$false] %s9185_s23 }
  0x7c   : > { %s9187_s27 = scalar_lea.vmem %s9186_s23, 64  ;;  %p9188_p11 = scmp.lt.s32.totalorder %s614_s3, %s9186_s23 }
  0x7d   : > { %p9183_p5 = pnand %p9181_p2, %p9865_p1  ;;  %p9189_p0 = scmp.lt.s32.totalorder %s9187_s27, %s9180_s22 }
  0x7f   : > { %p9184_p7 = pneg %p9183_p5  ;;  %p9190_p13 = por %p9189_p0, %p9188_p11 }
  0x81   : > { %p9191_p9 = pnand %p9190_p13, %p9184_p7 }
  0x83   : > { %9194 = shalt.err (!%p9191_p9)
}
  0x84   : > { %p11361_p10 = scmp.ne.s32.totalorder %s11350_s29, 0  ;;  %s11362_s1 = scalar_lea.sflag [#allocation9], %s9837_s19 }
  0x85   : > { %s11363_s7 = sld [smem:[#allocation50_spill]]  ;;  %s643_s23 = scalar_lea.vmem [#allocation11], %s9891_s25 }
  0x86   : > { %8305 = dma.hbm_to_vmem [thread:$0]  (!%p11361_p10), %s9900_s16, 32, %s614_s3, %s11362_s1  }
  0x87   : > { %s651_s18 = sshll.u32 %s643_s23, 4  ;;  %s652_s18 = int_to_ptr.vmem [resolvable:$true] %s651_s18 }
  0x8b   : > { %s9927_s0 = scalar_lea.hbm %s11363_s7, %s9894_s28  ;;  %s9200_s16 = scalar_lea.hbm %s11363_s7, 192 }
  0x8c   : > { %s9195_s22 = scalar_lea.hbm %s9927_s0, 32  ;;  %p9201_p6 = scmp.lt.u32.totalorder %s9927_s0, %s11363_s7 }
  0x8d   : > { %p9196_p13 = scmp.ne.s32.totalorder %s9927_s0, %s9195_s22  ;;  %p9202_p8 = scmp.lt.u32.totalorder %s9200_s16, %s9195_s22 }
  0x8e   : > { %p9204_p2 = scmp.lt.u32.totalorder %s9195_s22, %s9927_s0 }
  0x8f   : > { %p9198_p4 = pnand %p9196_p13, %p9865_p1  ;;  %p9203_p12 = por %p9202_p8, %p9201_p6 }
  0x91   : > { %p9199_p3 = pneg %p9198_p4  ;;  %p9205_p5 = por %p9204_p2, %p9203_p12 }
  0x93   : > { %p9206_p7 = pnand %p9205_p5, %p9199_p3 }
  0x95   : > { %9209 = shalt.err (!%p9206_p7)
}
  0x96   : > { %s9210_s30 = scalar_lea.vmem %s652_s18, 32  ;;  %s9628_s23 = smov [#allocation11]  }
  0x97   : > { %p9211_p11 = scmp.ne.s32.totalorder %s652_s18, %s9210_s30  ;;  %s9215_s24 = sshll.u32 %s9628_s23, 4  ;;  %s9216_s24 = int_to_ptr.vmem [resolvable:$false] %s9215_s24 }
  0x98   : > { %s9217_s27 = scalar_lea.vmem %s9216_s24, 64  ;;  %p9218_p13 = scmp.lt.s32.totalorder %s652_s18, %s9216_s24 }
  0x99   : > { %p9213_p0 = pnand %p9211_p11, %p9865_p1  ;;  %p9219_p4 = scmp.lt.s32.totalorder %s9217_s27, %s9210_s30 }
  0x9b   : > { %p9214_p9 = pneg %p9213_p0  ;;  %p9220_p10 = por %p9219_p4, %p9218_p13 }
  0x9d   : > { %p9221_p6 = pnand %p9220_p10, %p9214_p9 }
  0x9f   : > { %9224 = shalt.err (!%p9221_p6)
}
  0xa0   : > { %p11364_p8 = scmp.ne.s32.totalorder %s11350_s29, 0  ;;  %s11365_s22 = scalar_lea.sflag [#allocation12], %s9837_s19 }
  0xa1   : > { %s7420_s3 = sshll.u32 %s9834_s17, 4  ;;  %s8177_s16 = sshll.u32 %s9613_s26, 8 }
  0xa2   : > { %8311 = dma.hbm_to_vmem [thread:$0]  (!%p11364_p8), %s9927_s0, 32, %s652_s18, %s11365_s22  }
  0xa3   : > { %s9955_s24 = scalar_lea.hbm %s11294_s9, %s8177_s16  ;;  %s683_s30 = scalar_lea.vmem [#allocation14], %s7420_s3 }
  0xa4   : > { %s691_s23 = sshll.u32 %s683_s30, 4  ;;  %s11323_s27 = scalar_lea.sflag [#allocation15], %s9837_s19  ;;  %s692_s23 = int_to_ptr.vmem [resolvable:$true] %s691_s23 }
  0xa5   : > { %s9225_s5 = scalar_lea.hbm %s9955_s24, 256  ;;  %s9230_s22 = scalar_lea.hbm %s11294_s9, 1536 }
  0xa6   : > { %p9226_p10 = scmp.ne.s32.totalorder %s9955_s24, %s9225_s5  ;;  %p9231_p2 = scmp.lt.u32.totalorder %s9955_s24, %s11294_s9 }
  0xa7   : > { %p9232_p5 = scmp.lt.u32.totalorder %s9230_s22, %s9225_s5  ;;  %p9234_p11 = scmp.lt.u32.totalorder %s9225_s5, %s9955_s24 }
  0xa8   : > { %p9228_p3 = pnand %p9226_p10, %p9865_p1 }
  0xa9   : > { %p9233_p7 = por %p9232_p5, %p9231_p2 }
  0xaa   : > { %p9229_p12 = pneg %p9228_p3 }
  0xab   : > { %p9235_p0 = por %p9234_p11, %p9233_p7 }
  0xad   : > { %p9236_p9 = pnand %p9235_p0, %p9229_p12 }
  0xaf   : > { %9239 = shalt.err (!%p9236_p9)
}
  0xb0   : > { %s9240_s3 = scalar_lea.vmem %s692_s23, 256  ;;  %s9629_s14 = smov [#allocation14]  }
  0xb1   : > { %p9241_p13 = scmp.ne.s32.totalorder %s692_s23, %s9240_s3  ;;  %s9245_s30 = sshll.u32 %s9629_s14, 4  ;;  %s9246_s30 = int_to_ptr.vmem [resolvable:$false] %s9245_s30 }
  0xb2   : > { %s9247_s0 = scalar_lea.vmem %s9246_s30, 512  ;;  %p9248_p10 = scmp.lt.s32.totalorder %s692_s23, %s9246_s30 }
  0xb3   : > { %p9243_p4 = pnand %p9241_p13, %p9865_p1  ;;  %p9249_p3 = scmp.lt.s32.totalorder %s9247_s0, %s9240_s3 }
  0xb5   : > { %p9244_p6 = pneg %p9243_p4  ;;  %p9250_p8 = por %p9249_p3, %p9248_p10 }
  0xb7   : > { %p9251_p2 = pnand %p9250_p8, %p9244_p6 }
  0xb9   : > { %9254 = shalt.err (!%p9251_p2)
}
  0xba   : > { %p11366_p5 = scmp.ne.s32.totalorder %s11350_s29, 0  ;;  %s9981_s22 = scalar_lea.hbm %s11296_s11, %s9894_s28 }
  0xbb   : > { %s723_s1 = scalar_lea.vmem [#allocation17], %s9891_s25  ;;  %s11326_s3 = scalar_lea.sflag [#allocation18], %s9837_s19 }
  0xbc   : > { %8317 = dma.hbm_to_vmem [thread:$0]  (!%p11366_p5), %s9955_s24, 256, %s692_s23, %s11323_s27  }
  0xbd   : > { %s731_s16 = sshll.u32 %s723_s1, 4  ;;  %s9255_s14 = scalar_lea.hbm %s9981_s22, 32  ;;  %s732_s16 = int_to_ptr.vmem [resolvable:$true] %s731_s16 }
  0xbe   : > { %p9256_p8 = scmp.ne.s32.totalorder %s9981_s22, %s9255_s14  ;;  %s9260_s23 = scalar_lea.hbm %s11296_s11, 192 }
  0xbf   : > { %p9261_p11 = scmp.lt.u32.totalorder %s9981_s22, %s11296_s11  ;;  %p9262_p0 = scmp.lt.u32.totalorder %s9260_s23, %s9255_s14 }
  0xc0   : > { %p9258_p12 = pnand %p9256_p8, %p9865_p1  ;;  %p9264_p13 = scmp.lt.u32.totalorder %s9255_s14, %s9981_s22 }
  0xc1   : > { %p9263_p9 = por %p9262_p0, %p9261_p11 }
  0xc2   : > { %p9259_p7 = pneg %p9258_p12 }
  0xc3   : > { %p9265_p4 = por %p9264_p13, %p9263_p9 }
  0xc5   : > { %p9266_p6 = pnand %p9265_p4, %p9259_p7 }
  0xc7   : > { %9269 = shalt.err (!%p9266_p6)
}
  0xc8   : > { %s9270_s18 = scalar_lea.vmem %s732_s16, 32  ;;  %s9630_s1 = smov [#allocation17]  }
  0xc9   : > { %p9271_p10 = scmp.ne.s32.totalorder %s732_s16, %s9270_s18  ;;  %s9275_s27 = sshll.u32 %s9630_s1, 4  ;;  %s9276_s27 = int_to_ptr.vmem [resolvable:$false] %s9275_s27 }
  0xca   : > { %s9277_s30 = scalar_lea.vmem %s9276_s27, 64  ;;  %p9278_p8 = scmp.lt.s32.totalorder %s732_s16, %s9276_s27 }
  0xcb   : > { %p9273_p3 = pnand %p9271_p10, %p9865_p1  ;;  %p9279_p12 = scmp.lt.s32.totalorder %s9277_s30, %s9270_s18 }
  0xcd   : > { %p9274_p2 = pneg %p9273_p3  ;;  %p9280_p5 = por %p9279_p12, %p9278_p8 }
  0xcf   : > { %p9281_p0 = pnand %p9280_p5, %p9274_p2 }
  0xd1   : > { %9284 = shalt.err (!%p9281_p0)
}
  0xd2   : > { %p11367_p11 = scmp.ne.s32.totalorder %s11350_s29, 0  ;;  %s9631_s14 = smov [#allocation23]  }
  0xd3   : > { %s521_s24 = sshll.u32 %s9631_s14, 4  ;;  %s8248_s23 = smul.u32 768, %s9834_s17  ;;  %s522_s24 = int_to_ptr.vmem [resolvable:$true] %s521_s24 }
  0xd4   : > { %8323 = dma.hbm_to_vmem [thread:$0]  (!%p11367_p11), %s9981_s22, 32, %s732_s16, %s11326_s3  }
  0xd5   : > { %s9285_s27 = scalar_lea.hbm %s11300_s15, 64  ;;  %p11368_p7 = scmp.ne.s32.totalorder %s11349_s21, 0 }
  0xd6   : > { %p9286_p5 = scmp.ne.s32.totalorder %s11300_s15, %s9285_s27  ;;  %p9292_p6 = scmp.lt.u32.totalorder %s9285_s27, %s11300_s15 }
  0xd7   : > { %p11369_p9 = pneg %p11368_p7 }
  0xd9   : > { %p9288_p13 = pnand %p9286_p5, %p11369_p9 }
  0xdb   : > { %p9289_p4 = pneg %p9288_p13 }
  0xdd   : > { %p9294_p10 = pnand %p9292_p6, %p9289_p4 }
  0xdf   : > { %9297 = shalt.err (!%p9294_p10)
}
  0xe0   : > { %s9298_s22 = scalar_lea.vmem %s522_s24, 64  ;;  %p11370_p2 = pmov %p11369_p9 }
  0xe1   : > { %p9299_p3 = scmp.ne.s32.totalorder %s522_s24, %s9298_s22  ;;  %p9306_p0 = scmp.lt.s32.totalorder %s522_s24, %s522_s24 }
  0xe2   : > { %p9307_p11 = scmp.lt.s32.totalorder %s9298_s22, %s9298_s22 }
  0xe3   : > { %p9301_p8 = pnand %p9299_p3, %p11370_p2 }
  0xe4   : > { %p9308_p1 = por %p9307_p11, %p9306_p0 }
  0xe5   : > { %p9302_p12 = pneg %p9301_p8 }
  0xe7   : > { %p9309_p5 = pnand %p9308_p1, %p9302_p12 }
  0xe9   : > { %9312 = shalt.err (!%p9309_p5)
}
  0xea   : > { %8292 = dma.hbm_to_vmem [thread:$0]  (!%p11368_p7), %s11300_s15, 64, %s522_s24, [#allocation24]  }
  0xeb   : > { %s8249_s7 = smul.u32 12288, %s9613_s26  ;;  %s544_s0 = scalar_lea.vmem [#allocation3], %s8248_s23 }
  0xec   : > { %s551_s5 = sshll.u32 %s544_s0, 4  ;;  %s7405_s21 = sshll.u32 %s9834_s17, 8  ;;  %s10031_s5 = int_to_ptr.vmem [resolvable:$true] %s551_s5 }
  0xed   : > { %s10029_s1 = scalar_lea.hbm %s11287_s2, %s8249_s7  ;;  %s541_s30 = scalar_lea.sflag [#allocation4], %s9834_s17 }
  0xee   : > { %s9313_s22 = scalar_lea.hbm %s10029_s1, 12288  ;;  %p11371_p11 = scmp.ne.s32.totalorder %s11358_s20, 0 }
  0xef   : > { %p9314_p1 = scmp.ne.s32.totalorder %s10029_s1, %s9313_s22  ;;  %s9318_s16 = scalar_lea.hbm %s11287_s2, 73728 }
  0xf0   : > { %p9319_p13 = scmp.lt.u32.totalorder %s10029_s1, %s11287_s2  ;;  %p9320_p4 = scmp.lt.u32.totalorder %s9318_s16, %s9313_s22 }
  0xf1   : > { %p9316_p7 = pnand %p9314_p1, %p11371_p11  ;;  %p9322_p10 = scmp.lt.u32.totalorder %s9313_s22, %s10029_s1 }
  0xf2   : > { %p9321_p6 = por %p9320_p4, %p9319_p13 }
  0xf3   : > { %p9317_p9 = pneg %p9316_p7 }
  0xf4   : > { %p9323_p3 = por %p9322_p10, %p9321_p6 }
  0xf6   : > { %p9324_p2 = pnand %p9323_p3, %p9317_p9 }
  0xf8   : > { %9327 = shalt.err (!%p9324_p2)
}
  0xf9   : > { %s9328_s0 = scalar_lea.vmem %s10031_s5, 12288  ;;  %s9632_s27 = smov [#allocation3]  }
  0xfa   : > { %p9329_p8 = scmp.ne.s32.totalorder %s10031_s5, %s9328_s0  ;;  %s9333_s18 = sshll.u32 %s9632_s27, 4  ;;  %s9334_s18 = int_to_ptr.vmem [resolvable:$false] %s9333_s18 }
  0xfb   : > { %s9335_s24 = scalar_lea.vmem %s9334_s18, 24576  ;;  %p9336_p5 = scmp.lt.s32.totalorder %s10031_s5, %s9334_s18 }
  0xfc   : > { %p9331_p12 = pnand %p9329_p8, %p11371_p11  ;;  %p9337_p1 = scmp.lt.s32.totalorder %s9335_s24, %s9328_s0 }
  0xfe   : > { %p9332_p0 = pneg %p9331_p12  ;;  %p9338_p7 = por %p9337_p1, %p9336_p5 }
 0x100   : > { %p9339_p13 = pnand %p9338_p7, %p9332_p0 }
 0x102   : > { %9342 = shalt.err (!%p9339_p13)
}
 0x103   : > { %s9633_s22 = smov 384   ;;  %s9634_s23 = smov 24  }
 0x104   : > { %p11372_p9 = scmp.ne.s32.totalorder %s11350_s29, 0  ;;  %s8172_s16 = sshll.u32 %s9613_s26, 12 }
 0x105   : > { %s10062_s0 = scalar_lea.hbm %s11289_s4, %s8172_s16  ;;  %s584_s27 = scalar_lea.vmem [#allocation7], %s7405_s21 }
 0x106   : > { %8296 = dma.hbm_to_vmem [thread:$0]  (!%p11372_p9), %s10029_s1, 12288, %s10031_s5, %s541_s30, %s9633_s22, %s9633_s22, %s9634_s23  }
 0x107   : > { %s591_s18 = sshll.u32 %s584_s27, 4  ;;  %s9343_s24 = scalar_lea.hbm %s10062_s0, 4096  ;;  %s10066_s18 = int_to_ptr.vmem [resolvable:$true] %s591_s18 }
 0x108   : > { %p9344_p4 = scmp.ne.s32.totalorder %s10062_s0, %s9343_s24  ;;  %s9348_s30 = scalar_lea.hbm %s11289_s4, 24576 }
 0x109   : > { %p9349_p3 = scmp.lt.u32.totalorder %s10062_s0, %s11289_s4  ;;  %p9350_p2 = scmp.lt.u32.totalorder %s9348_s30, %s9343_s24 }
 0x10a   : > { %p9346_p6 = pnand %p9344_p4, %p11371_p11  ;;  %p9352_p12 = scmp.lt.u32.totalorder %s9343_s24, %s10062_s0 }
 0x10b   : > { %p9351_p8 = por %p9350_p2, %p9349_p3 }
 0x10c   : > { %p9347_p10 = pneg %p9346_p6 }
 0x10d   : > { %p9353_p0 = por %p9352_p12, %p9351_p8 }
 0x10f   : > { %p9354_p5 = pnand %p9353_p0, %p9347_p10 }
 0x111   : > { %9357 = shalt.err (!%p9354_p5)
}
 0x112   : > { %s9358_s21 = scalar_lea.vmem %s10066_s18, 4096  ;;  %s9635_s16 = smov [#allocation7]  }
 0x113   : > { %p9359_p1 = scmp.ne.s32.totalorder %s10066_s18, %s9358_s21  ;;  %s9363_s14 = sshll.u32 %s9635_s16, 4  ;;  %s9364_s14 = int_to_ptr.vmem [resolvable:$false] %s9363_s14 }
 0x114   : > { %s9365_s7 = scalar_lea.vmem %s9364_s14, 8192  ;;  %p9366_p4 = scmp.lt.s32.totalorder %s10066_s18, %s9364_s14 }
 0x115   : > { %p9361_p7 = pnand %p9359_p1, %p11371_p11  ;;  %p9367_p6 = scmp.lt.s32.totalorder %s9365_s7, %s9358_s21 }
 0x117   : > { %p9362_p13 = pneg %p9361_p7  ;;  %p9368_p3 = por %p9367_p6, %p9366_p4 }
 0x119   : > { %p9369_p2 = pnand %p9368_p3, %p9362_p13 }
 0x11b   : > { %9372 = shalt.err (!%p9369_p2)
}
 0x11c   : > { %s11328_s27 = smov 128   ;;  %s9637_s24 = smov 8  }
 0x11d   : > { %s11373_s5 = scalar_lea.sflag [#allocation6], %s9837_s19  ;;  %s10098_s22 = scalar_lea.hbm %s11291_s6, %s9894_s28 }
 0x11e   : > { %8302 = dma.hbm_to_vmem [thread:$0]  (!%p11372_p9), %s10062_s0, 4096, %s10066_s18, %s11373_s5, %s11328_s27, %s11328_s27, %s9637_s24  }
 0x11f   : > { %s624_s23 = scalar_lea.vmem [#allocation10], %s9891_s25  ;;  %s7417_s16 = sshll.u32 %s9834_s17, 11 }
 0x120   : > { %s632_s21 = sshll.u32 %s624_s23, 4  ;;  %s9373_s14 = scalar_lea.hbm %s10098_s22, 32  ;;  %s633_s21 = int_to_ptr.vmem [resolvable:$true] %s632_s21 }
 0x121   : > { %p9374_p10 = scmp.ne.s32.totalorder %s10098_s22, %s9373_s14  ;;  %s9378_s18 = scalar_lea.hbm %s11291_s6, 192 }
 0x122   : > { %p9379_p0 = scmp.lt.u32.totalorder %s10098_s22, %s11291_s6  ;;  %p9380_p5 = scmp.lt.u32.totalorder %s9378_s18, %s9373_s14 }
 0x123   : > { %p9376_p8 = pnand %p9374_p10, %p11371_p11  ;;  %p9382_p7 = scmp.lt.u32.totalorder %s9373_s14, %s10098_s22 }
 0x124   : > { %p9381_p1 = por %p9380_p5, %p9379_p0 }
 0x125   : > { %p9377_p12 = pneg %p9376_p8 }
 0x126   : > { %p9383_p13 = por %p9382_p7, %p9381_p1 }
 0x128   : > { %p9384_p4 = pnand %p9383_p13, %p9377_p12 }
 0x12a   : > { %9387 = shalt.err (!%p9384_p4)
}
 0x12b   : > { %s9388_s30 = scalar_lea.vmem %s633_s21, 32  ;;  %s9638_s23 = smov [#allocation10]  }
 0x12c   : > { %p9389_p6 = scmp.ne.s32.totalorder %s633_s21, %s9388_s30  ;;  %s9393_s3 = sshll.u32 %s9638_s23, 4  ;;  %s9394_s3 = int_to_ptr.vmem [resolvable:$false] %s9393_s3 }
 0x12d   : > { %s9395_s7 = scalar_lea.vmem %s9394_s3, 64  ;;  %p9396_p10 = scmp.lt.s32.totalorder %s633_s21, %s9394_s3 }
 0x12e   : > { %p9391_p3 = pnand %p9389_p6, %p11371_p11  ;;  %p9397_p8 = scmp.lt.s32.totalorder %s9395_s7, %s9388_s30 }
 0x130   : > { %p9392_p2 = pneg %p9391_p3  ;;  %p9398_p9 = por %p9397_p8, %p9396_p10 }
 0x132   : > { %p9399_p0 = pnand %p9398_p9, %p9392_p2 }
 0x134   : > { %9402 = shalt.err (!%p9399_p0)
}
 0x135   : > { %p11374_p5 = scmp.ne.s32.totalorder %s11350_s29, 0  ;;  %s11375_s14 = scalar_lea.sflag [#allocation9], %s9837_s19 }
 0x136   : > { %s8176_s0 = sshll.u32 %s9613_s26, 15  ;;  %s662_s1 = scalar_lea.vmem [#allocation13], %s7417_s16 }
 0x137   : > { %8308 = dma.hbm_to_vmem [thread:$0]  (!%p11374_p5), %s10098_s22, 32, %s633_s21, %s11375_s14  }
 0x138   : > { %s10127_s3 = scalar_lea.hbm %s11293_s8, %s8176_s0  ;;  %s669_s30 = sshll.u32 %s662_s1, 4  ;;  %s10131_s30 = int_to_ptr.vmem [resolvable:$true] %s669_s30 }
 0x139   : > { %s9403_s23 = scalar_lea.hbm %s10127_s3, 32768  ;;  %s9408_s7 = scalar_lea.hbm %s11293_s8, 196608 }
 0x13a   : > { %p9404_p9 = scmp.ne.s32.totalorder %s10127_s3, %s9403_s23  ;;  %p9409_p7 = scmp.lt.u32.totalorder %s10127_s3, %s11293_s8 }
 0x13b   : > { %p9410_p13 = scmp.lt.u32.totalorder %s9408_s7, %s9403_s23  ;;  %p9412_p6 = scmp.lt.u32.totalorder %s9403_s23, %s10127_s3 }
 0x13c   : > { %p9406_p12 = pnand %p9404_p9, %p11371_p11 }
 0x13d   : > { %p9411_p4 = por %p9410_p13, %p9409_p7 }
 0x13e   : > { %p9407_p1 = pneg %p9406_p12 }
 0x13f   : > { %p9413_p3 = por %p9412_p6, %p9411_p4 }
 0x141   : > { %p9414_p2 = pnand %p9413_p3, %p9407_p1 }
 0x143   : > { %9417 = shalt.err (!%p9414_p2)
}
 0x144   : > { %s9418_s5 = scalar_lea.vmem %s10131_s30, 32768  ;;  %s9639_s1 = smov [#allocation13]  }
 0x145   : > { %p9419_p10 = scmp.ne.s32.totalorder %s10131_s30, %s9418_s5  ;;  %s9423_s22 = sshll.u32 %s9639_s1, 4  ;;  %s9424_s22 = int_to_ptr.vmem [resolvable:$false] %s9423_s22 }
 0x146   : > { %s9425_s21 = scalar_lea.vmem %s9424_s22, 65536  ;;  %p9426_p9 = scmp.lt.s32.totalorder %s10131_s30, %s9424_s22 }
 0x147   : > { %p9421_p8 = pnand %p9419_p10, %p11371_p11  ;;  %p9427_p12 = scmp.lt.s32.totalorder %s9425_s21, %s9418_s5 }
 0x149   : > { %p9422_p0 = pneg %p9421_p8  ;;  %p9428_p7 = por %p9427_p12, %p9426_p9 }
 0x14b   : > { %p9429_p13 = pnand %p9428_p7, %p9422_p0 }
 0x14d   : > { %9432 = shalt.err (!%p9429_p13)
}
 0x14e   : > { %s9640_s23 = smov 1024   ;;  %s9641_s7 = smov 64  }
 0x14f   : > { %s11376_s14 = scalar_lea.sflag [#allocation12], %s9837_s19  ;;  %s10161_s5 = scalar_lea.hbm %s11295_s10, %s8176_s0 }
 0x150   : > { %8314 = dma.hbm_to_vmem [thread:$0]  (!%p11374_p5), %s10127_s3, 32768, %s10131_s30, %s11376_s14, %s9640_s23, %s9640_s23, %s9641_s7  }
 0x151   : > { %s702_s22 = scalar_lea.vmem [#allocation16], %s7417_s16  ;;  %s9433_s27 = scalar_lea.hbm %s10161_s5, 32768 }
 0x152   : > { %s709_s21 = sshll.u32 %s702_s22, 4  ;;  %p9434_p1 = scmp.ne.s32.totalorder %s10161_s5, %s9433_s27  ;;  %s10165_s21 = int_to_ptr.vmem [resolvable:$true] %s709_s21 }
 0x153   : > { %s9438_s23 = scalar_lea.hbm %s11295_s10, 196608  ;;  %p9439_p3 = scmp.lt.u32.totalorder %s10161_s5, %s11295_s10 }
 0x154   : > { %p9436_p4 = pnand %p9434_p1, %p11371_p11  ;;  %p9440_p2 = scmp.lt.u32.totalorder %s9438_s23, %s9433_s27 }
 0x155   : > { %p9442_p8 = scmp.lt.u32.totalorder %s9433_s27, %s10161_s5 }
 0x156   : > { %p9437_p6 = pneg %p9436_p4  ;;  %p9441_p10 = por %p9440_p2, %p9439_p3 }
 0x158   : > { %p9443_p0 = por %p9442_p8, %p9441_p10 }
 0x15a   : > { %p9444_p9 = pnand %p9443_p0, %p9437_p6 }
 0x15c   : > { %9447 = shalt.err (!%p9444_p9)
}
 0x15d   : > { %s9448_s17 = scalar_lea.vmem %s10165_s21, 32768  ;;  %s9642_s16 = smov [#allocation16]  }
 0x15e   : > { %p9449_p12 = scmp.ne.s32.totalorder %s10165_s21, %s9448_s17  ;;  %s9453_s14 = sshll.u32 %s9642_s16, 4  ;;  %s9454_s14 = int_to_ptr.vmem [resolvable:$false] %s9453_s14 }
 0x15f   : > { %s9455_s18 = scalar_lea.vmem %s9454_s14, 65536  ;;  %p9456_p1 = scmp.lt.s32.totalorder %s10165_s21, %s9454_s14 }
 0x160   : > { %p9451_p7 = pnand %p9449_p12, %p11371_p11  ;;  %p9457_p4 = scmp.lt.s32.totalorder %s9455_s18, %s9448_s17 }
 0x162   : > { %p9452_p13 = pneg %p9451_p7  ;;  %p9458_p3 = por %p9457_p4, %p9456_p1 }
 0x164   : > { %p9459_p2 = pnand %p9458_p3, %p9452_p13 }
 0x166   : > { %9462 = shalt.err (!%p9459_p2)
}
 0x167   : > { %s11377_s27 = smov 128   ;;  %s11378_s1 = scalar_lea.sflag [#allocation15], %s9837_s19 }
 0x168   : > { %8320 = dma.hbm_to_vmem [thread:$0]  (!%p11374_p5), %s10161_s5, 32768, %s10165_s21, %s11378_s1, %s11377_s27, %s11377_s27, %s9637_s24  }
 0x169   : > { %s10197_s30 = scalar_lea.hbm %s11297_s12, %s9894_s28  ;;  %s742_s23 = scalar_lea.vmem [#allocation19], %s9891_s25 }
 0x16a   : > { %s750_s0 = sshll.u32 %s742_s23, 4  ;;  %s9463_s7 = scalar_lea.hbm %s10197_s30, 32  ;;  %s751_s0 = int_to_ptr.vmem [resolvable:$true] %s750_s0 }
 0x16b   : > { %p9464_p6 = scmp.ne.s32.totalorder %s10197_s30, %s9463_s7  ;;  %s9468_s24 = scalar_lea.hbm %s11297_s12, 192 }
 0x16c   : > { %p9469_p0 = scmp.lt.u32.totalorder %s10197_s30, %s11297_s12  ;;  %p9470_p9 = scmp.lt.u32.totalorder %s9468_s24, %s9463_s7 }
 0x16d   : > { %p9466_p10 = pnand %p9464_p6, %p11371_p11  ;;  %p9472_p7 = scmp.lt.u32.totalorder %s9463_s7, %s10197_s30 }
 0x16e   : > { %p9471_p12 = por %p9470_p9, %p9469_p0 }
 0x16f   : > { %p9467_p8 = pneg %p9466_p10 }
 0x170   : > { %p9473_p13 = por %p9472_p7, %p9471_p12 }
 0x172   : > { %p9474_p1 = pnand %p9473_p13, %p9467_p8 }
 0x174   : > { %9477 = shalt.err (!%p9474_p1)
}
 0x175   : > { %s9478_s14 = scalar_lea.vmem %s751_s0, 32  ;;  %s9643_s18 = smov [#allocation19]  }
 0x176   : > { %p9479_p4 = scmp.ne.s32.totalorder %s751_s0, %s9478_s14  ;;  %s9483_s27 = sshll.u32 %s9643_s18, 4  ;;  %s9484_s27 = int_to_ptr.vmem [resolvable:$false] %s9483_s27 }
 0x177   : > { %s9485_s1 = scalar_lea.vmem %s9484_s27, 64  ;;  %p9486_p6 = scmp.lt.s32.totalorder %s751_s0, %s9484_s27 }
 0x178   : > { %p9481_p3 = pnand %p9479_p4, %p11371_p11  ;;  %p9487_p10 = scmp.lt.s32.totalorder %s9485_s1, %s9478_s14 }
 0x17a   : > { %p9482_p2 = pneg %p9481_p3  ;;  %p9488_p5 = por %p9487_p10, %p9486_p6 }
 0x17c   : > { %p9489_p0 = pnand %p9488_p5, %p9482_p2 }
 0x17e   : > { %9492 = shalt.err (!%p9489_p0)
}
 0x17f   : > { %p11379_p9 = scmp.ne.s32.totalorder %s11350_s29, 0  ;;  %s11380_s22 = scalar_lea.sflag [#allocation18], %s9837_s19 }
 0x180   : > { %s10223_s7 = scalar_lea.hbm %s11298_s13, %s9894_s28  ;;  %s761_s17 = scalar_lea.vmem [#allocation20], %s9891_s25 }
 0x181   : > { %8326 = dma.hbm_to_vmem [thread:$0]  (!%p11379_p9), %s10197_s30, 32, %s751_s0, %s11380_s22  }
 0x182   : > { %s769_s16 = sshll.u32 %s761_s17, 4  ;;  %s758_s24 = scalar_lea.sflag [#allocation21], %s9837_s19  ;;  %s770_s16 = int_to_ptr.vmem [resolvable:$true] %s769_s16 }
 0x183   : > { %s9493_s5 = scalar_lea.hbm %s10223_s7, 32  ;;  %s9498_s0 = scalar_lea.hbm %s11298_s13, 192 }
 0x184   : > { %p9494_p5 = scmp.ne.s32.totalorder %s10223_s7, %s9493_s5  ;;  %p9499_p7 = scmp.lt.u32.totalorder %s10223_s7, %s11298_s13 }
 0x185   : > { %p9500_p13 = scmp.lt.u32.totalorder %s9498_s0, %s9493_s5  ;;  %p9502_p4 = scmp.lt.u32.totalorder %s9493_s5, %s10223_s7 }
 0x186   : > { %p9496_p8 = pnand %p9494_p5, %p11371_p11 }
 0x187   : > { %p9501_p1 = por %p9500_p13, %p9499_p7 }
 0x188   : > { %p9497_p12 = pneg %p9496_p8 }
 0x189   : > { %p9503_p3 = por %p9502_p4, %p9501_p1 }
 0x18b   : > { %p9504_p2 = pnand %p9503_p3, %p9497_p12 }
 0x18d   : > { %9507 = shalt.err (!%p9504_p2)
}
 0x18e   : > { %s9508_s19 = scalar_lea.vmem %s770_s16, 32  ;;  %s9644_s25 = smov [#allocation20]  }
 0x18f   : > { %p9509_p6 = scmp.ne.s32.totalorder %s770_s16, %s9508_s19  ;;  %s9513_s18 = sshll.u32 %s9644_s25, 4  ;;  %s9514_s18 = int_to_ptr.vmem [resolvable:$false] %s9513_s18 }
 0x190   : > { %s9515_s27 = scalar_lea.vmem %s9514_s18, 64  ;;  %p9516_p5 = scmp.lt.s32.totalorder %s770_s16, %s9514_s18 }
 0x191   : > { %p9511_p10 = pnand %p9509_p6, %p11371_p11  ;;  %p9517_p8 = scmp.lt.s32.totalorder %s9515_s27, %s9508_s19 }
 0x193   : > { %p9512_p0 = pneg %p9511_p10  ;;  %p9518_p9 = por %p9517_p8, %p9516_p5 }
 0x195   : > { %p9519_p7 = pnand %p9518_p9, %p9512_p0 }
 0x197   : > { %9522 = shalt.err (!%p9519_p7)
}
 0x198   : > { %p11381_p13 = scmp.ne.s32.totalorder %s11350_s29, 0  ;;  %s11382_s1 = sld [smem:[#allocation42_spill]] }
 0x19a   : > { %8329 = dma.hbm_to_vmem [thread:$0]  (!%p11381_p13), %s10223_s7, 32, %s770_s16, %s758_s24  }
 0x19e   : > { %p11383_p12 = scmp.ne.s32.totalorder %s11382_s1, 0 }
 0x19f   : > { %s11384_s22 = sld [smem:[#allocation34_spill]] (!%p11383_p12)  ;;  %s11385_s20 = sld [smem:[#allocation41_spill]] (!%p11383_p12) }
 0x1a0   : > { %778 = sbr.rel (%p11383_p12) target bundleno = 4827 (0x12db), region = 84 }
 0x1a5   : > { %s10247_s3 = sand.u32 (!%p11383_p12), 1, %s11384_s22   ;;  %p11386_p11 = scmp.ne.s32.totalorder (!%p11383_p12), %s11385_s20, 0 }
 0x1a6   : > { %s8252_s23 = smul.u32 (!%p11383_p12), 768, %s10247_s3  ;;  %s781_s17 = scalar_lea.sflag (!%p11383_p12), [#allocation4], %s10247_s3 }
 0x1a8   : > { %s10251_s5 = scalar_lea.vmem [#allocation3], %s8252_s23 }
 0x1a9   : > { %9556 = dma.done.wait (%p11386_p11), %s781_s17, 12288  }
 0x1aa   : > { %9558 = vsyncadd (%p11386_p11), %s781_s17, 4294955008  ;;  %s11387_s29 = sld [smem:[#allocation39_spill]]  ;;  %s8253_s24 = smul.u32 6, %s10247_s3 }
 0x1ac   : > { %s10263_s30 = scalar_lea.vmem [#allocation5], %s8253_s24 }
 0x1b0   : > { %s11388_s7 = sadd.s32 4294967295, %s11387_s29  }
 0x1b1   : > { %s10259_s16 = sand.u32 1, %s11388_s7  }
 0x1b2   : > { %s790_s21 = scalar_lea.sflag [#allocation6], %s10259_s16 }
 0x1b3   : > { %9560 = dma.done.wait (%p11386_p11), %s790_s21, 4192  }
 0x1b4   : > { %9562 = vsyncadd (%p11386_p11), %s790_s21, 4294963104  ;;  %s7436_s0 = sshll.u32 %s10247_s3, 8  ;;  %s10271_s14 = sshll.u32 %s10247_s3, 1 }
 0x1b5   : > { %s10273_s28 = scalar_lea.vmem [#allocation7], %s7436_s0  ;;  %s808_s19 = scalar_lea.sflag [#allocation9], %s10259_s16 }
 0x1b6   : > { %9564 = dma.done.wait (%p11386_p11), %s808_s19, 64  }
 0x1b7   : > { %9566 = vsyncadd (%p11386_p11), %s808_s19, 4294967232  ;;  %s826_s27 = scalar_lea.sflag [#allocation12], %s10259_s16 }
 0x1b8   : > { %9568 = dma.done.wait (%p11386_p11), %s826_s27, 32800  }
 0x1b9   : > { %9570 = vsyncadd (%p11386_p11), %s826_s27, 4294934496  ;;  %s7440_s22 = sshll.u32 %s10247_s3, 11  ;;  %s7441_s23 = sshll.u32 %s10247_s3, 4 }
 0x1ba   : > { %s10290_s17 = scalar_lea.vmem [#allocation13], %s7440_s22  ;;  %s844_s29 = scalar_lea.sflag [#allocation15], %s10259_s16 }
 0x1bb   : > { %s10293_s7 = scalar_lea.vmem [#allocation14], %s7441_s23 }
 0x1bc   : > { %9572 = dma.done.wait (%p11386_p11), %s844_s29, 33024  }
 0x1bd   : > { %9574 = vsyncadd (%p11386_p11), %s844_s29, 4294934272  ;;  %s10299_s24 = scalar_lea.vmem [#allocation16], %s7440_s22  ;;  %s862_s21 = scalar_lea.sflag [#allocation18], %s10259_s16 }
 0x1be   : > { %9576 = dma.done.wait (%p11386_p11), %s862_s21, 64  }
 0x1bf   : > { %9578 = vsyncadd (%p11386_p11), %s862_s21, 4294967232  ;;  %s880_s19 = scalar_lea.sflag [#allocation21], %s10259_s16 }
 0x1c0   : > { %9580 = dma.done.wait (%p11386_p11), %s880_s19, 32  }
 0x1c1   : > { %9582 = vsyncadd (%p11386_p11), %s880_s19, 4294967264  ;;  %s11389_s22 = sld [smem:[#allocation40_spill]] }
 0x1c7   : > { %p11390_p9 = scmp.ne.s32.totalorder %s11389_s22, 0 }
 0x1c9   : > { %9584 = dma.done.wait (%p11390_p9), [#allocation21], 8192  }
 0x1ca   : > { %9586 = vsyncadd (%p11390_p9), [#allocation21], 4294959104 }
 0x1cb   : > { %9588 = dma.done.wait (%p11390_p9), [#allocation24], 64  }
 0x1cc   : > { %9590 = vsyncadd (%p11390_p9), [#allocation24], 4294967232  ;;  %s11391_s23 = sld [smem:[#allocation37_spill]]  ;;  %s11392_s19 = sld [smem:[#allocation46_spill]] }
 0x1cd   : > { %s11393_s1 = sld [smem:[#allocation52_spill]] }
 0x1ce   : > { %s11394_s25 = sld [smem:[#allocation36_spill]] }
 0x1d2   : > { %p1000_p1 = scmp.lt.s32.totalorder %s11391_s23, 1 }
 0x1d4   : > { %s11419_s23 = smov (!%p1000_p1, %s11391_s23), 1  ;;  %p7452_p4 = scmp.ne.s32.totalorder %s11394_s25, 0 }
 0x1d5   : > { %s8182_s16 = sshll.u32 %s11419_s23, 4  ;;  %s8183_s29 = sshll.u32 %s11419_s23, 5 }
 0x1d6   : > { %s1004_s27 = scalar_lea.vmem %s11392_s19, %s8182_s16  ;;  %s10330_s18 = scalar_lea.vmem %s11393_s1, %s8183_s29 }
 0x1d7   : > { %1014 = sbr.rel (%p7452_p4) target bundleno = 478 (0x1de), region = 144  ;;  %v1015_v0 = vld [vmem:[%s1004_s27] sm:$0xff] (!%p7452_p4)  ;;  %v1016_v1 = vld [vmem:[%s1004_s27 + $0x8] sm:$0xff] (!%p7452_p4) }
 0x1d8   : > { %1017 = vst [vmem:[#allocation2] sm:$0xff] (!%p7452_p4), %v1015_v0  ;;  %1018 = vst [vmem:[#allocation2 + $0x8] sm:$0xff] (!%p7452_p4), %v1016_v1 }
 0x1de PF: > { %v8413_v2 = vld [vmem:[%s10251_s5 + $0xc] ss:$24 sps:$4 sm:$0xff]   ;;  %v8415_v3 = vld [vmem:[%s10251_s5 + $0x8] ss:$24 sps:$4 sm:$0xff]   ;;  %v8416_v4 = vld [vmem:[%s10251_s5 + $0x3c] ss:$24 sps:$4 sm:$0xff]  }
 0x1df   : > { %1672 = vmatprep.subr.bf16.mxu1 %v8413_v2  ;;  %v8418_v5 = vld [vmem:[%s10251_s5 + $0x4] ss:$24 sps:$4 sm:$0xff]   ;;  %v8420_v6 = vld [vmem:[%s10251_s5 + $0x38] ss:$24 sps:$4 sm:$0xff]   ;;  %v8424_v9 = vld [vmem:[%s10251_s5 + $0x34] ss:$24 sps:$4 sm:$0xff]  }
 0x1e0   : > { %1673 = vmatpush1.bf16.msra.mxu1 %v8415_v3  ;;  %v8421_v7 = vld [vmem:[%s10251_s5] ss:$24 sps:$4 sm:$0xff]   ;;  %v8422_v8 = vld [vmem:[%s10251_s5 + $0x6c] ss:$24 sps:$4 sm:$0xff]   ;;  %1631 = vmatprep.subr.bf16.mxu0 %v8418_v5  ;;  %v8427_v10 = vld [vmem:[%s10251_s5 + $0x30] ss:$24 sps:$4 sm:$0xff]  }
 0x1e1   : > { %1674 = vmatprep.subr.bf16.mxu1 %v8416_v4  ;;  %1632 = vmatpush1.bf16.msra.mxu0 %v8421_v7  ;;  %v8426_v11 = vld [vmem:[%s10251_s5 + $0x68] ss:$24 sps:$4 sm:$0xff]   ;;  %v8428_v12 = vld [vmem:[%s10251_s5 + $0x9c] ss:$24 sps:$4 sm:$0xff]   ;;  %v8432_v15 = vld [vmem:[%s10251_s5 + $0x98] ss:$24 sps:$4 sm:$0xff]   ;;  %v1121_v7 = vlaneseq }
 0x1e2   : > { %1633 = vmatprep.subr.bf16.mxu0 %v8424_v9  ;;  %v8430_v13 = vld [vmem:[%s10251_s5 + $0x64] ss:$24 sps:$4 sm:$0xff]   ;;  %v8433_v14 = vld [vmem:[%s10251_s5 + $0x60] ss:$24 sps:$4 sm:$0xff]   ;;  %v8436_v16 = vld [vmem:[%s10251_s5 + $0x94] ss:$24 sps:$4 sm:$0xff]  }
 0x1e3   : > { %v8434_v17 = vld [vmem:[%s10251_s5 + $0xcc] ss:$24 sps:$4 sm:$0xff]   ;;  %v8438_v18 = vld [vmem:[%s10251_s5 + $0xc8] ss:$24 sps:$4 sm:$0xff]   ;;  %v8440_v21 = vld [vmem:[%s10251_s5 + $0xfc] ss:$24 sps:$4 sm:$0xff]  }
 0x1e4   : > { %1675 = vmatpush1.bf16.msra.mxu1 %v8420_v6  ;;  %v8439_v19 = vld [vmem:[%s10251_s5 + $0x90] ss:$24 sps:$4 sm:$0xff]   ;;  %v8442_v20 = vld [vmem:[%s10251_s5 + $0xc4] ss:$24 sps:$4 sm:$0xff]   ;;  %v8445_v22 = vld [vmem:[%s10251_s5 + $0xc0] ss:$24 sps:$4 sm:$0xff]  }
 0x1e5   : > { %1676 = vmatprep.subr.bf16.mxu1 %v8422_v8  ;;  %1634 = vmatpush1.bf16.msra.mxu0 %v8427_v10  ;;  %v8444_v23 = vld [vmem:[%s10251_s5 + $0xf8] ss:$24 sps:$4 sm:$0xff]   ;;  %v8448_v24 = vld [vmem:[%s10251_s5 + $0xf4] ss:$24 sps:$4 sm:$0xff]   ;;  %v8450_v26 = vld [vmem:[%s10251_s5 + $0x128] ss:$24 sps:$4 sm:$0xff]  }
 0x1e6   : > { %1635 = vmatprep.subr.bf16.mxu0 %v8430_v13  ;;  %v8446_v25 = vld [vmem:[%s10251_s5 + $0x12c] ss:$24 sps:$4 sm:$0xff]   ;;  %v8451_v27 = vld [vmem:[%s10251_s5 + $0xf0] ss:$24 sps:$4 sm:$0xff]   ;;  %v8452_v29 = vld [vmem:[%s10251_s5 + $0x15c] ss:$24 sps:$4 sm:$0xff]  }
 0x1e7   : > { %v8454_v28 = vld [vmem:[%s10251_s5 + $0x124] ss:$24 sps:$4 sm:$0xff]   ;;  %v8457_v30 = vld [vmem:[%s10251_s5 + $0x120] ss:$24 sps:$4 sm:$0xff]   ;;  %v8460_v32 = vld [vmem:[%s10251_s5 + $0x154] ss:$24 sps:$4 sm:$0xff]  }
 0x1e8   : > { %1677 = vmatpush1.bf16.msra.mxu1 %v8426_v11  ;;  %v8456_v31 = vld [vmem:[%s10251_s5 + $0x158] ss:$24 sps:$4 sm:$0xff]   ;;  %v8458_v33 = vld [vmem:[%s10251_s5 + $0x18c] ss:$24 sps:$4 sm:$0xff]   ;;  %v8462_v34 = vld [vmem:[%s10251_s5 + $0x188] ss:$24 sps:$4 sm:$0xff]  }
 0x1e9   : > { %1678 = vmatprep.subr.bf16.mxu1 %v8428_v12  ;;  %1636 = vmatpush1.bf16.msra.mxu0 %v8433_v14  ;;  %v8463_v35 = vld [vmem:[%s10251_s5 + $0x150] ss:$24 sps:$4 sm:$0xff]   ;;  %v8466_v36 = vld [vmem:[%s10251_s5 + $0x184] ss:$24 sps:$4 sm:$0xff]   ;;  %v8469_v38 = vld [vmem:[%s10251_s5 + $0x180] ss:$24 sps:$4 sm:$0xff]  }
 0x1ea   : > { %1637 = vmatprep.subr.bf16.mxu0 %v8436_v16  ;;  %v8464_v37 = vld [vmem:[%s10251_s5 + $0x1bc] ss:$24 sps:$4 sm:$0xff]   ;;  %v8468_v39 = vld [vmem:[%s10251_s5 + $0x1b8] ss:$24 sps:$4 sm:$0xff]   ;;  %v8470_v41 = vld [vmem:[%s10251_s5 + $0x1ec] ss:$24 sps:$4 sm:$0xff]  }
 0x1eb   : > { %v8472_v40 = vld [vmem:[%s10251_s5 + $0x1b4] ss:$24 sps:$4 sm:$0xff]   ;;  %v8474_v42 = vld [vmem:[%s10251_s5 + $0x1e8] ss:$24 sps:$4 sm:$0xff]   ;;  %v8478_v44 = vld [vmem:[%s10251_s5 + $0x1e4] ss:$24 sps:$4 sm:$0xff]  }
 0x1ec   : > { %1679 = vmatpush1.bf16.msra.mxu1 %v8432_v15  ;;  %v8475_v43 = vld [vmem:[%s10251_s5 + $0x1b0] ss:$24 sps:$4 sm:$0xff]   ;;  %v8476_v45 = vld [vmem:[%s10251_s5 + $0x21c] ss:$24 sps:$4 sm:$0xff]   ;;  %v8481_v48 = vld [vmem:[%s10251_s5 + $0x1e0] ss:$24 sps:$4 sm:$0xff]  }
 0x1ed   : > { %1680 = vmatprep.subr.bf16.mxu1 %v8434_v17  ;;  %1638 = vmatpush1.bf16.msra.mxu0 %v8439_v19  ;;  %v8480_v46 = vld [vmem:[%s10251_s5 + $0x218] ss:$24 sps:$4 sm:$0xff]   ;;  %v8482_v50 = vld [vmem:[%s10251_s5 + $0x24c] ss:$24 sps:$4 sm:$0xff]   ;;  %v8486_v53 = vld [vmem:[%s10251_s5 + $0x248] ss:$24 sps:$4 sm:$0xff]  }
 0x1ee   : > { %1639 = vmatprep.subr.bf16.mxu0 %v8442_v20  ;;  %v1020_v47 = vld [vmem:[#allocation2 + $0x8] sm:$0xff]  ;;  %v8484_v51 = vld [vmem:[%s10251_s5 + $0x214] ss:$24 sps:$4 sm:$0xff]   ;;  %v8487_v52 = vld [vmem:[%s10251_s5 + $0x210] ss:$24 sps:$4 sm:$0xff]   ;;  %v9645_v6 = vmov 0.0  }
 0x1ef   : > { %v1022_v49 = vpack.c.bf16 %v1020_v47, %v1020_v47  ;;  %v8490_v54 = vld [vmem:[%s10251_s5 + $0x244] ss:$24 sps:$4 sm:$0xff]   ;;  %v8493_v56 = vld [vmem:[%s10251_s5 + $0x240] ss:$24 sps:$4 sm:$0xff]   ;;  %v8496_v58 = vld [vmem:[%s10251_s5 + $0x274] ss:$24 sps:$4 sm:$0xff]  }
 0x1f0   : > { %1681 = vmatpush1.bf16.msra.mxu1 %v8438_v18  ;;  %v8488_v55 = vld [vmem:[%s10251_s5 + $0x27c] ss:$24 sps:$4 sm:$0xff]   ;;  %v8492_v57 = vld [vmem:[%s10251_s5 + $0x278] ss:$24 sps:$4 sm:$0xff]   ;;  %v8494_v59 = vld [vmem:[%s10251_s5 + $0x2ac] ss:$24 sps:$4 sm:$0xff]  }
 0x1f1   : > { %1682 = vmatprep.subr.bf16.mxu1 %v8440_v21  ;;  %1640 = vmatpush1.bf16.msra.mxu0 %v8445_v22  ;;  %v8499_v60 = vld [vmem:[%s10251_s5 + $0x270] ss:$24 sps:$4 sm:$0xff]   ;;  %v8502_v62 = vld [vmem:[%s10251_s5 + $0x2a4] ss:$24 sps:$4 sm:$0xff]   ;;  %v8505_v0 = vld [vmem:[%s10251_s5 + $0x2a0] ss:$24 sps:$4 sm:$0xff]  }
 0x1f2   : > { %1641 = vmatprep.subr.bf16.mxu0 %v8448_v24  ;;  %1704 = vmatprep.mubr.bf16.mxu1 %v1022_v49  ;;  %v8498_v61 = vld [vmem:[%s10251_s5 + $0x2a8] ss:$24 sps:$4 sm:$0xff]   ;;  %v8500_v63 = vld [vmem:[%s10251_s5 + $0x2dc] ss:$24 sps:$4 sm:$0xff]   ;;  %v8504_v1 = vld [vmem:[%s10251_s5 + $0x2d8] ss:$24 sps:$4 sm:$0xff]  }
 0x1f3   : > { %1663 = vmatprep.mubr.bf16.mxu0 %v1022_v49  ;;  %v1019_v2 = vld [vmem:[#allocation2] sm:$0xff]  ;;  %vm9646_vm0 = vmmov 0   ;;  %v10404_v8 = vshrl.u32 %v1121_v7, 7  ;;  %v10410_v10 = vld [vmem:[%s10263_s30] sm:$0x3f]  ;;  %vm1793_vm1 = vcmask 523264  }
 0x1f4   : > { %1683 = vmatpush1.bf16.msra.mxu1 %v8444_v23  ;;  %v8506_v3 = vld [vmem:[%s10251_s5 + $0x2d4] ss:$24 sps:$4 sm:$0xff]   ;;  %v8508_v4 = vld [vmem:[%s10251_s5 + $0x2d0] ss:$24 sps:$4 sm:$0xff]   ;;  %v10397_v5 = vpack.c.bf16 %v1019_v2, %v1019_v2  ;;  %s9647_s30 = smov 64   ;;  %s11395_s0 = sld [smem:[#allocation47_spill]] }
 0x1f5   : > { %1684 = vmatprep.subr.bf16.mxu1 %v8446_v25  ;;  %1642 = vmatpush1.bf16.msra.mxu0 %v8451_v27  ;;  %v10407_v9 = vsub.s32 2, %v10404_v8  ;;  %v10413_v11 = vsub.s32 0, %v10404_v8  ;;  %v8509_v27 = vld [vmem:[%s10251_s5 + $0x10] ss:$24 sps:$4 sm:$0xff]   ;;  %v8541_v47 = vld [vmem:[%s10251_s5 + $0x1f4] ss:$24 sps:$4 sm:$0xff]  }
 0x1f6   : > { %1643 = vmatprep.subr.bf16.mxu0 %v8454_v28  ;;  %v8511_v28 = vld [vmem:[%s10251_s5 + $0x14] ss:$24 sps:$4 sm:$0xff]   ;;  %vm1842_vm2 = vcmask 64512   ;;  %vm1858_vm3 = vcmask 1043456   ;;  %s11398_s3 = scalar_lea.vmem [#allocation11], %s10271_s14 }
 0x1f7   : > { %v1132_v12 = vrot.slane %v10410_v10, %v10407_v9  ;;  %v1124_v14 = vrot.slane %v10410_v10, %v10413_v11 }
 0x1f8   : > { %1685 = vmatpush1.bf16.msra.mxu1 %v8450_v26 }
 0x1f9   : > { %1686 = vmatprep.subr.bf16.mxu1 %v8452_v29  ;;  %1644 = vmatpush1.bf16.msra.mxu0 %v8457_v30  ;;  %v8514_v29 = vld [vmem:[%s10251_s5 + $0x44] ss:$24 sps:$4 sm:$0xff]   ;;  %v8512_v30 = vld [vmem:[%s10251_s5 + $0x40] ss:$24 sps:$4 sm:$0xff]  }
 0x1fa   : > { %1645 = vmatprep.subr.bf16.mxu0 %v8460_v32  ;;  %v8515_v32 = vld [vmem:[%s10251_s5 + $0x70] ss:$24 sps:$4 sm:$0xff]  }
 0x1fc   : > { %1687 = vmatpush1.bf16.msra.mxu1 %v8456_v31  ;;  %v8517_v31 = vld [vmem:[%s10251_s5 + $0x74] ss:$24 sps:$4 sm:$0xff]  }
 0x1fd   : > { %1688 = vmatprep.subr.bf16.mxu1 %v8458_v33  ;;  %1646 = vmatpush1.bf16.msra.mxu0 %v8463_v35  ;;  %v8520_v33 = vld [vmem:[%s10251_s5 + $0xa4] ss:$24 sps:$4 sm:$0xff]   ;;  %v8523_v35 = vld [vmem:[%s10251_s5 + $0xd4] ss:$24 sps:$4 sm:$0xff]  }
 0x1fe   : > { %1647 = vmatprep.subr.bf16.mxu0 %v8466_v36  ;;  %v8521_v36 = vld [vmem:[%s10251_s5 + $0xd0] ss:$24 sps:$4 sm:$0xff]  }
 0x200   : > { %1689 = vmatpush1.bf16.msra.mxu1 %v8462_v34  ;;  %v8518_v34 = vld [vmem:[%s10251_s5 + $0xa0] ss:$24 sps:$4 sm:$0xff]  }
 0x201   : > { %1690 = vmatprep.subr.bf16.mxu1 %v8464_v37  ;;  %1648 = vmatpush1.bf16.msra.mxu0 %v8469_v38  ;;  %v8526_v37 = vld [vmem:[%s10251_s5 + $0x104] ss:$24 sps:$4 sm:$0xff]   ;;  %v8524_v38 = vld [vmem:[%s10251_s5 + $0x100] ss:$24 sps:$4 sm:$0xff]  }
 0x202   : > { %1649 = vmatprep.subr.bf16.mxu0 %v8472_v40  ;;  %v8527_v40 = vld [vmem:[%s10251_s5 + $0x130] ss:$24 sps:$4 sm:$0xff]  }
 0x204   : > { %1691 = vmatpush1.bf16.msra.mxu1 %v8468_v39  ;;  %v8529_v39 = vld [vmem:[%s10251_s5 + $0x134] ss:$24 sps:$4 sm:$0xff]  }
 0x205   : > { %1692 = vmatprep.subr.bf16.mxu1 %v8470_v41  ;;  %1650 = vmatpush1.bf16.msra.mxu0 %v8475_v43  ;;  %v8532_v41 = vld [vmem:[%s10251_s5 + $0x164] ss:$24 sps:$4 sm:$0xff]   ;;  %v8535_v43 = vld [vmem:[%s10251_s5 + $0x194] ss:$24 sps:$4 sm:$0xff]  }
 0x206   : > { %1651 = vmatprep.subr.bf16.mxu0 %v8478_v44  ;;  %v8533_v44 = vld [vmem:[%s10251_s5 + $0x190] ss:$24 sps:$4 sm:$0xff]  }
 0x208   : > { %1693 = vmatpush1.bf16.msra.mxu1 %v8474_v42  ;;  %v8530_v42 = vld [vmem:[%s10251_s5 + $0x160] ss:$24 sps:$4 sm:$0xff]  }
 0x209   : > { %1694 = vmatprep.subr.bf16.mxu1 %v8476_v45  ;;  %1652 = vmatpush1.bf16.msra.mxu0 %v8481_v48  ;;  %v8538_v45 = vld [vmem:[%s10251_s5 + $0x1c4] ss:$24 sps:$4 sm:$0xff]   ;;  %v8539_v48 = vld [vmem:[%s10251_s5 + $0x1f0] ss:$24 sps:$4 sm:$0xff]  }
 0x20a   : > { %1653 = vmatprep.subr.bf16.mxu0 %v8484_v51  ;;  %v8547_v51 = vld [vmem:[%s10251_s5 + $0x254] ss:$24 sps:$4 sm:$0xff]  }
 0x20c   : > { %1695 = vmatpush1.bf16.msra.mxu1 %v8480_v46  ;;  %v8536_v46 = vld [vmem:[%s10251_s5 + $0x1c0] ss:$24 sps:$4 sm:$0xff]  }
 0x20d   : > { %1696 = vmatprep.subr.bf16.mxu1 %v8482_v50  ;;  %1654 = vmatpush1.bf16.msra.mxu0 %v8487_v52  ;;  %v8542_v50 = vld [vmem:[%s10251_s5 + $0x220] ss:$24 sps:$4 sm:$0xff]   ;;  %v8545_v52 = vld [vmem:[%s10251_s5 + $0x250] ss:$24 sps:$4 sm:$0xff]  }
 0x20e   : > { %1655 = vmatprep.subr.bf16.mxu0 %v8490_v54  ;;  %v8548_v54 = vld [vmem:[%s10251_s5 + $0x280] ss:$24 sps:$4 sm:$0xff]  }
 0x210   : > { %1697 = vmatpush1.bf16.msra.mxu1 %v8486_v53  ;;  %v8550_v53 = vld [vmem:[%s10251_s5 + $0x284] ss:$24 sps:$4 sm:$0xff]  }
 0x211   : > { %1698 = vmatprep.subr.bf16.mxu1 %v8488_v55  ;;  %1656 = vmatpush1.bf16.msra.mxu0 %v8493_v56  ;;  %v8553_v55 = vld [vmem:[%s10251_s5 + $0x2b4] ss:$24 sps:$4 sm:$0xff]   ;;  %v8551_v56 = vld [vmem:[%s10251_s5 + $0x2b0] ss:$24 sps:$4 sm:$0xff]  }
 0x212   : > { %1657 = vmatprep.subr.bf16.mxu0 %v8496_v58  ;;  %v8554_v58 = vld [vmem:[%s10251_s5 + $0x2e0] ss:$24 sps:$4 sm:$0xff]  }
 0x214   : > { %1699 = vmatpush1.bf16.msra.mxu1 %v8492_v57  ;;  %v8556_v57 = vld [vmem:[%s10251_s5 + $0x2e4] ss:$24 sps:$4 sm:$0xff]  }
 0x215   : > { %1700 = vmatprep.subr.bf16.mxu1 %v8494_v59  ;;  %1658 = vmatpush1.bf16.msra.mxu0 %v8499_v60  ;;  %v10466_v60 = vld [vmem:[%s11395_s0] sm:$0xff] }
 0x216   : > { %1659 = vmatprep.subr.bf16.mxu0 %v8502_v62 }
 0x218   : > { %1701 = vmatpush1.bf16.msra.mxu1 %v8498_v61 }
 0x219   : > { %1702 = vmatprep.subr.bf16.mxu1 %v8500_v63  ;;  %1660 = vmatpush1.bf16.msra.mxu0 %v8505_v0 }
 0x21a   : > { %1661 = vmatprep.subr.bf16.mxu0 %v8506_v3 }
 0x21c   : > { %1703 = vmatpush1.bf16.msra.mxu1 %v8504_v1 }
 0x21d   : > { %1662 = vmatpush1.bf16.msra.mxu0 %v8508_v4  ;;  %8200 = vmatprep.subr.bf16.mxu1 %v9645_v6 }
 0x21e   : > { %1713 = vmatprep.subr.bf16.mxu0 %v8511_v28 }
 0x21f   : > { %1705 = vmatmul.mubr.bf16.vlgmr.msra.gmra.mrb[0].mxu1 %v10397_v5 }
 0x220   : > { %1664 = vmatmul.mubr.bf16.vlgmr.msra.gmra.mrb[0].mxu0 %v10397_v5  ;;  %8202 = vmatprep.mubr.msk.bf16.mxu1 %vm9646_vm0, %v9645_v6 }
 0x221   : > { %1745 = vmatprep.mubr.bf16.mxu0 %v1022_v49  ;;  %1714 = vmatpush1.bf16.msra.mxu0 %v8509_v27  ;;  %v8544_v49 = vld [vmem:[%s10251_s5 + $0x224] ss:$24 sps:$4 sm:$0xff]   ;;  %s11396_s5 = scalar_lea.vmem [#allocation8], %s10271_s14 }
 0x222   : > { %1715 = vmatprep.subr.bf16.mxu0 %v8514_v29 }
 0x225   : > { %1716 = vmatpush1.bf16.msra.mxu0 %v8512_v30 }
 0x226   : > { %1717 = vmatprep.subr.bf16.mxu0 %v8517_v31 }
 0x229   : > { %1718 = vmatpush1.bf16.msra.mxu0 %v8515_v32 }
 0x22a   : > { %1719 = vmatprep.subr.bf16.mxu0 %v8520_v33 }
 0x22d   : > { %1720 = vmatpush1.bf16.msra.mxu0 %v8518_v34 }
 0x22e   : > { %1721 = vmatprep.subr.bf16.mxu0 %v8523_v35 }
 0x231   : > { %1722 = vmatpush1.bf16.msra.mxu0 %v8521_v36 }
 0x232   : > { %1723 = vmatprep.subr.bf16.mxu0 %v8526_v37 }
 0x235   : > { %1724 = vmatpush1.bf16.msra.mxu0 %v8524_v38 }
 0x236   : > { %1725 = vmatprep.subr.bf16.mxu0 %v8529_v39 }
 0x239   : > { %1726 = vmatpush1.bf16.msra.mxu0 %v8527_v40 }
 0x23a   : > { %1727 = vmatprep.subr.bf16.mxu0 %v8532_v41 }
 0x23d   : > { %1728 = vmatpush1.bf16.msra.mxu0 %v8530_v42 }
 0x23e   : > { %1729 = vmatprep.subr.bf16.mxu0 %v8535_v43 }
 0x241   : > { %1730 = vmatpush1.bf16.msra.mxu0 %v8533_v44 }
 0x242   : > { %1731 = vmatprep.subr.bf16.mxu0 %v8538_v45 }
 0x245   : > { %1732 = vmatpush1.bf16.msra.mxu0 %v8536_v46 }
 0x246   : > { %1733 = vmatprep.subr.bf16.mxu0 %v8541_v47 }
 0x249   : > { %1734 = vmatpush1.bf16.msra.mxu0 %v8539_v48 }
 0x24a   : > { %1735 = vmatprep.subr.bf16.mxu0 %v8544_v49  ;;  %v8559_v49 = vld [vmem:[%s10273_s28 + $0x44] ss:$8 sps:$4 sm:$0xff]  }
 0x24d   : > { %1736 = vmatpush1.bf16.msra.mxu0 %v8542_v50 }
 0x24e   : > { %1737 = vmatprep.subr.bf16.mxu0 %v8547_v51 }
 0x251   : > { %1738 = vmatpush1.bf16.msra.mxu0 %v8545_v52 }
 0x252   : > { %1739 = vmatprep.subr.bf16.mxu0 %v8550_v53  ;;  %v8557_v53 = vld [vmem:[%s10273_s28 + $0x40] ss:$8 sps:$4 sm:$0xff]  }
 0x255   : > { %1740 = vmatpush1.bf16.msra.mxu0 %v8548_v54 }
 0x256   : > { %1741 = vmatprep.subr.bf16.mxu0 %v8553_v55  ;;  %v8562_v55 = vld [vmem:[%s10273_s28 + $0x54] ss:$8 sps:$4 sm:$0xff]  }
 0x259   : > { %1742 = vmatpush1.bf16.msra.mxu0 %v8551_v56  ;;  %v8560_v56 = vld [vmem:[%s10273_s28 + $0x50] ss:$8 sps:$4 sm:$0xff]  }
 0x25a   : > { %1743 = vmatprep.subr.bf16.mxu0 %v8556_v57  ;;  %v8565_v57 = vld [vmem:[%s10273_s28 + $0x64] ss:$8 sps:$4 sm:$0xff]  }
 0x25d   : > { %1744 = vmatpush1.bf16.msra.mxu0 %v8554_v58  ;;  %v8563_v58 = vld [vmem:[%s10273_s28 + $0x60] ss:$8 sps:$4 sm:$0xff]  }
 0x260   : > { %1746 = vmatmul.mubr.bf16.vlgmr.msra.gmra.mrb[4].mxu0 %v10397_v5  ;;  %v10471_v5 = vsub.s32 4, %v10404_v8 }
 0x2f2   : > { %v1706_v13 = vpop.f32.mrb[0].mxu1 }
 0x2f3   : > { %v1707_v15 = vadd.f32 %v1706_v13, %v1132_v12  ;;  %v10419_v16 = vpop.f32.mrb[1].mxu1  ;;  %v1665_v20 = vpop.f32.mrb[0].mxu0  ;;  %v1140_v12 = vrot.slane %v10410_v10, %v10471_v5 }
 0x2f4   : > { %v1710_v17 = vpop.f32.mrb[2].mxu1  ;;  %v1666_v21 = vadd.f32 %v1665_v20, %v1124_v14  ;;  %v10421_v22 = vpop.f32.mrb[1].mxu0 }
 0x2f5   : > { %v1756_v18 = vpack.c.bf16 %v1707_v15, %v1707_v15  ;;  %v1711_v19 = vpop.f32.mrb[3].mxu1  ;;  %v1669_v24 = vpop.f32.mrb[2].mxu0 }
 0x2f6   : > { %v1754_v25 = vpack.c.bf16 %v1666_v21, %v1666_v21  ;;  %v1670_v26 = vpop.f32.mrb[3].mxu0 }
 0x2f7   : > { %v1798_v23 = vsel %vm1793_vm1, %v1756_v18, 0  ;;  %1907 = vrot.lane.b32.xlu1 %v1756_v18, %s9647_s30 }
 0x2f8   : > { %8201 = vmatpush3.bf16.xpose.msra.mxu1 %v1798_v23 }
 0x2f9   : > { %8206 = vmatprep.subr.bf16.mxu1 %v9645_v6 }
 0x2fb   : > { %1904 = vrot.lane.b32.xlu1 %v1754_v25, %s9647_s30 }
 0x2ff   : > { %8203 = vmatmul.mubr.msk.bf16.vlgmr.msra.gmra.mrb[4].mxu1 %vm1793_vm1, %v1754_v25 }
 0x300   : > { %8208 = vmatprep.mubr.msk.bf16.mxu1 %vm9646_vm0, %v9645_v6 }
 0x333   : > { %v1747_v13 = vpop.f32.mrb[4].mxu0 }
 0x334   : > { %v1748_v14 = vadd.f32 %v1747_v13, %v1140_v12  ;;  %v10475_v15 = vpop.f32.mrb[5].mxu0  ;;  %v8572_v13 = vld [vmem:[%s10273_s28 + $0x10] ss:$8 sps:$4 sm:$0xff]  }
 0x335   : > { %v1751_v17 = vpop.f32.mrb[6].mxu0 }
 0x336   : > { %v1758_v18 = vpack.c.bf16 %v1748_v14, %v1748_v14  ;;  %v1752_v19 = vpop.f32.mrb[7].mxu0  ;;  %v8577_v14 = vld [vmem:[%s10273_s28 + $0x24] ss:$8 sps:$4 sm:$0xff]   ;;  %v10514_v17 = vsub.s32 3, %v10404_v8 }
 0x337   : > { %v8580_v19 = vld [vmem:[%s10273_s28 + $0x34] ss:$8 sps:$4 sm:$0xff]  }
 0x338   : > { %v1860_v20 = vsel %vm1858_vm3, %v1758_v18, 0 }
 0x339   : > { %8207 = vmatpush3.bf16.msra.mxu1 %v1860_v20  ;;  %v1136_v20 = vrot.slane %v10410_v10, %v10514_v17 }
 0x33a   : > { %8212 = vmatprep.subr.bf16.mxu1 %v9645_v6 }
 0x369   : > { %v1908_v27 = vpop.permute.xlu1 %1907 }
 0x36a   : > { %v1913_v29 = vsel %vm1793_vm1, %v1908_v27, 0 }
 0x36d   : > { %v1905_v30 = vpop.permute.xlu1 %1904 }
 0x3d2   : > { %v1834_v59 = vpop.f32.mrb[4].mxu1 }
 0x3d3   : > { %v1840_v61 = vmul.f32 0.17149858, %v1834_v59  ;;  %v8204_v62 = vpop.f32.mrb[5].mxu1  ;;  %v8568_v59 = vld [vmem:[%s10273_s28 + $0x74] ss:$8 sps:$4 sm:$0xff]  }
 0x3d4   : > { %v1837_v63 = vpop.f32.mrb[6].mxu1  ;;  %v8571_v62 = vld [vmem:[%s10273_s28 + $0x4] ss:$8 sps:$4 sm:$0xff]  }
 0x3d5   : > { %v8205_v0 = vpop.f32.mrb[7].mxu1  ;;  %v1841_v1 = vadd.f32 %v1840_v61, %v10466_v60  ;;  %v8566_v61 = vld [vmem:[%s10273_s28 + $0x70] ss:$8 sps:$4 sm:$0xff]   ;;  %v9648_v63 = vmov 0  }
 0x3d6   : > { %2369 = vmatprep.mubr.bf16.mxu0 %v9648_v63 }
 0x3d7   : > { %v1843_v2 = vsel %vm1842_vm2, %v1841_v1, -inf }
 0x3d8   : > { %1844 = vmax.xlane.f32.xlu0 %v1843_v2 }
 0x465   : > { %v1845_v3 = vpop.xlane.xlu0 %1844 }
 0x466   : > { %v1846_v4 = vsub.f32 %v1841_v1, %v1845_v3  ;;  %v8569_v1 = vld [vmem:[%s10273_s28] ss:$8 sps:$4 sm:$0xff]  }
 0x468   : > { %v1847_v7 = vmul.f32 1.442695, %v1846_v4  ;;  %v8574_v4 = vld [vmem:[%s10273_s28 + $0x14] ss:$8 sps:$4 sm:$0xff]  }
 0x46a   : > { %8989 = vpow2.f32 %v1847_v7 }
 0x474   : > { %v8990_v21 = vpop.eup %8989 }
 0x475   : > { %v1849_v23 = vsel %vm1842_vm2, %v8990_v21, 0.0 }
 0x476   : > { %1850 = vadd.xlane.f32.xlu0 %v1849_v23  ;;  %v1709_v23 = vadd.f32 %v10419_v16, %v1136_v20 }
 0x478   : > { %v1757_v27 = vpack.c.bf16 %v1709_v23, %v1709_v23 }
 0x503   : > { %v1851_v24 = vpop.xlane.xlu0 %1850 }
 0x504   : > { %8991 = vrcp.f32 %v1851_v24  ;;  %v10523_v24 = vsub.s32 5, %v10404_v8 }
 0x50e   : > { %v8992_v25 = vpop.eup %8991 }
 0x50f   : > { %v1853_v26 = vmul.f32 %v8992_v25, %v8990_v21  ;;  %v8578_v21 = vld [vmem:[%s10273_s28 + $0x30] ss:$8 sps:$4 sm:$0xff]  }
 0x511   : > { %v1854_v28 = vpack.c.bf16 %v1853_v26, %v1853_v26  ;;  %v10529_v26 = vsub.s32 1, %v10404_v8 }
 0x513   : > { %8209 = vmatmul.mubr.msk.bf16.vlgmr.msra.gmra.mrb[8].mxu1 %vm1842_vm2, %v1854_v28  ;;  %v1144_v28 = vrot.slane %v10410_v10, %v10523_v24  ;;  %v1128_v16 = vrot.slane %v10410_v10, %v10529_v26 }
 0x514   : > { %8213 = vmatpush3.bf16.xpose.msra.mxu1 %v1913_v29  ;;  %8214 = vmatprep.mubr.msk.bf16.mxu1 %vm9646_vm0, %v9645_v6  ;;  %v2191_v29 = vsel %vm1793_vm1, %v1757_v27, 0 }
 0x515   : > { %8218 = vmatprep.subr.bf16.mxu1 %v9645_v6 }
 0x51b   : > { %8215 = vmatmul.mubr.msk.bf16.vlgmr.msra.gmra.mrb[12].mxu1 %vm1793_vm1, %v1905_v30  ;;  %v1750_v30 = vadd.f32 %v10475_v15, %v1144_v28 }
 0x51c   : > { %8220 = vmatprep.mubr.msk.bf16.mxu1 %vm9646_vm0, %v9645_v6 }
 0x5e6   : > { %v10488_v31 = vpop.f32.mrb[8].mxu1 }
 0x5e7   : > { %v8210_v32 = vpop.f32.mrb[9].mxu1  ;;  %v1902_v25 = vpack.c.bf16 %v10488_v31, %v10488_v31  ;;  %v1668_v31 = vadd.f32 %v10421_v22, %v1128_v16 }
 0x5e8   : > { %v1899_v33 = vpop.f32.mrb[10].mxu1  ;;  %v10542_v32 = vpack.c.bf16 %v1750_v30, %v1750_v30 }
 0x5e9   : > { %v8211_v34 = vpop.f32.mrb[11].mxu1  ;;  %v1755_v33 = vpack.c.bf16 %v1668_v31, %v1668_v31 }
 0x5ea   : > { %v2251_v34 = vsel %vm1858_vm3, %v10542_v32, 0 }
 0x5ee   : > { %v1949_v35 = vpop.f32.mrb[12].mxu1 }
 0x5ef   : > { %v1955_v36 = vmul.f32 0.17149858, %v1949_v35  ;;  %v8216_v37 = vpop.f32.mrb[13].mxu1 }
 0x5f0   : > { %v1952_v38 = vpop.f32.mrb[14].mxu1 }
 0x5f1   : > { %v8217_v39 = vpop.f32.mrb[15].mxu1  ;;  %v1956_v40 = vadd.f32 %v1955_v36, %v10466_v60 }
 0x5f3   : > { %v1957_v41 = vsel %vm1842_vm2, %v1956_v40, -inf }
 0x5f4   : > { %1958 = vmax.xlane.f32.xlu0 %v1957_v41 }
 0x60a   : > { %1970 = vrot.lane.b32.xlu0 %v1758_v18, %s9647_s30  ;;  %v8575_v18 = vld [vmem:[%s10273_s28 + $0x20] ss:$8 sps:$4 sm:$0xff]  }
 0x681   : > { %v1959_v42 = vpop.xlane.xlu0 %1958 }
 0x682   : > { %v1960_v43 = vsub.f32 %v1956_v40, %v1959_v42 }
 0x684   : > { %v1961_v44 = vmul.f32 1.442695, %v1960_v43 }
 0x685   : > { %v1971_v45 = vpop.permute.xlu0 %1970 }
 0x686   : > { %8993 = vpow2.f32 %v1961_v44  ;;  %v1976_v46 = vsel %vm1858_vm3, %v1971_v45, 0 }
 0x687   : > { %8219 = vmatpush3.bf16.msra.mxu1 %v1976_v46 }
 0x688   : > { %2062 = vmatprep.subr.bf16.mxu1 %v8559_v49 }
 0x690   : > { %v8994_v47 = vpop.eup %8993 }
 0x691   : > { %v1963_v48 = vsel %vm1842_vm2, %v8994_v47, 0.0 }
 0x692   : > { %1964 = vadd.xlane.f32.xlu1 %v1963_v48 }
 0x71f   : > { %v1965_v50 = vpop.xlane.xlu1 %1964 }
 0x720   : > { %8995 = vrcp.f32 %v1965_v50 }
 0x72a   : > { %v8996_v51 = vpop.eup %8995 }
 0x72b   : > { %v1967_v52 = vmul.f32 %v8996_v51, %v8994_v47 }
 0x72d   : > { %v1968_v54 = vpack.c.bf16 %v1967_v52, %v1967_v52 }
 0x72f   : > { %8221 = vmatmul.mubr.msk.bf16.vlgmr.msra.gmra.mrb[16].mxu1 %vm1842_vm2, %v1968_v54  ;;  %v8581_v54 = vld [vmem:[%s10273_s28 + $0x80] ss:$8 sps:$4 sm:$0xff]  }
 0x730   : > { %2063 = vmatpush1.bf16.msra.mxu1 %v8557_v53  ;;  %2094 = vmatprep.mubr.bf16.mxu1 %v9648_v63 }
 0x731   : > { %2064 = vmatprep.subr.bf16.mxu1 %v8562_v55  ;;  %v8583_v55 = vld [vmem:[%s10273_s28 + $0x84] ss:$8 sps:$4 sm:$0xff]  }
 0x732   : > { %2337 = vmatprep.subr.bf16.mxu0 %v8583_v55  ;;  %v2654_v55 = vld [vmem:[%s10290_s17 + $0x40] sm:$0xff] }
 0x733   : > { %2338 = vmatpush1.bf16.msra.mxu0 %v8581_v54  ;;  %v2646_v54 = vld [vmem:[%s10290_s17] sm:$0xff] }
 0x734   : > { %2065 = vmatpush1.bf16.msra.mxu1 %v8560_v56  ;;  %v8586_v56 = vld [vmem:[%s10273_s28 + $0x94] ss:$8 sps:$4 sm:$0xff]  }
 0x735   : > { %2066 = vmatprep.subr.bf16.mxu1 %v8565_v57  ;;  %v8584_v57 = vld [vmem:[%s10273_s28 + $0x90] ss:$8 sps:$4 sm:$0xff]   ;;  %2339 = vmatprep.subr.bf16.mxu0 %v8586_v56 }
 0x736   : > { %v2647_v56 = vld [vmem:[%s10290_s17 + $0x8] sm:$0xff] }
 0x737   : > { %2340 = vmatpush1.bf16.msra.mxu0 %v8584_v57  ;;  %v7593_v57 = vcombine.low %v2646_v54, %v2654_v55 }
 0x738   : > { %2067 = vmatpush1.bf16.msra.mxu1 %v8563_v58  ;;  %v8589_v58 = vld [vmem:[%s10273_s28 + $0xa4] ss:$8 sps:$4 sm:$0xff]  }
 0x739   : > { %2068 = vmatprep.subr.bf16.mxu1 %v8568_v59  ;;  %v8587_v59 = vld [vmem:[%s10273_s28 + $0xa0] ss:$8 sps:$4 sm:$0xff]   ;;  %2341 = vmatprep.subr.bf16.mxu0 %v8589_v58  ;;  %v7594_v58 = vcombine.high %v2646_v54, %v2654_v55  ;;  %v2766_v54 = vld [vmem:[%s10290_s17 + $0x3c0] sm:$0xff]  ;;  %v2759_v55 = vld [vmem:[%s10290_s17 + $0x388] sm:$0xff] }
 0x73b   : > { %2342 = vmatpush1.bf16.msra.mxu0 %v8587_v59  ;;  %v2655_v59 = vld [vmem:[%s10290_s17 + $0x48] sm:$0xff] }
 0x73c   : > { %2069 = vmatpush1.bf16.msra.mxu1 %v8566_v61  ;;  %v8592_v61 = vld [vmem:[%s10273_s28 + $0xb4] ss:$8 sps:$4 sm:$0xff]  }
 0x73d   : > { %2146 = vmatprep.subr.bf16.mxu1 %v8571_v62  ;;  %v8590_v62 = vld [vmem:[%s10273_s28 + $0xb0] ss:$8 sps:$4 sm:$0xff]   ;;  %2343 = vmatprep.subr.bf16.mxu0 %v8592_v61 }
 0x73e   : > { %v2662_v61 = vld [vmem:[%s10290_s17 + $0x80] sm:$0xff] }
 0x73f   : > { %2344 = vmatpush1.bf16.msra.mxu0 %v8590_v62  ;;  %v2670_v62 = vld [vmem:[%s10290_s17 + $0xc0] sm:$0xff] }
 0x802   : > { %v2012_v0 = vpop.f32.mrb[16].mxu1 }
 0x803   : > { %v2018_v2 = vpack.c.bf16 %v2012_v0, %v2012_v0  ;;  %v8222_v3 = vpop.f32.mrb[17].mxu1 }
 0x804   : > { %v2015_v7 = vpop.f32.mrb[18].mxu1 }
 0x805   : > { %v8223_v12 = vpop.f32.mrb[19].mxu1  ;;  %7561 = vmatmul.mubr.msk.bf16.vlgmr.msra.gmra.mrb[20].mxu1 %vm1793_vm1, %v2018_v2 }
 0x806   : > { %2147 = vmatpush1.bf16.msra.mxu1 %v8569_v1  ;;  %2178 = vmatprep.mubr.bf16.mxu1 %v9648_v63 }
 0x807   : > { %2148 = vmatprep.subr.bf16.mxu1 %v8574_v4 }
 0x80a   : > { %2149 = vmatpush1.bf16.msra.mxu1 %v8572_v13 }
 0x80b   : > { %2150 = vmatprep.subr.bf16.mxu1 %v8577_v14 }
 0x80e   : > { %2151 = vmatpush1.bf16.msra.mxu1 %v8575_v18 }
 0x80f   : > { %2152 = vmatprep.subr.bf16.mxu1 %v8580_v19 }
 0x812   : > { %2153 = vmatpush1.bf16.msra.mxu1 %v8578_v21 }
 0x813   : > { %8224 = vmatprep.subr.bf16.mxu1 %v9645_v6 }
 0x815   : > { %7570 = vmatmul.mubr.msk.bf16.vlgmr.msra.gmra.mrb[24].mxu1 %vm1793_vm1, %v1902_v25 }
 0x816   : > { %8226 = vmatprep.mubr.msk.bf16.mxu1 %vm9646_vm0, %v9645_v6 }
 0x81b   : > { %8225 = vmatpush3.bf16.xpose.msra.mxu1 %v2191_v29 }
 0x81c   : > { %8230 = vmatprep.subr.bf16.mxu1 %v9645_v6 }
 0x822   : > { %8227 = vmatmul.mubr.msk.bf16.vlgmr.msra.gmra.mrb[28].mxu1 %vm1793_vm1, %v1755_v33 }
 0x823   : > { %8231 = vmatpush3.bf16.msra.mxu1 %v2251_v34  ;;  %8232 = vmatprep.mubr.msk.bf16.mxu1 %vm9646_vm0, %v9645_v6 }
 0x824   : > { %8236 = vmatprep.subr.bf16.mxu1 %v9645_v6 }
 0x8d8   : > { %v2096_v10 = vpop.f32.mrb[20].mxu1 }
 0x8d9   : > { %v2098_v15 = vpop.f32.mrb[21].mxu1 }
 0x8da   : > { %v2100_v35 = vpop.f32.mrb[22].mxu1 }
 0x8db   : > { %v2101_v22 = vpop.f32.mrb[23].mxu1  ;;  %v8596_v35 = vld [vmem:[%s10273_s28 + $0xd0] ss:$8 sps:$4 sm:$0xff]  }
 0x8dc   : > { %v8601_v22 = vld [vmem:[%s10273_s28 + $0xe4] ss:$8 sps:$4 sm:$0xff]  }
 0x8e8   : > { %v2180_v36 = vpop.f32.mrb[24].mxu1 }
 0x8e9   : > { %v10550_v37 = vadd.f32 %v2180_v36, %v2096_v10  ;;  %v2182_v38 = vpop.f32.mrb[25].mxu1  ;;  %v8593_v10 = vld [vmem:[%s10273_s28 + $0xc0] ss:$8 sps:$4 sm:$0xff]  }
 0x8ea   : > { %v10552_v39 = vadd.f32 %v2182_v38, %v2098_v15  ;;  %v2184_v40 = vpop.f32.mrb[26].mxu1  ;;  %v8595_v15 = vld [vmem:[%s10273_s28 + $0xc4] ss:$8 sps:$4 sm:$0xff]   ;;  %v8599_v36 = vld [vmem:[%s10273_s28 + $0xe0] ss:$8 sps:$4 sm:$0xff]  }
 0x8eb   : > { %v2185_v41 = vpop.f32.mrb[27].mxu1  ;;  %2539 = vmatprep.subr.bf16.mxu0 %v8595_v15  ;;  %v8604_v38 = vld [vmem:[%s10273_s28 + $0xf4] ss:$8 sps:$4 sm:$0xff]   ;;  %v8602_v40 = vld [vmem:[%s10273_s28 + $0xf0] ss:$8 sps:$4 sm:$0xff]  }
 0x8f5   : > { %v2227_v42 = vpop.f32.mrb[28].mxu1 }
 0x8f6   : > { %v2233_v43 = vmul.f32 0.17149858, %v2227_v42  ;;  %v8228_v44 = vpop.f32.mrb[29].mxu1 }
 0x8f7   : > { %v2230_v45 = vpop.f32.mrb[30].mxu1 }
 0x8f8   : > { %v8229_v46 = vpop.f32.mrb[31].mxu1  ;;  %v2234_v47 = vadd.f32 %v2233_v43, %v10466_v60 }
 0x8fa   : > { %v2235_v48 = vsel %vm1842_vm2, %v2234_v47, -inf }
 0x8fb   : > { %2236 = vmax.xlane.f32.xlu0 %v2235_v48 }
 0x911   : > { %2381 = vrot.lane.b32.xlu0 %v1755_v33, %s9647_s30 }
 0x988   : > { %v2237_v49 = vpop.xlane.xlu0 %2236 }
 0x989   : > { %v2238_v50 = vsub.f32 %v2234_v47, %v2237_v49 }
 0x98b   : > { %v2239_v51 = vmul.f32 1.442695, %v2238_v50 }
 0x98c   : > { %v2382_v12 = vpop.permute.xlu0 %2381 }
 0x98d   : > { %8997 = vpow2.f32 %v2239_v51 }
 0x997   : > { %v8998_v52 = vpop.eup %8997 }
 0x998   : > { %v2241_v53 = vsel %vm1842_vm2, %v8998_v52, 0.0 }
 0x999   : > { %2242 = vadd.xlane.f32.xlu1 %v2241_v53 }
 0x9aa   : > { %2384 = vrot.lane.b32.xlu1 %v1757_v27, %s9647_s30 }
 0xa26   : > { %v2243_v0 = vpop.xlane.xlu1 %2242 }
 0xa27   : > { %8999 = vrcp.f32 %v2243_v0  ;;  %v7595_v0 = vcombine.low %v2647_v56, %v2655_v59 }
 0xa2a   : > { %v2385_v3 = vpop.permute.xlu1 %2384 }
 0xa2b   : > { %v2390_v7 = vsel %vm1793_vm1, %v2385_v3, 0  ;;  %v2663_v3 = vld [vmem:[%s10290_s17 + $0x88] sm:$0xff] }
 0xa31   : > { %v9000_v1 = vpop.eup %8999 }
 0xa32   : > { %v2245_v2 = vmul.f32 %v9000_v1, %v8998_v52  ;;  %v7596_v1 = vcombine.high %v2647_v56, %v2655_v59  ;;  %v2767_v56 = vld [vmem:[%s10290_s17 + $0x3c8] sm:$0xff] }
 0xa34   : > { %v2246_v4 = vpack.c.bf16 %v2245_v2, %v2245_v2  ;;  %v7610_v2 = vcombine.high %v2662_v61, %v2670_v62 }
 0xa36   : > { %8233 = vmatmul.mubr.msk.bf16.vlgmr.msra.gmra.mrb[32].mxu1 %vm1842_vm2, %v2246_v4  ;;  %v2671_v4 = vld [vmem:[%s10290_s17 + $0xc8] sm:$0xff] }
 0xa37   : > { %8237 = vmatpush3.bf16.xpose.msra.mxu1 %v2390_v7  ;;  %8238 = vmatprep.mubr.msk.bf16.mxu1 %vm9646_vm0, %v9645_v6  ;;  %v2678_v7 = vld [vmem:[%s10290_s17 + $0x100] sm:$0xff] }
 0xa38   : > { %8242 = vmatprep.subr.bf16.mxu1 %v9645_v6 }
 0xa3e   : > { %8239 = vmatmul.mubr.msk.bf16.vlgmr.msra.gmra.mrb[36].mxu1 %vm1793_vm1, %v2382_v12  ;;  %v7612_v12 = vcombine.high %v2663_v3, %v2671_v4 }
 0xa3f   : > { %8244 = vmatprep.mubr.msk.bf16.mxu1 %vm9646_vm0, %v9645_v6 }
 0xb09   : > { %v2287_v13 = vpop.f32.mrb[32].mxu1 }
 0xb0a   : > { %v2293_v14 = vpack.c.bf16 %v2287_v13, %v2287_v13  ;;  %v8234_v18 = vpop.f32.mrb[33].mxu1  ;;  %v2686_v13 = vld [vmem:[%s10290_s17 + $0x140] sm:$0xff] }
 0xb0b   : > { %v2290_v19 = vpop.f32.mrb[34].mxu1  ;;  %v2687_v18 = vld [vmem:[%s10290_s17 + $0x148] sm:$0xff] }
 0xb0c   : > { %v8235_v20 = vpop.f32.mrb[35].mxu1  ;;  %7581 = vmatmul.mubr.msk.bf16.vlgmr.msra.gmra.mrb[8].mxu0 %vm1793_vm1, %v2293_v14  ;;  %v2679_v14 = vld [vmem:[%s10290_s17 + $0x108] sm:$0xff]  ;;  %v7609_v19 = vcombine.low %v2662_v61, %v2670_v62  ;;  %v7708_v61 = vcombine.high %v2759_v55, %v2767_v56  ;;  %v2774_v62 = vld [vmem:[%s10290_s17 + $0x400] sm:$0xff] }
 0xb0d   : > { %2571 = vmatprep.mubr.bf16.mxu0 %v9648_v63  ;;  %2540 = vmatpush1.bf16.msra.mxu0 %v8593_v10  ;;  %v7611_v20 = vcombine.low %v2663_v3, %v2671_v4  ;;  %v7707_v4 = vcombine.low %v2759_v55, %v2767_v56 }
 0xb11   : > { %v2426_v21 = vpop.f32.mrb[36].mxu1 }
 0xb12   : > { %v2432_v23 = vmul.f32 0.17149858, %v2426_v21  ;;  %v8240_v25 = vpop.f32.mrb[37].mxu1  ;;  %v7626_v21 = vcombine.high %v2678_v7, %v2686_v13 }
 0xb13   : > { %v2429_v27 = vpop.f32.mrb[38].mxu1  ;;  %v2694_v25 = vld [vmem:[%s10290_s17 + $0x180] sm:$0xff] }
 0xb14   : > { %v8241_v28 = vpop.f32.mrb[39].mxu1  ;;  %v2433_v16 = vadd.f32 %v2432_v23, %v10466_v60  ;;  %v7628_v23 = vcombine.high %v2679_v14, %v2687_v18  ;;  %v2702_v27 = vld [vmem:[%s10290_s17 + $0x1c0] sm:$0xff] }
 0xb15   : > { %v2695_v28 = vld [vmem:[%s10290_s17 + $0x188] sm:$0xff]  ;;  %v7641_v10 = vcombine.low %v2694_v25, %v2702_v27 }
 0xb16   : > { %v2434_v6 = vsel %vm1842_vm2, %v2433_v16, -inf }
 0xb17   : > { %2435 = vmax.xlane.f32.xlu1 %v2434_v6  ;;  %v7625_v6 = vcombine.low %v2678_v7, %v2686_v13  ;;  %v2790_v13 = vld [vmem:[%s10290_s17 + $0x480] sm:$0xff] }
 0xb28   : > { %2447 = vrot.lane.b32.xlu1 %v10542_v32, %s9647_s30  ;;  %v8598_v32 = vld [vmem:[%s10273_s28 + $0xd4] ss:$8 sps:$4 sm:$0xff]   ;;  %s11397_s28 = scalar_lea.vmem [#allocation10], %s10271_s14 }
 0xb29   : > { %2541 = vmatprep.subr.bf16.mxu0 %v8598_v32 }
 0xb2a   : > { %2542 = vmatpush1.bf16.msra.mxu0 %v8596_v35 }
 0xb2b   : > { %2543 = vmatprep.subr.bf16.mxu0 %v8601_v22  ;;  %v2726_v22 = vld [vmem:[%s10290_s17 + $0x280] sm:$0xff] }
 0xb2e   : > { %2544 = vmatpush1.bf16.msra.mxu0 %v8599_v36  ;;  %v2734_v36 = vld [vmem:[%s10290_s17 + $0x2c0] sm:$0xff] }
 0xb2f   : > { %2545 = vmatprep.subr.bf16.mxu0 %v8604_v38  ;;  %v2727_v38 = vld [vmem:[%s10290_s17 + $0x288] sm:$0xff] }
 0xb32   : > { %2546 = vmatpush1.bf16.msra.mxu0 %v8602_v40  ;;  %v2735_v40 = vld [vmem:[%s10290_s17 + $0x2c8] sm:$0xff] }
 0xb33   : > { %4307 = vmatprep.subr.bf16.mxu0 %v7596_v1  ;;  %v2775_v1 = vld [vmem:[%s10290_s17 + $0x408] sm:$0xff] }
 0xba4   : > { %v2436_v29 = vpop.xlane.xlu1 %2435 }
 0xba5   : > { %v2437_v30 = vsub.f32 %v2433_v16, %v2436_v29  ;;  %v2703_v16 = vld [vmem:[%s10290_s17 + $0x1c8] sm:$0xff]  ;;  %v7627_v29 = vcombine.low %v2679_v14, %v2687_v18  ;;  %v2798_v14 = vld [vmem:[%s10290_s17 + $0x4c0] sm:$0xff] }
 0xba6   : > { %v7643_v15 = vcombine.low %v2695_v28, %v2703_v16  ;;  %v2791_v18 = vld [vmem:[%s10290_s17 + $0x488] sm:$0xff] }
 0xba7   : > { %v2438_v63 = vmul.f32 1.442695, %v2437_v30  ;;  %v7642_v30 = vcombine.high %v2694_v25, %v2702_v27  ;;  %v7737_v27 = vcombine.low %v2790_v13, %v2798_v14 }
 0xba8   : > { %v2448_v31 = vpop.permute.xlu1 %2447 }
 0xba9   : > { %9001 = vpow2.f32 %v2438_v63  ;;  %v2453_v33 = vsel %vm1858_vm3, %v2448_v31, 0  ;;  %v7644_v63 = vcombine.high %v2695_v28, %v2703_v16  ;;  %v2710_v31 = vld [vmem:[%s10290_s17 + $0x200] sm:$0xff]  ;;  %v2582_v16 = vld [vmem:[%s11396_s5] sm:$0x3] }
 0xbaa   : > { %8243 = vmatpush3.bf16.msra.mxu1 %v2453_v33  ;;  %v2718_v33 = vld [vmem:[%s10290_s17 + $0x240] sm:$0xff] }
 0xbab   : > { %4266 = vmatprep.subr.bf16.mxu1 %v7594_v58  ;;  %v7658_v32 = vcombine.high %v2710_v31, %v2718_v33 }
 0xbb3   : > { %v9002_v60 = vpop.eup %9001 }
 0xbb4   : > { %v2440_v34 = vsel %vm1842_vm2, %v9002_v60, 0.0 }
 0xbb5   : > { %2441 = vadd.xlane.f32.xlu0 %v2440_v34  ;;  %v2719_v34 = vld [vmem:[%s10290_s17 + $0x248] sm:$0xff] }
 0xbdf   : > { %v2371_v41 = vpop.f32.mrb[8].mxu0 }
 0xbe0   : > { %v10592_v42 = vadd.f32 %v2371_v41, %v10550_v37  ;;  %v2373_v43 = vpop.f32.mrb[9].mxu0  ;;  %v7657_v41 = vcombine.low %v2710_v31, %v2718_v33 }
 0xbe1   : > { %v10595_v44 = vadd.f32 %v2373_v43, %v10552_v39  ;;  %v2375_v45 = vpop.f32.mrb[10].mxu0 }
 0xbe2   : > { %v2376_v46 = vpop.f32.mrb[11].mxu0  ;;  %v7674_v45 = vcombine.high %v2726_v22, %v2734_v36 }
 0xbe3   : > { %v7676_v46 = vcombine.high %v2727_v38, %v2735_v40 }
 0xc42   : > { %v2442_v47 = vpop.xlane.xlu0 %2441 }
 0xc43   : > { %9003 = vrcp.f32 %v2442_v47  ;;  %v2742_v47 = vld [vmem:[%s10290_s17 + $0x300] sm:$0xff] }
 0xc4d   : > { %v9004_v48 = vpop.eup %9003 }
 0xc4e   : > { %v2444_v49 = vmul.f32 %v9004_v48, %v9002_v60  ;;  %v2711_v60 = vld [vmem:[%s10290_s17 + $0x208] sm:$0xff]  ;;  %v2750_v48 = vld [vmem:[%s10290_s17 + $0x340] sm:$0xff] }
 0xc4f   : > { %v7660_v35 = vcombine.high %v2711_v60, %v2719_v34  ;;  %v7659_v43 = vcombine.low %v2711_v60, %v2719_v34 }
 0xc50   : > { %v2445_v50 = vpack.c.bf16 %v2444_v49, %v2444_v49  ;;  %v2743_v49 = vld [vmem:[%s10290_s17 + $0x308] sm:$0xff] }
 0xc52   : > { %8245 = vmatmul.mubr.msk.bf16.vlgmr.msra.gmra.mrb[40].mxu1 %vm1842_vm2, %v2445_v50  ;;  %v2751_v50 = vld [vmem:[%s10290_s17 + $0x348] sm:$0xff] }
 0xc53   : > { %4267 = vmatpush1.bf16.msra.mxu1 %v7593_v57  ;;  %v7689_v57 = vcombine.low %v2742_v47, %v2750_v48  ;;  %v7691_v58 = vcombine.low %v2743_v49, %v2751_v50 }
 0xc54   : > { %4268 = vmatprep.subr.bf16.mxu1 %v7610_v2  ;;  %v2783_v2 = vld [vmem:[%s10290_s17 + $0x448] sm:$0xff] }
 0xc57   : > { %4269 = vmatpush1.bf16.msra.mxu1 %v7609_v19  ;;  %v2799_v19 = vld [vmem:[%s10290_s17 + $0x4c8] sm:$0xff] }
 0xc58   : > { %4270 = vmatprep.subr.bf16.mxu1 %v7626_v21  ;;  %v7723_v21 = vcombine.low %v2775_v1, %v2783_v2  ;;  %v7740_v25 = vcombine.high %v2791_v18, %v2799_v19  ;;  %v7739_v28 = vcombine.low %v2791_v18, %v2799_v19 }
 0xc5b   : > { %4271 = vmatpush1.bf16.msra.mxu1 %v7625_v6  ;;  %v2587_v6 = vrot.slane %v2582_v16, %v10413_v11 }
 0xc5c   : > { %4272 = vmatprep.subr.bf16.mxu1 %v7642_v30  ;;  %v2591_v30 = vrot.slane %v2582_v16, %v10529_v26 }
 0xc5f   : > { %4273 = vmatpush1.bf16.msra.mxu1 %v7641_v10 }
 0xc60   : > { %4274 = vmatprep.subr.bf16.mxu1 %v7658_v32  ;;  %v9009_v32 = vld [vmem:[#allocation2] sm:$0xff] }
 0xc63   : > { %4275 = vmatpush1.bf16.msra.mxu1 %v7657_v41  ;;  %v2806_v41 = vld [vmem:[%s10290_s17 + $0x500] sm:$0xff] }
 0xc64   : > { %4276 = vmatprep.subr.bf16.mxu1 %v7674_v45  ;;  %v2807_v45 = vld [vmem:[%s10290_s17 + $0x508] sm:$0xff] }
 0xd25   : > { %v2489_v37 = vpop.f32.mrb[40].mxu1 }
 0xd26   : > { %v2495_v51 = vpack.c.bf16 %v2489_v37, %v2489_v37  ;;  %v8246_v39 = vpop.f32.mrb[41].mxu1  ;;  %v7673_v37 = vcombine.low %v2726_v22, %v2734_v36  ;;  %v9010_v22 = vld [vmem:[#allocation2 + $0x8] sm:$0xff] }
 0xd27   : > { %v2492_v52 = vpop.f32.mrb[42].mxu1  ;;  %v7690_v39 = vcombine.high %v2742_v47, %v2750_v48  ;;  %v2815_v47 = vld [vmem:[%s10290_s17 + $0x548] sm:$0xff] }
 0xd28   : > { %v8247_v53 = vpop.f32.mrb[43].mxu1  ;;  %7592 = vmatmul.mubr.msk.bf16.vlgmr.msra.gmra.mrb[12].mxu0 %vm1793_vm1, %v2495_v51  ;;  %v7675_v51 = vcombine.low %v2727_v38, %v2735_v40  ;;  %v7692_v52 = vcombine.high %v2743_v49, %v2751_v50  ;;  %4277 = vmatpush1.bf16.msra.mxu1 %v7673_v37  ;;  %v7755_v49 = vcombine.low %v2807_v45, %v2815_v47  ;;  %v2822_v37 = vld [vmem:[%s10290_s17 + $0x580] sm:$0xff] }
 0xd29   : > { %4308 = vmatpush1.bf16.msra.mxu0 %v7595_v0  ;;  %v2758_v53 = vld [vmem:[%s10290_s17 + $0x380] sm:$0xff]  ;;  %4278 = vmatprep.subr.bf16.mxu1 %v7690_v39  ;;  %v7756_v50 = vcombine.high %v2807_v45, %v2815_v47  ;;  %v2823_v39 = vld [vmem:[%s10290_s17 + $0x588] sm:$0xff] }
 0xd2a   : > { %4309 = vmatprep.subr.bf16.mxu0 %v7612_v12  ;;  %v7706_v59 = vcombine.high %v2758_v53, %v2766_v54  ;;  %v2782_v0 = vld [vmem:[%s10290_s17 + $0x440] sm:$0xff]  ;;  %v7705_v3 = vcombine.low %v2758_v53, %v2766_v54  ;;  %v7724_v12 = vcombine.high %v2775_v1, %v2783_v2  ;;  %v2831_v53 = vld [vmem:[%s10290_s17 + $0x5c8] sm:$0xff] }
 0xd2b   : > { %v7722_v7 = vcombine.high %v2774_v62, %v2782_v0  ;;  %v7771_v55 = vcombine.low %v2823_v39, %v2831_v53  ;;  %v7772_v56 = vcombine.high %v2823_v39, %v2831_v53 }
 0xd2c   : > { %4279 = vmatpush1.bf16.msra.mxu1 %v7689_v57  ;;  %v2838_v57 = vld [vmem:[%s10290_s17 + $0x600] sm:$0xff] }
 0xd2d   : > { %4310 = vmatpush1.bf16.msra.mxu0 %v7611_v20  ;;  %4280 = vmatprep.subr.bf16.mxu1 %v7706_v59  ;;  %v7721_v20 = vcombine.low %v2774_v62, %v2782_v0  ;;  %v2839_v59 = vld [vmem:[%s10290_s17 + $0x608] sm:$0xff] }
 0xd2e   : > { %4311 = vmatprep.subr.bf16.mxu0 %v7628_v23  ;;  %v7738_v23 = vcombine.high %v2790_v13, %v2798_v14  ;;  %v2847_v62 = vld [vmem:[%s10290_s17 + $0x648] sm:$0xff] }
 0xd2f   : > { %v7787_v1 = vcombine.low %v2839_v59, %v2847_v62  ;;  %v7788_v2 = vcombine.high %v2839_v59, %v2847_v62  ;;  %v2863_v13 = vld [vmem:[%s10290_s17 + $0x6c8] sm:$0xff] }
 0xd30   : > { %4281 = vmatpush1.bf16.msra.mxu1 %v7705_v3  ;;  %v2854_v3 = vld [vmem:[%s10290_s17 + $0x680] sm:$0xff] }
 0xd31   : > { %4312 = vmatpush1.bf16.msra.mxu0 %v7627_v29  ;;  %4282 = vmatprep.subr.bf16.mxu1 %v7722_v7  ;;  %v2855_v7 = vld [vmem:[%s10290_s17 + $0x688] sm:$0xff] }
 0xd32   : > { %4313 = vmatprep.subr.bf16.mxu0 %v7644_v63  ;;  %v7803_v18 = vcombine.low %v2855_v7, %v2863_v13  ;;  %v7804_v19 = vcombine.high %v2855_v7, %v2863_v13 }
 0xd34   : > { %4283 = vmatpush1.bf16.msra.mxu1 %v7721_v20  ;;  %v2870_v20 = vld [vmem:[%s10290_s17 + $0x700] sm:$0xff] }
 0xd35   : > { %4314 = vmatpush1.bf16.msra.mxu0 %v7643_v15  ;;  %4284 = vmatprep.subr.bf16.mxu1 %v7738_v23  ;;  %v2871_v23 = vld [vmem:[%s10290_s17 + $0x708] sm:$0xff] }
 0xd36   : > { %4315 = vmatprep.subr.bf16.mxu0 %v7660_v35 }
 0xd38   : > { %4285 = vmatpush1.bf16.msra.mxu1 %v7737_v27  ;;  %v2879_v27 = vld [vmem:[%s10290_s17 + $0x748] sm:$0xff] }
 0xd39   : > { %4316 = vmatpush1.bf16.msra.mxu0 %v7659_v43  ;;  %v2814_v43 = vld [vmem:[%s10290_s17 + $0x540] sm:$0xff]  ;;  %v7819_v16 = vcombine.low %v2871_v23, %v2879_v27 }
 0xd3a   : > { %4317 = vmatprep.subr.bf16.mxu0 %v7676_v46  ;;  %v7754_v46 = vcombine.high %v2806_v41, %v2814_v43  ;;  %v7753_v48 = vcombine.low %v2806_v41, %v2814_v43 }
 0xd3c   : > { %4286 = vmatprep.subr.bf16.mxu1 %v7754_v46 }
 0xd3d   : > { %4318 = vmatpush1.bf16.msra.mxu0 %v7675_v51  ;;  %v2830_v51 = vld [vmem:[%s10290_s17 + $0x5c0] sm:$0xff]  ;;  %4287 = vmatpush1.bf16.msra.mxu1 %v7753_v48 }
 0xd3e   : > { %4319 = vmatprep.subr.bf16.mxu0 %v7692_v52  ;;  %v7770_v52 = vcombine.high %v2822_v37, %v2830_v51  ;;  %v7769_v54 = vcombine.low %v2822_v37, %v2830_v51  ;;  %v2598_v37 = vld [vmem:[%s11397_s28] sm:$0x3]  ;;  %v2599_v51 = vld [vmem:[%s11398_s3] sm:$0x3] }
 0xd3f   : > { %v2622_v53 = vrot.slane %v2598_v37, %v10413_v11 }
 0xd40   : > { %4288 = vmatprep.subr.bf16.mxu1 %v7770_v52 }
 0xd41   : > { %4320 = vmatpush1.bf16.msra.mxu0 %v7691_v58  ;;  %v2846_v58 = vld [vmem:[%s10290_s17 + $0x640] sm:$0xff]  ;;  %4289 = vmatpush1.bf16.msra.mxu1 %v7769_v54  ;;  %v2626_v54 = vrot.slane %v2598_v37, %v10529_v26  ;;  %v2745_v37 = vld [vmem:[%s10290_s17 + $0x318] sm:$0xff] }
 0xd42   : > { %4321 = vmatprep.subr.bf16.mxu0 %v7708_v61  ;;  %v7786_v61 = vcombine.high %v2838_v57, %v2846_v58  ;;  %v7785_v0 = vcombine.low %v2838_v57, %v2846_v58  ;;  %v2639_v57 = vrot.slane %v2599_v51, %v10529_v26 }
 0xd44   : > { %4290 = vmatprep.subr.bf16.mxu1 %v7786_v61 }
 0xd45   : > { %4322 = vmatpush1.bf16.msra.mxu0 %v7707_v4  ;;  %v2862_v4 = vld [vmem:[%s10290_s17 + $0x6c0] sm:$0xff]  ;;  %4291 = vmatpush1.bf16.msra.mxu1 %v7785_v0  ;;  %v2664_v0 = vld [vmem:[%s10290_s17 + $0x90] sm:$0xff] }
 0xd46   : > { %4323 = vmatprep.subr.bf16.mxu0 %v7724_v12  ;;  %v7802_v12 = vcombine.high %v2854_v3, %v2862_v4  ;;  %v7801_v14 = vcombine.low %v2854_v3, %v2862_v4  ;;  %v2673_v3 = vld [vmem:[%s10290_s17 + $0xd8] sm:$0xff] }
 0xd48   : > { %4292 = vmatprep.subr.bf16.mxu1 %v7802_v12  ;;  %v2680_v12 = vld [vmem:[%s10290_s17 + $0x110] sm:$0xff] }
 0xd49   : > { %4324 = vmatpush1.bf16.msra.mxu0 %v7723_v21  ;;  %v2878_v21 = vld [vmem:[%s10290_s17 + $0x740] sm:$0xff]  ;;  %4293 = vmatpush1.bf16.msra.mxu1 %v7801_v14 }
 0xd4a   : > { %4325 = vmatprep.subr.bf16.mxu0 %v7740_v25  ;;  %v7818_v25 = vcombine.high %v2870_v20, %v2878_v21 }
 0xd4c   : > { %4294 = vmatprep.subr.bf16.mxu1 %v7818_v25 }
 0xd4d   : > { %4326 = vmatpush1.bf16.msra.mxu0 %v7739_v28  ;;  %v7817_v28 = vcombine.low %v2870_v20, %v2878_v21  ;;  %v2689_v20 = vld [vmem:[%s10290_s17 + $0x158] sm:$0xff] }
 0xd4e   : > { %4327 = vmatprep.subr.bf16.mxu0 %v7756_v50 }
 0xd4f   : > { %4295 = vmatpush1.bf16.msra.mxu1 %v7817_v28  ;;  %v2696_v28 = vld [vmem:[%s10290_s17 + $0x190] sm:$0xff] }
 0xd51   : > { %4328 = vmatpush1.bf16.msra.mxu0 %v7755_v49 }
 0xd52   : > { %4329 = vmatprep.subr.bf16.mxu0 %v7772_v56  ;;  %v2635_v56 = vrot.slane %v2599_v51, %v10413_v11  ;;  %v2753_v51 = vld [vmem:[%s10290_s17 + $0x358] sm:$0xff] }
 0xd55   : > { %4330 = vmatpush1.bf16.msra.mxu0 %v7771_v55 }
 0xd56   : > { %4331 = vmatprep.subr.bf16.mxu0 %v7788_v2  ;;  %v2665_v2 = vld [vmem:[%s10290_s17 + $0x98] sm:$0xff] }
 0xd57   : > { %v7616_v14 = vcombine.high %v2665_v2, %v2673_v3 }
 0xd59   : > { %4332 = vmatpush1.bf16.msra.mxu0 %v7787_v1  ;;  %v2672_v1 = vld [vmem:[%s10290_s17 + $0xd0] sm:$0xff] }
 0xd5a   : > { %4333 = vmatprep.subr.bf16.mxu0 %v7804_v19  ;;  %v7614_v13 = vcombine.high %v2664_v0, %v2672_v1  ;;  %v2681_v19 = vld [vmem:[%s10290_s17 + $0x118] sm:$0xff]  ;;  %v7613_v21 = vcombine.low %v2664_v0, %v2672_v1  ;;  %v2776_v1 = vld [vmem:[%s10290_s17 + $0x410] sm:$0xff] }
 0xd5d   : > { %4334 = vmatpush1.bf16.msra.mxu0 %v7803_v18  ;;  %v2688_v18 = vld [vmem:[%s10290_s17 + $0x150] sm:$0xff] }
 0xd5e   : > { %v7630_v25 = vcombine.high %v2680_v12, %v2688_v18 }
 0xdfb   : > { %v2573_v29 = vpop.f32.mrb[12].mxu0 }
 0xdfc   : > { %v2580_v63 = vadd.f32 %v2573_v29, %v10592_v42  ;;  %v2575_v31 = vpop.f32.mrb[13].mxu0  ;;  %v2886_v29 = vld [vmem:[%s10290_s17 + $0x780] sm:$0xff] }
 0xdfd   : > { %v2581_v33 = vadd.f32 %v2575_v31, %v10595_v44  ;;  %v2577_v60 = vpop.f32.mrb[14].mxu0 }
 0xdfe   : > { %v2594_v34 = vadd.f32 %v2587_v6, %v2580_v63  ;;  %v2578_v10 = vpop.f32.mrb[15].mxu0  ;;  %v7820_v6 = vcombine.high %v2871_v23, %v2879_v27  ;;  %v2887_v63 = vld [vmem:[%s10290_s17 + $0x788] sm:$0xff]  ;;  %v7615_v23 = vcombine.low %v2665_v2, %v2673_v3  ;;  %v7632_v27 = vcombine.high %v2681_v19, %v2689_v20  ;;  %v2784_v2 = vld [vmem:[%s10290_s17 + $0x450] sm:$0xff]  ;;  %v2777_v3 = vld [vmem:[%s10290_s17 + $0x418] sm:$0xff] }
 0xdff   : > { %v2595_v15 = vadd.f32 %v2591_v30, %v2581_v33  ;;  %v2894_v30 = vld [vmem:[%s10290_s17 + $0x7c0] sm:$0xff]  ;;  %v2895_v33 = vld [vmem:[%s10290_s17 + $0x7c8] sm:$0xff] }
 0xe00   : > { %v10645_v35 = vadd.f32 %v9009_v32, %v2594_v34  ;;  %4335 = vmatprep.subr.bf16.mxu0 %v7820_v6  ;;  %v7834_v31 = vcombine.high %v2886_v29, %v2894_v30  ;;  %v7833_v60 = vcombine.low %v2886_v29, %v2894_v30  ;;  %v7835_v34 = vcombine.low %v2887_v63, %v2895_v33  ;;  %v2656_v32 = vld [vmem:[%s10290_s17 + $0x50] sm:$0xff]  ;;  %v2697_v6 = vld [vmem:[%s10290_s17 + $0x198] sm:$0xff] }
 0xe01   : > { %v10647_v36 = vadd.f32 %v9010_v22, %v2595_v15  ;;  %4336 = vmatpush1.bf16.msra.mxu0 %v7819_v16  ;;  %v7836_v10 = vcombine.high %v2887_v63, %v2895_v33  ;;  %v2648_v15 = vld [vmem:[%s10290_s17 + $0x10] sm:$0xff]  ;;  %v2649_v22 = vld [vmem:[%s10290_s17 + $0x18] sm:$0xff]  ;;  %v7629_v30 = vcombine.low %v2680_v12, %v2688_v18  ;;  %v7631_v63 = vcombine.low %v2681_v19, %v2689_v20 }
 0xe02   : > { %v2604_v42 = vmul.f32 %v10645_v35, %v10645_v35  ;;  %4296 = vmatprep.subr.bf16.mxu1 %v7834_v31  ;;  %v2704_v16 = vld [vmem:[%s10290_s17 + $0x1d0] sm:$0xff]  ;;  %v2705_v29 = vld [vmem:[%s10290_s17 + $0x1d8] sm:$0xff]  ;;  %v7726_v18 = vcombine.high %v2776_v1, %v2784_v2 }
 0xe03   : > { %v2600_v44 = vadd.f32 %v10647_v36, %v10645_v35  ;;  %v2605_v38 = vmul.f32 %v10647_v36, %v10647_v36  ;;  %4337 = vmatprep.subr.bf16.mxu0 %v7836_v10  ;;  %4297 = vmatpush1.bf16.msra.mxu1 %v7833_v60  ;;  %v7646_v31 = vcombine.high %v2696_v28, %v2704_v16  ;;  %v2712_v60 = vld [vmem:[%s10290_s17 + $0x210] sm:$0xff]  ;;  %v2713_v10 = vld [vmem:[%s10290_s17 + $0x218] sm:$0xff] }
 0xe04   : > { %v7648_v33 = vcombine.high %v2697_v6, %v2705_v29  ;;  %v2785_v12 = vld [vmem:[%s10290_s17 + $0x458] sm:$0xff]  ;;  %v2792_v20 = vld [vmem:[%s10290_s17 + $0x490] sm:$0xff] }
 0xe05   : > { %2601 = vadd.xlane.f32.xlu0 %v2600_v44  ;;  %v2606_v40 = vadd.f32 %v2605_v38, %v2604_v42  ;;  %v7598_v42 = vcombine.high %v2648_v15, %v2656_v32  ;;  %v2657_v44 = vld [vmem:[%s10290_s17 + $0x58] sm:$0xff]  ;;  %4338 = vmatpush1.bf16.msra.mxu0 %v7835_v34  ;;  %v7597_v38 = vcombine.low %v2648_v15, %v2656_v32  ;;  %v2720_v34 = vld [vmem:[%s10290_s17 + $0x250] sm:$0xff] }
 0xe06   : > { %v7600_v41 = vcombine.high %v2649_v22, %v2657_v44  ;;  %v2721_v15 = vld [vmem:[%s10290_s17 + $0x258] sm:$0xff]  ;;  %v7645_v32 = vcombine.low %v2696_v28, %v2704_v16  ;;  %v7728_v19 = vcombine.high %v2777_v3, %v2785_v12  ;;  %v7727_v28 = vcombine.low %v2777_v3, %v2785_v12  ;;  %v2888_v12 = vld [vmem:[%s10290_s17 + $0x790] sm:$0xff] }
 0xe07   : > { %2607 = vadd.xlane.f32.xlu1 %v2606_v40  ;;  %v7599_v40 = vcombine.low %v2649_v22, %v2657_v44  ;;  %4348 = vmatprep.subr.bf16.mxu1 %v7598_v42  ;;  %v7647_v22 = vcombine.low %v2697_v6, %v2705_v29  ;;  %v7662_v42 = vcombine.high %v2712_v60, %v2720_v34  ;;  %v2808_v29 = vld [vmem:[%s10290_s17 + $0x510] sm:$0xff] }
 0xe08   : > { %4389 = vmatprep.subr.bf16.mxu0 %v7600_v41  ;;  %v7664_v44 = vcombine.high %v2713_v10, %v2721_v15  ;;  %v2729_v41 = vld [vmem:[%s10290_s17 + $0x298] sm:$0xff] }
 0xe92   : > { %v2602_v43 = vpop.xlane.xlu0 %2601 }
 0xe93   : > { %v2603_v45 = vmul.f32 0.007352941, %v2602_v43  ;;  %v2737_v43 = vld [vmem:[%s10290_s17 + $0x2d8] sm:$0xff] }
 0xe94   : > { %v2608_v46 = vpop.xlane.xlu1 %2607 }
 0xe95   : > { %v2609_v47 = vmul.f32 0.007352941, %v2608_v46  ;;  %v2610_v48 = vmul.f32 %v2603_v45, %v2603_v45  ;;  %v2612_v39 = vsub.f32 %v10645_v35, %v2603_v45  ;;  %v2613_v52 = vsub.f32 %v10647_v36, %v2603_v45 }
 0xe96   : > { %v7661_v45 = vcombine.low %v2712_v60, %v2720_v34  ;;  %v7663_v46 = vcombine.low %v2713_v10, %v2721_v15  ;;  %v2824_v15 = vld [vmem:[%s10290_s17 + $0x590] sm:$0xff] }
 0xe97   : > { %v2611_v49 = vsub.f32 %v2609_v47, %v2610_v48  ;;  %v7680_v48 = vcombine.high %v2729_v41, %v2737_v43 }
 0xe99   : > { %v2614_v50 = vadd.f32 1e-05, %v2611_v49  ;;  %v2744_v49 = vld [vmem:[%s10290_s17 + $0x310] sm:$0xff] }
 0xe9b   : > { %9005 = vrsqrt.f32 %v2614_v50  ;;  %v2752_v50 = vld [vmem:[%s10290_s17 + $0x350] sm:$0xff] }
 0xea5   : > { %v9006_v55 = vpop.eup %9005 }
 0xea6   : > { %v2616_v58 = vmul.f32 %v9006_v55, %v2612_v39  ;;  %v2617_v59 = vmul.f32 %v9006_v55, %v2613_v52  ;;  %v7679_v52 = vcombine.low %v2729_v41, %v2737_v43  ;;  %v2760_v55 = vld [vmem:[%s10290_s17 + $0x390] sm:$0xff] }
 0xea7   : > { %v2840_v43 = vld [vmem:[%s10290_s17 + $0x610] sm:$0xff] }
 0xea8   : > { %v2629_v61 = vmul.f32 %v2622_v53, %v2616_v58  ;;  %v2630_v62 = vmul.f32 %v2626_v54, %v2617_v59  ;;  %v7694_v53 = vcombine.high %v2744_v49, %v2752_v50  ;;  %v7696_v54 = vcombine.high %v2745_v37, %v2753_v51  ;;  %v2769_v58 = vld [vmem:[%s10290_s17 + $0x3d8] sm:$0xff] }
 0xea9   : > { %v7693_v59 = vcombine.low %v2744_v49, %v2752_v50 }
 0xeaa   : > { %v10693_v35 = vadd.f32 %v2635_v56, %v2629_v61  ;;  %v10695_v36 = vadd.f32 %v2639_v57, %v2630_v62  ;;  %v2768_v56 = vld [vmem:[%s10290_s17 + $0x3d0] sm:$0xff]  ;;  %v2761_v57 = vld [vmem:[%s10290_s17 + $0x398] sm:$0xff]  ;;  %v7695_v61 = vcombine.low %v2745_v37, %v2753_v51 }
 0xeab   : > { %v7710_v62 = vcombine.high %v2760_v55, %v2768_v56  ;;  %v7712_v0 = vcombine.high %v2761_v57, %v2769_v58  ;;  %v2856_v51 = vld [vmem:[%s10290_s17 + $0x690] sm:$0xff] }
 0xeac   : > { %v10703_v4 = vpack.c.bf16 %v10693_v35, %v10693_v35  ;;  %v10707_v7 = vpack.c.bf16 %v10695_v36, %v10695_v36 }
 0xeae   : > { %4298 = vmatprep.mubr.bf16.mxu1 %v10707_v7  ;;  %4339 = vmatprep.mubr.bf16.mxu0 %v10707_v7 }
 0xeaf   : > { %4299 = vmatmul.mubr.bf16.vlgmr.msra.gmra.mrb[44].mxu1 %v10703_v4  ;;  %4340 = vmatmul.mubr.bf16.vlgmr.msra.gmra.mrb[16].mxu0 %v10703_v4 }
 0xeb0   : > { %4349 = vmatpush1.bf16.msra.mxu1 %v7597_v38  ;;  %4390 = vmatpush1.bf16.msra.mxu0 %v7599_v40  ;;  %v2728_v38 = vld [vmem:[%s10290_s17 + $0x290] sm:$0xff] }
 0xeb1   : > { %4380 = vmatprep.mubr.bf16.mxu1 %v10707_v7  ;;  %4421 = vmatprep.mubr.bf16.mxu0 %v10707_v7  ;;  %v2736_v40 = vld [vmem:[%s10290_s17 + $0x2d0] sm:$0xff] }
 0xeb2   : > { %4350 = vmatprep.subr.bf16.mxu1 %v7614_v13  ;;  %4391 = vmatprep.subr.bf16.mxu0 %v7616_v14  ;;  %v7678_v47 = vcombine.high %v2728_v38, %v2736_v40  ;;  %v7677_v39 = vcombine.low %v2728_v38, %v2736_v40  ;;  %v7709_v13 = vcombine.low %v2760_v55, %v2768_v56 }
 0xeb3   : > { %v7711_v14 = vcombine.low %v2761_v57, %v2769_v58  ;;  %v2872_v58 = vld [vmem:[%s10290_s17 + $0x710] sm:$0xff] }
 0xeb4   : > { %4351 = vmatpush1.bf16.msra.mxu1 %v7613_v21  ;;  %4392 = vmatpush1.bf16.msra.mxu0 %v7615_v23  ;;  %v2800_v21 = vld [vmem:[%s10290_s17 + $0x4d0] sm:$0xff]  ;;  %v2793_v23 = vld [vmem:[%s10290_s17 + $0x498] sm:$0xff] }
 0xeb5   : > { %4352 = vmatprep.subr.bf16.mxu1 %v7630_v25  ;;  %4393 = vmatprep.subr.bf16.mxu0 %v7632_v27  ;;  %v2801_v25 = vld [vmem:[%s10290_s17 + $0x4d8] sm:$0xff]  ;;  %v7725_v27 = vcombine.low %v2776_v1, %v2784_v2  ;;  %v7742_v16 = vcombine.high %v2792_v20, %v2800_v21 }
 0xeb6   : > { %v7744_v6 = vcombine.high %v2793_v23, %v2801_v25  ;;  %v7743_v60 = vcombine.low %v2793_v23, %v2801_v25  ;;  %v2650_v25 = vld [vmem:[%s10290_s17 + $0x20] sm:$0xff] }
 0xeb8   : > { %4353 = vmatpush1.bf16.msra.mxu1 %v7629_v30  ;;  %4394 = vmatpush1.bf16.msra.mxu0 %v7631_v63  ;;  %v2816_v30 = vld [vmem:[%s10290_s17 + $0x550] sm:$0xff]  ;;  %v2809_v63 = vld [vmem:[%s10290_s17 + $0x518] sm:$0xff] }
 0xeb9   : > { %4354 = vmatprep.subr.bf16.mxu1 %v7646_v31  ;;  %4395 = vmatprep.subr.bf16.mxu0 %v7648_v33  ;;  %v2817_v31 = vld [vmem:[%s10290_s17 + $0x558] sm:$0xff]  ;;  %v7741_v33 = vcombine.low %v2792_v20, %v2800_v21  ;;  %v7758_v34 = vcombine.high %v2808_v29, %v2816_v30 }
 0xeba   : > { %v7760_v10 = vcombine.high %v2809_v63, %v2817_v31  ;;  %v7759_v38 = vcombine.low %v2809_v63, %v2817_v31  ;;  %v2666_v31 = vld [vmem:[%s10290_s17 + $0xa0] sm:$0xff] }
 0xebc   : > { %4355 = vmatpush1.bf16.msra.mxu1 %v7645_v32  ;;  %4396 = vmatpush1.bf16.msra.mxu0 %v7647_v22  ;;  %v2832_v32 = vld [vmem:[%s10290_s17 + $0x5d0] sm:$0xff]  ;;  %v2825_v22 = vld [vmem:[%s10290_s17 + $0x598] sm:$0xff] }
 0xebd   : > { %4356 = vmatprep.subr.bf16.mxu1 %v7662_v42  ;;  %4397 = vmatprep.subr.bf16.mxu0 %v7664_v44  ;;  %v2833_v42 = vld [vmem:[%s10290_s17 + $0x5d8] sm:$0xff]  ;;  %v7757_v44 = vcombine.low %v2808_v29, %v2816_v30  ;;  %v7774_v40 = vcombine.high %v2824_v15, %v2832_v32 }
 0xebe   : > { %v7776_v41 = vcombine.high %v2825_v22, %v2833_v42  ;;  %v7775_v49 = vcombine.low %v2825_v22, %v2833_v42  ;;  %v2682_v42 = vld [vmem:[%s10290_s17 + $0x120] sm:$0xff] }
 0xec0   : > { %4357 = vmatpush1.bf16.msra.mxu1 %v7661_v45  ;;  %4398 = vmatpush1.bf16.msra.mxu0 %v7663_v46  ;;  %v2848_v45 = vld [vmem:[%s10290_s17 + $0x650] sm:$0xff]  ;;  %v2841_v46 = vld [vmem:[%s10290_s17 + $0x618] sm:$0xff] }
 0xec1   : > { %4358 = vmatprep.subr.bf16.mxu1 %v7678_v47  ;;  %4399 = vmatprep.subr.bf16.mxu0 %v7680_v48  ;;  %v2849_v47 = vld [vmem:[%s10290_s17 + $0x658] sm:$0xff]  ;;  %v7773_v48 = vcombine.low %v2824_v15, %v2832_v32  ;;  %v7790_v50 = vcombine.high %v2840_v43, %v2848_v45 }
 0xec2   : > { %v7792_v37 = vcombine.high %v2841_v46, %v2849_v47  ;;  %v7791_v55 = vcombine.low %v2841_v46, %v2849_v47  ;;  %v2698_v47 = vld [vmem:[%s10290_s17 + $0x1a0] sm:$0xff] }
 0xec4   : > { %4359 = vmatpush1.bf16.msra.mxu1 %v7677_v39  ;;  %4400 = vmatpush1.bf16.msra.mxu0 %v7679_v52  ;;  %v2864_v39 = vld [vmem:[%s10290_s17 + $0x6d0] sm:$0xff]  ;;  %v2857_v52 = vld [vmem:[%s10290_s17 + $0x698] sm:$0xff] }
 0xec5   : > { %4360 = vmatprep.subr.bf16.mxu1 %v7694_v53  ;;  %4401 = vmatprep.subr.bf16.mxu0 %v7696_v54  ;;  %v2865_v53 = vld [vmem:[%s10290_s17 + $0x6d8] sm:$0xff]  ;;  %v7789_v54 = vcombine.low %v2840_v43, %v2848_v45  ;;  %v7806_v56 = vcombine.high %v2856_v51, %v2864_v39 }
 0xec6   : > { %v7808_v57 = vcombine.high %v2857_v52, %v2865_v53  ;;  %v7807_v1 = vcombine.low %v2857_v52, %v2865_v53  ;;  %v2714_v53 = vld [vmem:[%s10290_s17 + $0x220] sm:$0xff] }
 0xec8   : > { %4361 = vmatpush1.bf16.msra.mxu1 %v7693_v59  ;;  %4402 = vmatpush1.bf16.msra.mxu0 %v7695_v61  ;;  %v2880_v59 = vld [vmem:[%s10290_s17 + $0x750] sm:$0xff]  ;;  %v2873_v61 = vld [vmem:[%s10290_s17 + $0x718] sm:$0xff] }
 0xec9   : > { %4362 = vmatprep.subr.bf16.mxu1 %v7710_v62  ;;  %4403 = vmatprep.subr.bf16.mxu0 %v7712_v0  ;;  %v2881_v62 = vld [vmem:[%s10290_s17 + $0x758] sm:$0xff]  ;;  %v7805_v0 = vcombine.low %v2856_v51, %v2864_v39  ;;  %v7822_v2 = vcombine.high %v2872_v58, %v2880_v59 }
 0xeca   : > { %v7824_v3 = vcombine.high %v2873_v61, %v2881_v62  ;;  %v7823_v20 = vcombine.low %v2873_v61, %v2881_v62  ;;  %v2730_v62 = vld [vmem:[%s10290_s17 + $0x2a0] sm:$0xff] }
 0xecc   : > { %4363 = vmatpush1.bf16.msra.mxu1 %v7709_v13  ;;  %4404 = vmatpush1.bf16.msra.mxu0 %v7711_v14  ;;  %v2896_v13 = vld [vmem:[%s10290_s17 + $0x7d0] sm:$0xff]  ;;  %v2889_v14 = vld [vmem:[%s10290_s17 + $0x798] sm:$0xff] }
 0xecd   : > { %4364 = vmatprep.subr.bf16.mxu1 %v7726_v18  ;;  %4405 = vmatprep.subr.bf16.mxu0 %v7728_v19  ;;  %v2897_v18 = vld [vmem:[%s10290_s17 + $0x7d8] sm:$0xff]  ;;  %v7821_v19 = vcombine.low %v2872_v58, %v2880_v59  ;;  %v7838_v21 = vcombine.high %v2888_v12, %v2896_v13 }
 0xece   : > { %v7840_v23 = vcombine.high %v2889_v14, %v2897_v18  ;;  %v7839_v29 = vcombine.low %v2889_v14, %v2897_v18  ;;  %v2746_v18 = vld [vmem:[%s10290_s17 + $0x320] sm:$0xff] }
 0xed0   : > { %4365 = vmatpush1.bf16.msra.mxu1 %v7725_v27  ;;  %4406 = vmatpush1.bf16.msra.mxu0 %v7727_v28  ;;  %v2658_v27 = vld [vmem:[%s10290_s17 + $0x60] sm:$0xff]  ;;  %v2651_v28 = vld [vmem:[%s10290_s17 + $0x28] sm:$0xff] }
 0xed1   : > { %4366 = vmatprep.subr.bf16.mxu1 %v7742_v16  ;;  %4407 = vmatprep.subr.bf16.mxu0 %v7744_v6  ;;  %v2659_v16 = vld [vmem:[%s10290_s17 + $0x68] sm:$0xff]  ;;  %v7837_v6 = vcombine.low %v2888_v12, %v2896_v13  ;;  %v7602_v30 = vcombine.high %v2650_v25, %v2658_v27 }
 0xed2   : > { %v7604_v63 = vcombine.high %v2651_v28, %v2659_v16  ;;  %v7603_v15 = vcombine.low %v2651_v28, %v2659_v16  ;;  %v2762_v16 = vld [vmem:[%s10290_s17 + $0x3a0] sm:$0xff] }
 0xed4   : > { %4367 = vmatpush1.bf16.msra.mxu1 %v7741_v33  ;;  %4408 = vmatpush1.bf16.msra.mxu0 %v7743_v60  ;;  %v2674_v33 = vld [vmem:[%s10290_s17 + $0xe0] sm:$0xff]  ;;  %v2667_v60 = vld [vmem:[%s10290_s17 + $0xa8] sm:$0xff] }
 0xed5   : > { %4368 = vmatprep.subr.bf16.mxu1 %v7758_v34  ;;  %4409 = vmatprep.subr.bf16.mxu0 %v7760_v10  ;;  %v2675_v34 = vld [vmem:[%s10290_s17 + $0xe8] sm:$0xff]  ;;  %v7601_v10 = vcombine.low %v2650_v25, %v2658_v27  ;;  %v7618_v32 = vcombine.high %v2666_v31, %v2674_v33 }
 0xed6   : > { %v7620_v22 = vcombine.high %v2667_v60, %v2675_v34  ;;  %v7619_v43 = vcombine.low %v2667_v60, %v2675_v34  ;;  %v2778_v34 = vld [vmem:[%s10290_s17 + $0x420] sm:$0xff] }
 0xed8   : > { %4369 = vmatpush1.bf16.msra.mxu1 %v7757_v44  ;;  %4410 = vmatpush1.bf16.msra.mxu0 %v7759_v38  ;;  %v2690_v44 = vld [vmem:[%s10290_s17 + $0x160] sm:$0xff]  ;;  %v2683_v38 = vld [vmem:[%s10290_s17 + $0x128] sm:$0xff] }
 0xed9   : > { %4370 = vmatprep.subr.bf16.mxu1 %v7774_v40  ;;  %4411 = vmatprep.subr.bf16.mxu0 %v7776_v41  ;;  %v2691_v40 = vld [vmem:[%s10290_s17 + $0x168] sm:$0xff]  ;;  %v7617_v41 = vcombine.low %v2666_v31, %v2674_v33  ;;  %v7634_v45 = vcombine.high %v2682_v42, %v2690_v44 }
 0xeda   : > { %v7636_v46 = vcombine.high %v2683_v38, %v2691_v40  ;;  %v7635_v51 = vcombine.low %v2683_v38, %v2691_v40  ;;  %v2794_v40 = vld [vmem:[%s10290_s17 + $0x4a0] sm:$0xff] }
 0xedc   : > { %4371 = vmatpush1.bf16.msra.mxu1 %v7773_v48  ;;  %4412 = vmatpush1.bf16.msra.mxu0 %v7775_v49  ;;  %v2706_v48 = vld [vmem:[%s10290_s17 + $0x1e0] sm:$0xff]  ;;  %v2699_v49 = vld [vmem:[%s10290_s17 + $0x1a8] sm:$0xff] }
 0xedd   : > { %4372 = vmatprep.subr.bf16.mxu1 %v7790_v50  ;;  %4413 = vmatprep.subr.bf16.mxu0 %v7792_v37  ;;  %v2707_v50 = vld [vmem:[%s10290_s17 + $0x1e8] sm:$0xff]  ;;  %v7633_v37 = vcombine.low %v2682_v42, %v2690_v44  ;;  %v7650_v39 = vcombine.high %v2698_v47, %v2706_v48 }
 0xede   : > { %v7652_v52 = vcombine.high %v2699_v49, %v2707_v50  ;;  %v7651_v58 = vcombine.low %v2699_v49, %v2707_v50  ;;  %v2810_v50 = vld [vmem:[%s10290_s17 + $0x520] sm:$0xff] }
 0xee0   : > { %4373 = vmatpush1.bf16.msra.mxu1 %v7789_v54  ;;  %4414 = vmatpush1.bf16.msra.mxu0 %v7791_v55  ;;  %v2722_v54 = vld [vmem:[%s10290_s17 + $0x260] sm:$0xff]  ;;  %v2715_v55 = vld [vmem:[%s10290_s17 + $0x228] sm:$0xff] }
 0xee1   : > { %4374 = vmatprep.subr.bf16.mxu1 %v7806_v56  ;;  %4415 = vmatprep.subr.bf16.mxu0 %v7808_v57  ;;  %v2723_v56 = vld [vmem:[%s10290_s17 + $0x268] sm:$0xff]  ;;  %v7649_v57 = vcombine.low %v2698_v47, %v2706_v48  ;;  %v7666_v59 = vcombine.high %v2714_v53, %v2722_v54 }
 0xee2   : > { %v7668_v61 = vcombine.high %v2715_v55, %v2723_v56  ;;  %v7667_v12 = vcombine.low %v2715_v55, %v2723_v56  ;;  %v2826_v56 = vld [vmem:[%s10290_s17 + $0x5a0] sm:$0xff] }
 0xee4   : > { %4375 = vmatpush1.bf16.msra.mxu1 %v7805_v0  ;;  %4416 = vmatpush1.bf16.msra.mxu0 %v7807_v1  ;;  %v2738_v0 = vld [vmem:[%s10290_s17 + $0x2e0] sm:$0xff]  ;;  %v2731_v1 = vld [vmem:[%s10290_s17 + $0x2a8] sm:$0xff] }
 0xee5   : > { %4376 = vmatprep.subr.bf16.mxu1 %v7822_v2  ;;  %4417 = vmatprep.subr.bf16.mxu0 %v7824_v3  ;;  %v2739_v2 = vld [vmem:[%s10290_s17 + $0x2e8] sm:$0xff]  ;;  %v7665_v3 = vcombine.low %v2714_v53, %v2722_v54  ;;  %v7682_v13 = vcombine.high %v2730_v62, %v2738_v0 }
 0xee6   : > { %v7684_v14 = vcombine.high %v2731_v1, %v2739_v2  ;;  %v7683_v25 = vcombine.low %v2731_v1, %v2739_v2  ;;  %v2842_v2 = vld [vmem:[%s10290_s17 + $0x620] sm:$0xff] }
 0xee8   : > { %4377 = vmatpush1.bf16.msra.mxu1 %v7821_v19  ;;  %4418 = vmatpush1.bf16.msra.mxu0 %v7823_v20  ;;  %v2754_v19 = vld [vmem:[%s10290_s17 + $0x360] sm:$0xff]  ;;  %v2747_v20 = vld [vmem:[%s10290_s17 + $0x328] sm:$0xff] }
 0xee9   : > { %4378 = vmatprep.subr.bf16.mxu1 %v7838_v21  ;;  %4419 = vmatprep.subr.bf16.mxu0 %v7840_v23  ;;  %v2755_v21 = vld [vmem:[%s10290_s17 + $0x368] sm:$0xff]  ;;  %v7681_v23 = vcombine.low %v2730_v62, %v2738_v0  ;;  %v7698_v27 = vcombine.high %v2746_v18, %v2754_v19 }
 0xeea   : > { %v7700_v28 = vcombine.high %v2747_v20, %v2755_v21  ;;  %v7699_v31 = vcombine.low %v2747_v20, %v2755_v21  ;;  %v2858_v21 = vld [vmem:[%s10290_s17 + $0x6a0] sm:$0xff] }
 0xeec   : > { %4379 = vmatpush1.bf16.msra.mxu1 %v7837_v6  ;;  %4420 = vmatpush1.bf16.msra.mxu0 %v7839_v29  ;;  %v2770_v6 = vld [vmem:[%s10290_s17 + $0x3e0] sm:$0xff]  ;;  %v2763_v29 = vld [vmem:[%s10290_s17 + $0x3a8] sm:$0xff] }
 0xeed   : > { %4430 = vmatprep.subr.bf16.mxu1 %v7602_v30  ;;  %4471 = vmatprep.subr.bf16.mxu0 %v7604_v63  ;;  %v2771_v30 = vld [vmem:[%s10290_s17 + $0x3e8] sm:$0xff]  ;;  %v7697_v63 = vcombine.low %v2746_v18, %v2754_v19  ;;  %v7714_v33 = vcombine.high %v2762_v16, %v2770_v6 }
 0xeee   : > { %v7716_v60 = vcombine.high %v2763_v29, %v2771_v30  ;;  %v7715_v42 = vcombine.low %v2763_v29, %v2771_v30  ;;  %v2874_v30 = vld [vmem:[%s10290_s17 + $0x720] sm:$0xff] }
 0xeef   : > { %4381 = vmatmul.mubr.bf16.vlgmr.msra.gmra.mrb[48].mxu1 %v10703_v4  ;;  %4422 = vmatmul.mubr.bf16.vlgmr.msra.gmra.mrb[20].mxu0 %v10703_v4 }
 0xef0   : > { %4431 = vmatpush1.bf16.msra.mxu1 %v7601_v10  ;;  %4462 = vmatprep.mubr.bf16.mxu1 %v10707_v7  ;;  %v2786_v10 = vld [vmem:[%s10290_s17 + $0x460] sm:$0xff] }
 0xef1   : > { %4472 = vmatpush1.bf16.msra.mxu0 %v7603_v15  ;;  %4503 = vmatprep.mubr.bf16.mxu0 %v10707_v7  ;;  %v2779_v15 = vld [vmem:[%s10290_s17 + $0x428] sm:$0xff]  ;;  %v7730_v44 = vcombine.high %v2778_v34, %v2786_v10 }
 0xef2   : > { %4432 = vmatprep.subr.bf16.mxu1 %v7618_v32  ;;  %4473 = vmatprep.subr.bf16.mxu0 %v7620_v22  ;;  %v2787_v32 = vld [vmem:[%s10290_s17 + $0x468] sm:$0xff]  ;;  %v7713_v22 = vcombine.low %v2762_v16, %v2770_v6 }
 0xef3   : > { %v7732_v38 = vcombine.high %v2779_v15, %v2787_v32  ;;  %v7731_v47 = vcombine.low %v2779_v15, %v2787_v32  ;;  %v2890_v32 = vld [vmem:[%s10290_s17 + $0x7a0] sm:$0xff] }
 0xef4   : > { %4433 = vmatpush1.bf16.msra.mxu1 %v7617_v41  ;;  %v2802_v41 = vld [vmem:[%s10290_s17 + $0x4e0] sm:$0xff] }
 0xef5   : > { %4474 = vmatpush1.bf16.msra.mxu0 %v7619_v43  ;;  %4434 = vmatprep.subr.bf16.mxu1 %v7634_v45  ;;  %v2795_v43 = vld [vmem:[%s10290_s17 + $0x4a8] sm:$0xff]  ;;  %v7746_v48 = vcombine.high %v2794_v40, %v2802_v41 }
 0xef6   : > { %4475 = vmatprep.subr.bf16.mxu0 %v7636_v46  ;;  %v2803_v45 = vld [vmem:[%s10290_s17 + $0x4e8] sm:$0xff]  ;;  %v7729_v46 = vcombine.low %v2778_v34, %v2786_v10 }
 0xef7   : > { %v7748_v49 = vcombine.high %v2795_v43, %v2803_v45  ;;  %v7747_v53 = vcombine.low %v2795_v43, %v2803_v45  ;;  %v2652_v45 = vld [vmem:[%s10290_s17 + $0x30] sm:$0xff] }
 0xef8   : > { %4435 = vmatpush1.bf16.msra.mxu1 %v7633_v37  ;;  %v2818_v37 = vld [vmem:[%s10290_s17 + $0x560] sm:$0xff] }
 0xef9   : > { %4476 = vmatpush1.bf16.msra.mxu0 %v7635_v51  ;;  %4436 = vmatprep.subr.bf16.mxu1 %v7650_v39  ;;  %v2811_v51 = vld [vmem:[%s10290_s17 + $0x528] sm:$0xff]  ;;  %v7762_v54 = vcombine.high %v2810_v50, %v2818_v37 }
 0xefa   : > { %4477 = vmatprep.subr.bf16.mxu0 %v7652_v52  ;;  %v2819_v39 = vld [vmem:[%s10290_s17 + $0x568] sm:$0xff]  ;;  %v7745_v52 = vcombine.low %v2794_v40, %v2802_v41 }
 0xefb   : > { %v7764_v55 = vcombine.high %v2811_v51, %v2819_v39  ;;  %v7763_v62 = vcombine.low %v2811_v51, %v2819_v39  ;;  %v2668_v39 = vld [vmem:[%s10290_s17 + $0xb0] sm:$0xff] }
 0xefc   : > { %4437 = vmatpush1.bf16.msra.mxu1 %v7649_v57  ;;  %v2834_v57 = vld [vmem:[%s10290_s17 + $0x5e0] sm:$0xff] }
 0xefd   : > { %4478 = vmatpush1.bf16.msra.mxu0 %v7651_v58  ;;  %4438 = vmatprep.subr.bf16.mxu1 %v7666_v59  ;;  %v2827_v58 = vld [vmem:[%s10290_s17 + $0x5a8] sm:$0xff]  ;;  %v7778_v0 = vcombine.high %v2826_v56, %v2834_v57 }
 0xefe   : > { %4479 = vmatprep.subr.bf16.mxu0 %v7668_v61  ;;  %v2835_v59 = vld [vmem:[%s10290_s17 + $0x5e8] sm:$0xff]  ;;  %v7761_v61 = vcombine.low %v2810_v50, %v2818_v37 }
 0xeff   : > { %v7780_v1 = vcombine.high %v2827_v58, %v2835_v59  ;;  %v7779_v18 = vcombine.low %v2827_v58, %v2835_v59  ;;  %v2684_v58 = vld [vmem:[%s10290_s17 + $0x130] sm:$0xff] }
 0xf00   : > { %4439 = vmatpush1.bf16.msra.mxu1 %v7665_v3  ;;  %v2850_v3 = vld [vmem:[%s10290_s17 + $0x660] sm:$0xff]  ;;  %v2692_v59 = vld [vmem:[%s10290_s17 + $0x170] sm:$0xff] }
 0xf01   : > { %4480 = vmatpush1.bf16.msra.mxu0 %v7667_v12  ;;  %4440 = vmatprep.subr.bf16.mxu1 %v7682_v13  ;;  %v2843_v12 = vld [vmem:[%s10290_s17 + $0x628] sm:$0xff]  ;;  %v7794_v19 = vcombine.high %v2842_v2, %v2850_v3 }
 0xf02   : > { %4481 = vmatprep.subr.bf16.mxu0 %v7684_v14  ;;  %v2851_v13 = vld [vmem:[%s10290_s17 + $0x668] sm:$0xff]  ;;  %v7777_v14 = vcombine.low %v2826_v56, %v2834_v57 }
 0xf03   : > { %v7796_v20 = vcombine.high %v2843_v12, %v2851_v13  ;;  %v7795_v16 = vcombine.low %v2843_v12, %v2851_v13  ;;  %v2700_v13 = vld [vmem:[%s10290_s17 + $0x1b0] sm:$0xff] }
 0xf04   : > { %4441 = vmatpush1.bf16.msra.mxu1 %v7681_v23  ;;  %v2866_v23 = vld [vmem:[%s10290_s17 + $0x6e0] sm:$0xff] }
 0xf05   : > { %4482 = vmatpush1.bf16.msra.mxu0 %v7683_v25  ;;  %4442 = vmatprep.subr.bf16.mxu1 %v7698_v27  ;;  %v2859_v25 = vld [vmem:[%s10290_s17 + $0x6a8] sm:$0xff]  ;;  %v7810_v6 = vcombine.high %v2858_v21, %v2866_v23 }
 0xf06   : > { %4483 = vmatprep.subr.bf16.mxu0 %v7700_v28  ;;  %v2867_v27 = vld [vmem:[%s10290_s17 + $0x6e8] sm:$0xff]  ;;  %v7793_v28 = vcombine.low %v2842_v2, %v2850_v3  ;;  %v7638_v3 = vcombine.high %v2684_v58, %v2692_v59 }
 0xf07   : > { %v7812_v29 = vcombine.high %v2859_v25, %v2867_v27  ;;  %v7811_v34 = vcombine.low %v2859_v25, %v2867_v27  ;;  %v2716_v25 = vld [vmem:[%s10290_s17 + $0x230] sm:$0xff] }
 0xf08   : > { %4443 = vmatpush1.bf16.msra.mxu1 %v7697_v63  ;;  %v2882_v63 = vld [vmem:[%s10290_s17 + $0x760] sm:$0xff]  ;;  %v2724_v27 = vld [vmem:[%s10290_s17 + $0x270] sm:$0xff] }
 0xf09   : > { %4484 = vmatpush1.bf16.msra.mxu0 %v7699_v31  ;;  %4444 = vmatprep.subr.bf16.mxu1 %v7714_v33  ;;  %v2875_v31 = vld [vmem:[%s10290_s17 + $0x728] sm:$0xff]  ;;  %v7826_v10 = vcombine.high %v2874_v30, %v2882_v63 }
 0xf0a   : > { %4485 = vmatprep.subr.bf16.mxu0 %v7716_v60  ;;  %v2883_v33 = vld [vmem:[%s10290_s17 + $0x768] sm:$0xff]  ;;  %v7809_v60 = vcombine.low %v2858_v21, %v2866_v23 }
 0xf0b   : > { %v7828_v15 = vcombine.high %v2875_v31, %v2883_v33  ;;  %v7827_v40 = vcombine.low %v2875_v31, %v2883_v33  ;;  %v2732_v31 = vld [vmem:[%s10290_s17 + $0x2b0] sm:$0xff] }
 0xf0c   : > { %4445 = vmatpush1.bf16.msra.mxu1 %v7713_v22  ;;  %v2898_v22 = vld [vmem:[%s10290_s17 + $0x7e0] sm:$0xff]  ;;  %v2740_v33 = vld [vmem:[%s10290_s17 + $0x2f0] sm:$0xff] }
 0xf0d   : > { %4486 = vmatpush1.bf16.msra.mxu0 %v7715_v42  ;;  %4446 = vmatprep.subr.bf16.mxu1 %v7730_v44  ;;  %v2891_v42 = vld [vmem:[%s10290_s17 + $0x7a8] sm:$0xff]  ;;  %v7842_v41 = vcombine.high %v2890_v32, %v2898_v22 }
 0xf0e   : > { %4487 = vmatprep.subr.bf16.mxu0 %v7732_v38  ;;  %v2899_v44 = vld [vmem:[%s10290_s17 + $0x7e8] sm:$0xff]  ;;  %v7825_v38 = vcombine.low %v2874_v30, %v2882_v63  ;;  %v7670_v30 = vcombine.high %v2716_v25, %v2724_v27 }
 0xf0f   : > { %v7844_v43 = vcombine.high %v2891_v42, %v2899_v44  ;;  %v7843_v50 = vcombine.low %v2891_v42, %v2899_v44  ;;  %v2748_v42 = vld [vmem:[%s10290_s17 + $0x330] sm:$0xff] }
 0xf10   : > { %4447 = vmatpush1.bf16.msra.mxu1 %v7729_v46  ;;  %v2660_v46 = vld [vmem:[%s10290_s17 + $0x70] sm:$0xff] }
 0xf11   : > { %4488 = vmatpush1.bf16.msra.mxu0 %v7731_v47  ;;  %4448 = vmatprep.subr.bf16.mxu1 %v7746_v48  ;;  %v2653_v47 = vld [vmem:[%s10290_s17 + $0x38] sm:$0xff]  ;;  %v7606_v37 = vcombine.high %v2652_v45, %v2660_v46  ;;  %v2756_v44 = vld [vmem:[%s10290_s17 + $0x370] sm:$0xff] }
 0xf12   : > { %4489 = vmatprep.subr.bf16.mxu0 %v7748_v49  ;;  %v2661_v48 = vld [vmem:[%s10290_s17 + $0x78] sm:$0xff]  ;;  %v7841_v49 = vcombine.low %v2890_v32, %v2898_v22  ;;  %v7686_v32 = vcombine.high %v2732_v31, %v2740_v33 }
 0xf13   : > { %v7608_v51 = vcombine.high %v2653_v47, %v2661_v48  ;;  %v7607_v56 = vcombine.low %v2653_v47, %v2661_v48  ;;  %v2764_v47 = vld [vmem:[%s10290_s17 + $0x3b0] sm:$0xff] }
 0xf14   : > { %4449 = vmatpush1.bf16.msra.mxu1 %v7745_v52  ;;  %v2676_v52 = vld [vmem:[%s10290_s17 + $0xf0] sm:$0xff] }
 0xf15   : > { %4490 = vmatpush1.bf16.msra.mxu0 %v7747_v53  ;;  %4450 = vmatprep.subr.bf16.mxu1 %v7762_v54  ;;  %v7605_v53 = vcombine.low %v2652_v45, %v2660_v46  ;;  %v2669_v54 = vld [vmem:[%s10290_s17 + $0xb8] sm:$0xff]  ;;  %v7622_v57 = vcombine.high %v2668_v39, %v2676_v52  ;;  %v7702_v45 = vcombine.high %v2748_v42, %v2756_v44  ;;  %v2772_v48 = vld [vmem:[%s10290_s17 + $0x3f0] sm:$0xff] }
 0xf16   : > { %4491 = vmatprep.subr.bf16.mxu0 %v7764_v55  ;;  %v2677_v55 = vld [vmem:[%s10290_s17 + $0xf8] sm:$0xff] }
 0xf17   : > { %v7623_v2 = vcombine.low %v2669_v54, %v2677_v55 }
 0xf18   : > { %4451 = vmatpush1.bf16.msra.mxu1 %v7761_v61  ;;  %v7624_v61 = vcombine.high %v2669_v54, %v2677_v55  ;;  %v2788_v54 = vld [vmem:[%s10290_s17 + $0x470] sm:$0xff]  ;;  %v2781_v55 = vld [vmem:[%s10290_s17 + $0x438] sm:$0xff] }
 0xf19   : > { %4492 = vmatpush1.bf16.msra.mxu0 %v7763_v62  ;;  %4452 = vmatprep.subr.bf16.mxu1 %v7778_v0  ;;  %v2685_v62 = vld [vmem:[%s10290_s17 + $0x138] sm:$0xff] }
 0xf1a   : > { %4493 = vmatprep.subr.bf16.mxu0 %v7780_v1  ;;  %v2693_v0 = vld [vmem:[%s10290_s17 + $0x178] sm:$0xff]  ;;  %v7621_v1 = vcombine.low %v2668_v39, %v2676_v52  ;;  %v7718_v39 = vcombine.high %v2764_v47, %v2772_v48 }
 0xf1b   : > { %v7640_v12 = vcombine.high %v2685_v62, %v2693_v0  ;;  %v7639_v21 = vcombine.low %v2685_v62, %v2693_v0  ;;  %v2796_v62 = vld [vmem:[%s10290_s17 + $0x4b0] sm:$0xff] }
 0xf1c   : > { %4453 = vmatpush1.bf16.msra.mxu1 %v7777_v14  ;;  %v2708_v14 = vld [vmem:[%s10290_s17 + $0x1f0] sm:$0xff] }
 0xf1d   : > { %4494 = vmatpush1.bf16.msra.mxu0 %v7779_v18  ;;  %4454 = vmatprep.subr.bf16.mxu1 %v7794_v19  ;;  %v2701_v18 = vld [vmem:[%s10290_s17 + $0x1b8] sm:$0xff]  ;;  %v7654_v23 = vcombine.high %v2700_v13, %v2708_v14  ;;  %v2804_v0 = vld [vmem:[%s10290_s17 + $0x4f0] sm:$0xff] }
 0xf1e   : > { %4495 = vmatprep.subr.bf16.mxu0 %v7796_v20  ;;  %v2709_v19 = vld [vmem:[%s10290_s17 + $0x1f8] sm:$0xff]  ;;  %v7637_v20 = vcombine.low %v2684_v58, %v2692_v59 }
 0xf20   : > { %4455 = vmatpush1.bf16.msra.mxu1 %v7793_v28  ;;  %v2717_v28 = vld [vmem:[%s10290_s17 + $0x238] sm:$0xff] }
 0xf21   : > { %4496 = vmatpush1.bf16.msra.mxu0 %v7795_v16  ;;  %4456 = vmatprep.subr.bf16.mxu1 %v7810_v6  ;;  %v2725_v16 = vld [vmem:[%s10290_s17 + $0x278] sm:$0xff]  ;;  %v7653_v6 = vcombine.low %v2700_v13, %v2708_v14  ;;  %v7750_v13 = vcombine.high %v2796_v62, %v2804_v0 }
 0xf22   : > { %4497 = vmatprep.subr.bf16.mxu0 %v7812_v29  ;;  %v7655_v29 = vcombine.low %v2701_v18, %v2709_v19  ;;  %v7672_v63 = vcombine.high %v2717_v28, %v2725_v16 }
 0xf24   : > { %4457 = vmatpush1.bf16.msra.mxu1 %v7809_v60  ;;  %v2733_v60 = vld [vmem:[%s10290_s17 + $0x2b8] sm:$0xff] }
 0xf25   : > { %4498 = vmatpush1.bf16.msra.mxu0 %v7811_v34  ;;  %4458 = vmatprep.subr.bf16.mxu1 %v7826_v10  ;;  %v2741_v34 = vld [vmem:[%s10290_s17 + $0x2f8] sm:$0xff]  ;;  %v7669_v10 = vcombine.low %v2716_v25, %v2724_v27 }
 0xf26   : > { %4499 = vmatprep.subr.bf16.mxu0 %v7828_v15  ;;  %v7671_v15 = vcombine.low %v2717_v28, %v2725_v16  ;;  %v7688_v22 = vcombine.high %v2733_v60, %v2741_v34  ;;  %v2828_v28 = vld [vmem:[%s10290_s17 + $0x5b0] sm:$0xff] }
 0xf27   : > { %v2836_v16 = vld [vmem:[%s10290_s17 + $0x5f0] sm:$0xff] }
 0xf28   : > { %4459 = vmatpush1.bf16.msra.mxu1 %v7825_v38  ;;  %v2749_v38 = vld [vmem:[%s10290_s17 + $0x338] sm:$0xff] }
 0xf29   : > { %4500 = vmatpush1.bf16.msra.mxu0 %v7827_v40  ;;  %4460 = vmatprep.subr.bf16.mxu1 %v7842_v41  ;;  %v2757_v40 = vld [vmem:[%s10290_s17 + $0x378] sm:$0xff]  ;;  %v7685_v41 = vcombine.low %v2732_v31, %v2740_v33  ;;  %v7782_v31 = vcombine.high %v2828_v28, %v2836_v16 }
 0xf2a   : > { %4501 = vmatprep.subr.bf16.mxu0 %v7844_v43  ;;  %v7687_v43 = vcombine.low %v2733_v60, %v2741_v34  ;;  %v7704_v46 = vcombine.high %v2749_v38, %v2757_v40  ;;  %v2844_v60 = vld [vmem:[%s10290_s17 + $0x630] sm:$0xff] }
 0xf2b   : > { %v2852_v34 = vld [vmem:[%s10290_s17 + $0x670] sm:$0xff] }
 0xf2c   : > { %4461 = vmatpush1.bf16.msra.mxu1 %v7841_v49  ;;  %v2765_v49 = vld [vmem:[%s10290_s17 + $0x3b8] sm:$0xff] }
 0xf2d   : > { %4502 = vmatpush1.bf16.msra.mxu0 %v7843_v50  ;;  %4512 = vmatprep.subr.bf16.mxu1 %v7606_v37  ;;  %v2773_v50 = vld [vmem:[%s10290_s17 + $0x3f8] sm:$0xff]  ;;  %v7701_v37 = vcombine.low %v2748_v42, %v2756_v44  ;;  %v7798_v42 = vcombine.high %v2844_v60, %v2852_v34 }
 0xf2e   : > { %4553 = vmatprep.subr.bf16.mxu0 %v7608_v51  ;;  %v7703_v51 = vcombine.low %v2749_v38, %v2757_v40  ;;  %v7720_v52 = vcombine.high %v2765_v49, %v2773_v50  ;;  %v7719_v58 = vcombine.low %v2765_v49, %v2773_v50  ;;  %v2860_v38 = vld [vmem:[%s10290_s17 + $0x6b0] sm:$0xff] }
 0xf2f   : > { %4463 = vmatmul.mubr.bf16.vlgmr.msra.gmra.mrb[52].mxu1 %v10703_v4  ;;  %v2868_v40 = vld [vmem:[%s10290_s17 + $0x6f0] sm:$0xff] }
 0xf30   : > { %4504 = vmatmul.mubr.bf16.vlgmr.msra.gmra.mrb[24].mxu0 %v10703_v4  ;;  %4513 = vmatpush1.bf16.msra.mxu1 %v7605_v53  ;;  %v2780_v53 = vld [vmem:[%s10290_s17 + $0x430] sm:$0xff] }
 0xf31   : > { %4544 = vmatprep.mubr.bf16.mxu1 %v10707_v7  ;;  %4554 = vmatpush1.bf16.msra.mxu0 %v7607_v56  ;;  %v2789_v56 = vld [vmem:[%s10290_s17 + $0x478] sm:$0xff]  ;;  %v7734_v59 = vcombine.high %v2780_v53, %v2788_v54  ;;  %v2876_v49 = vld [vmem:[%s10290_s17 + $0x730] sm:$0xff] }
 0xf32   : > { %4585 = vmatprep.mubr.bf16.mxu0 %v10707_v7  ;;  %4514 = vmatprep.subr.bf16.mxu1 %v7622_v57  ;;  %v7656_v7 = vcombine.high %v2701_v18, %v2709_v19  ;;  %v7717_v57 = vcombine.low %v2764_v47, %v2772_v48  ;;  %v2812_v18 = vld [vmem:[%s10290_s17 + $0x530] sm:$0xff]  ;;  %v7814_v47 = vcombine.high %v2860_v38, %v2868_v40 }
 0xf33   : > { %4555 = vmatprep.subr.bf16.mxu0 %v7624_v61  ;;  %v7736_v61 = vcombine.high %v2781_v55, %v2789_v56  ;;  %v2820_v19 = vld [vmem:[%s10290_s17 + $0x570] sm:$0xff] }
 0xf34   : > { %4515 = vmatpush1.bf16.msra.mxu1 %v7621_v1  ;;  %v2797_v1 = vld [vmem:[%s10290_s17 + $0x4b8] sm:$0xff]  ;;  %v7766_v25 = vcombine.high %v2812_v18, %v2820_v19  ;;  %v2884_v50 = vld [vmem:[%s10290_s17 + $0x770] sm:$0xff] }
 0xf35   : > { %4556 = vmatpush1.bf16.msra.mxu0 %v7623_v2  ;;  %4516 = vmatprep.subr.bf16.mxu1 %v7638_v3  ;;  %v2805_v2 = vld [vmem:[%s10290_s17 + $0x4f8] sm:$0xff]  ;;  %v7733_v3 = vcombine.low %v2780_v53, %v2788_v54  ;;  %v7830_v53 = vcombine.high %v2876_v49, %v2884_v50 }
 0xf36   : > { %4557 = vmatprep.subr.bf16.mxu0 %v7640_v12  ;;  %v7735_v12 = vcombine.low %v2781_v55, %v2789_v56  ;;  %v7752_v14 = vcombine.high %v2797_v1, %v2805_v2  ;;  %v2892_v55 = vld [vmem:[%s10290_s17 + $0x7b0] sm:$0xff] }
 0xf37   : > { %v2900_v56 = vld [vmem:[%s10290_s17 + $0x7f0] sm:$0xff] }
 0xf38   : > { %4517 = vmatpush1.bf16.msra.mxu1 %v7637_v20  ;;  %v2813_v20 = vld [vmem:[%s10290_s17 + $0x538] sm:$0xff] }
 0xf39   : > { %4558 = vmatpush1.bf16.msra.mxu0 %v7639_v21  ;;  %4518 = vmatprep.subr.bf16.mxu1 %v7654_v23  ;;  %v2821_v21 = vld [vmem:[%s10290_s17 + $0x578] sm:$0xff]  ;;  %v7749_v23 = vcombine.low %v2796_v62, %v2804_v0  ;;  %v7846_v62 = vcombine.high %v2892_v55, %v2900_v56 }
 0xf3a   : > { %4559 = vmatprep.subr.bf16.mxu0 %v7656_v7  ;;  %v7751_v7 = vcombine.low %v2797_v1, %v2805_v2  ;;  %v7768_v27 = vcombine.high %v2813_v20, %v2821_v21  ;;  %v7845_v1 = vcombine.low %v2892_v55, %v2900_v56 }
 0xf3c   : > { %4519 = vmatpush1.bf16.msra.mxu1 %v7653_v6  ;;  %v2829_v6 = vld [vmem:[%s10290_s17 + $0x5b8] sm:$0xff] }
 0xf3d   : > { %4560 = vmatpush1.bf16.msra.mxu0 %v7655_v29  ;;  %4520 = vmatprep.subr.bf16.mxu1 %v7670_v30  ;;  %v2837_v29 = vld [vmem:[%s10290_s17 + $0x5f8] sm:$0xff]  ;;  %v7765_v30 = vcombine.low %v2812_v18, %v2820_v19 }
 0xf3e   : > { %4561 = vmatprep.subr.bf16.mxu0 %v7672_v63  ;;  %v7767_v63 = vcombine.low %v2813_v20, %v2821_v21  ;;  %v7784_v33 = vcombine.high %v2829_v6, %v2837_v29  ;;  %v8613_v18 = vld [vmem:[%s10299_s24 + $0x14] ss:$8 sps:$4 sm:$0xff]   ;;  %v8611_v20 = vld [vmem:[%s10299_s24 + $0x10] ss:$8 sps:$4 sm:$0xff]  }
 0xf3f   : > { %v8616_v19 = vld [vmem:[%s10299_s24 + $0x114] ss:$8 sps:$4 sm:$0xff]   ;;  %v8614_v21 = vld [vmem:[%s10299_s24 + $0x110] ss:$8 sps:$4 sm:$0xff]  }
 0xf40   : > { %4521 = vmatpush1.bf16.msra.mxu1 %v7669_v10  ;;  %v2845_v10 = vld [vmem:[%s10290_s17 + $0x638] sm:$0xff] }
 0xf41   : > { %4562 = vmatpush1.bf16.msra.mxu0 %v7671_v15  ;;  %4522 = vmatprep.subr.bf16.mxu1 %v7686_v32  ;;  %v2853_v15 = vld [vmem:[%s10290_s17 + $0x678] sm:$0xff]  ;;  %v7781_v32 = vcombine.low %v2828_v28, %v2836_v16 }
 0xf42   : > { %4563 = vmatprep.subr.bf16.mxu0 %v7688_v22  ;;  %v7783_v22 = vcombine.low %v2829_v6, %v2837_v29  ;;  %v7800_v44 = vcombine.high %v2845_v10, %v2853_v15  ;;  %v8628_v28 = vld [vmem:[%s10299_s24 + $0x134] ss:$8 sps:$4 sm:$0xff]   ;;  %v8623_v16 = vld [vmem:[%s10299_s24 + $0x30] ss:$8 sps:$4 sm:$0xff]   ;;  %v8631_v29 = vld [vmem:[%s10299_s24 + $0x44] ss:$8 sps:$4 sm:$0xff]  }
 0xf43   : > { %v8626_v6 = vld [vmem:[%s10299_s24 + $0x130] ss:$8 sps:$4 sm:$0xff]  }
 0xf44   : > { %4523 = vmatpush1.bf16.msra.mxu1 %v7685_v41  ;;  %v2861_v41 = vld [vmem:[%s10290_s17 + $0x6b8] sm:$0xff] }
 0xf45   : > { %4564 = vmatpush1.bf16.msra.mxu0 %v7687_v43  ;;  %4524 = vmatprep.subr.bf16.mxu1 %v7702_v45  ;;  %v2869_v43 = vld [vmem:[%s10290_s17 + $0x6f8] sm:$0xff]  ;;  %v7797_v45 = vcombine.low %v2844_v60, %v2852_v34 }
 0xf46   : > { %4565 = vmatprep.subr.bf16.mxu0 %v7704_v46  ;;  %v7799_v46 = vcombine.low %v2845_v10, %v2853_v15  ;;  %v7816_v48 = vcombine.high %v2861_v41, %v2869_v43  ;;  %v8637_v60 = vld [vmem:[%s10299_s24 + $0x54] ss:$8 sps:$4 sm:$0xff]   ;;  %v8635_v10 = vld [vmem:[%s10299_s24 + $0x50] ss:$8 sps:$4 sm:$0xff]  }
 0xf47   : > { %v8640_v34 = vld [vmem:[%s10299_s24 + $0x154] ss:$8 sps:$4 sm:$0xff]  }
 0xf48   : > { %4525 = vmatpush1.bf16.msra.mxu1 %v7701_v37  ;;  %v2877_v37 = vld [vmem:[%s10290_s17 + $0x738] sm:$0xff] }
 0xf49   : > { %4566 = vmatpush1.bf16.msra.mxu0 %v7703_v51  ;;  %4526 = vmatprep.subr.bf16.mxu1 %v7718_v39  ;;  %v2885_v51 = vld [vmem:[%s10290_s17 + $0x778] sm:$0xff]  ;;  %v7813_v39 = vcombine.low %v2860_v38, %v2868_v40  ;;  %v8646_v40 = vld [vmem:[%s10299_s24 + $0x164] ss:$8 sps:$4 sm:$0xff]  }
 0xf4a   : > { %4567 = vmatprep.subr.bf16.mxu0 %v7720_v52  ;;  %v7815_v52 = vcombine.low %v2861_v41, %v2869_v43  ;;  %v7832_v54 = vcombine.high %v2877_v37, %v2885_v51 }
 0xf4c   : > { %4527 = vmatpush1.bf16.msra.mxu1 %v7717_v57  ;;  %v2893_v57 = vld [vmem:[%s10290_s17 + $0x7b8] sm:$0xff] }
 0xf4d   : > { %4568 = vmatpush1.bf16.msra.mxu0 %v7719_v58  ;;  %4528 = vmatprep.subr.bf16.mxu1 %v7734_v59  ;;  %v2901_v58 = vld [vmem:[%s10290_s17 + $0x7f8] sm:$0xff]  ;;  %v7829_v59 = vcombine.low %v2876_v49, %v2884_v50  ;;  %v8641_v49 = vld [vmem:[%s10299_s24 + $0x60] ss:$8 sps:$4 sm:$0xff]   ;;  %s11399_s17 = scalar_lea.vmem [#allocation17], %s10271_s14 }
 0xf4e   : > { %4569 = vmatprep.subr.bf16.mxu0 %v7736_v61  ;;  %v7831_v61 = vcombine.low %v2877_v37, %v2885_v51  ;;  %v7848_v0 = vcombine.high %v2893_v57, %v2901_v58  ;;  %v7847_v2 = vcombine.low %v2893_v57, %v2901_v58  ;;  %v8644_v51 = vld [vmem:[%s10299_s24 + $0x160] ss:$8 sps:$4 sm:$0xff]   ;;  %v8647_v57 = vld [vmem:[%s10299_s24 + $0x70] ss:$8 sps:$4 sm:$0xff]  }
 0xf4f   : > { %v8650_v58 = vld [vmem:[%s10299_s24 + $0x170] ss:$8 sps:$4 sm:$0xff]  }
 0xf50   : > { %4529 = vmatpush1.bf16.msra.mxu1 %v7733_v3  ;;  %v8607_v3 = vld [vmem:[%s10299_s24 + $0x4] ss:$8 sps:$4 sm:$0xff]  }
 0xf51   : > { %4570 = vmatpush1.bf16.msra.mxu0 %v7735_v12  ;;  %4530 = vmatprep.subr.bf16.mxu1 %v7750_v13  ;;  %v8610_v12 = vld [vmem:[%s10299_s24 + $0x104] ss:$8 sps:$4 sm:$0xff]   ;;  %v8605_v13 = vld [vmem:[%s10299_s24] ss:$8 sps:$4 sm:$0xff]  }
 0xf52   : > { %4571 = vmatprep.subr.bf16.mxu0 %v7752_v14  ;;  %v8608_v14 = vld [vmem:[%s10299_s24 + $0x100] ss:$8 sps:$4 sm:$0xff]  }
 0xf54   : > { %4531 = vmatpush1.bf16.msra.mxu1 %v7749_v23  ;;  %v8619_v23 = vld [vmem:[%s10299_s24 + $0x24] ss:$8 sps:$4 sm:$0xff]  }
 0xf55   : > { %4572 = vmatpush1.bf16.msra.mxu0 %v7751_v7  ;;  %4532 = vmatprep.subr.bf16.mxu1 %v7766_v25  ;;  %v8622_v7 = vld [vmem:[%s10299_s24 + $0x124] ss:$8 sps:$4 sm:$0xff]   ;;  %v8617_v25 = vld [vmem:[%s10299_s24 + $0x20] ss:$8 sps:$4 sm:$0xff]  }
 0xf56   : > { %4573 = vmatprep.subr.bf16.mxu0 %v7768_v27  ;;  %v8620_v27 = vld [vmem:[%s10299_s24 + $0x120] ss:$8 sps:$4 sm:$0xff]  }
 0xf58   : > { %4533 = vmatpush1.bf16.msra.mxu1 %v7765_v30  ;;  %v8634_v30 = vld [vmem:[%s10299_s24 + $0x144] ss:$8 sps:$4 sm:$0xff]  }
 0xf59   : > { %4574 = vmatpush1.bf16.msra.mxu0 %v7767_v63  ;;  %4534 = vmatprep.subr.bf16.mxu1 %v7782_v31  ;;  %v8629_v63 = vld [vmem:[%s10299_s24 + $0x40] ss:$8 sps:$4 sm:$0xff]  }
 0xf5a   : > { %4575 = vmatprep.subr.bf16.mxu0 %v7784_v33  ;;  %v8632_v31 = vld [vmem:[%s10299_s24 + $0x140] ss:$8 sps:$4 sm:$0xff]  }
 0xf5b   : > { %v10930_v33 = vld [vmem:[%s10293_s7] sm:$0xff] }
 0xf5c   : > { %4535 = vmatpush1.bf16.msra.mxu1 %v7781_v32  ;;  %v2913_v15 = vrot.slane %v10930_v33, %v10529_v26  ;;  %v2921_v32 = vrot.slane %v10930_v33, %v10514_v17 }
 0xf5d   : > { %4576 = vmatpush1.bf16.msra.mxu0 %v7783_v22  ;;  %4536 = vmatprep.subr.bf16.mxu1 %v7798_v42  ;;  %v8638_v22 = vld [vmem:[%s10299_s24 + $0x150] ss:$8 sps:$4 sm:$0xff]   ;;  %v8643_v42 = vld [vmem:[%s10299_s24 + $0x64] ss:$8 sps:$4 sm:$0xff]  }
 0xf5e   : > { %4577 = vmatprep.subr.bf16.mxu0 %v7800_v44 }
 0xf60   : > { %4537 = vmatpush1.bf16.msra.mxu1 %v7797_v45 }
 0xf61   : > { %4578 = vmatpush1.bf16.msra.mxu0 %v7799_v46  ;;  %4538 = vmatprep.subr.bf16.mxu1 %v7814_v47 }
 0xf62   : > { %4579 = vmatprep.subr.bf16.mxu0 %v7816_v48 }
 0xf64   : > { %4539 = vmatpush1.bf16.msra.mxu1 %v7813_v39  ;;  %v8649_v39 = vld [vmem:[%s10299_s24 + $0x74] ss:$8 sps:$4 sm:$0xff]  }
 0xf65   : > { %4580 = vmatpush1.bf16.msra.mxu0 %v7815_v52  ;;  %4540 = vmatprep.subr.bf16.mxu1 %v7830_v53 }
 0xf66   : > { %4581 = vmatprep.subr.bf16.mxu0 %v7832_v54  ;;  %v8652_v54 = vld [vmem:[%s10299_s24 + $0x174] ss:$8 sps:$4 sm:$0xff]  }
 0xf68   : > { %4541 = vmatpush1.bf16.msra.mxu1 %v7829_v59  ;;  %v8655_v59 = vld [vmem:[%s10299_s24 + $0x84] ss:$8 sps:$4 sm:$0xff]  }
 0xf69   : > { %4582 = vmatpush1.bf16.msra.mxu0 %v7831_v61  ;;  %4542 = vmatprep.subr.bf16.mxu1 %v7846_v62  ;;  %v8658_v61 = vld [vmem:[%s10299_s24 + $0x184] ss:$8 sps:$4 sm:$0xff]   ;;  %v8653_v62 = vld [vmem:[%s10299_s24 + $0x80] ss:$8 sps:$4 sm:$0xff]  }
 0xf6a   : > { %4583 = vmatprep.subr.bf16.mxu0 %v7848_v0  ;;  %v8656_v0 = vld [vmem:[%s10299_s24 + $0x180] ss:$8 sps:$4 sm:$0xff]  }
 0xf6c   : > { %4543 = vmatpush1.bf16.msra.mxu1 %v7845_v1  ;;  %v8661_v1 = vld [vmem:[%s10299_s24 + $0x94] ss:$8 sps:$4 sm:$0xff]  }
 0xf6d   : > { %4584 = vmatpush1.bf16.msra.mxu0 %v7847_v2  ;;  %6174 = vmatprep.subr.bf16.mxu1 %v8607_v3  ;;  %v8664_v2 = vld [vmem:[%s10299_s24 + $0x194] ss:$8 sps:$4 sm:$0xff]   ;;  %v8659_v3 = vld [vmem:[%s10299_s24 + $0x90] ss:$8 sps:$4 sm:$0xff]  }
 0xf6e   : > { %6215 = vmatprep.subr.bf16.mxu0 %v8610_v12  ;;  %v8662_v12 = vld [vmem:[%s10299_s24 + $0x190] ss:$8 sps:$4 sm:$0xff]  }
 0xf6f   : > { %4545 = vmatmul.mubr.bf16.vlgmr.msra.gmra.mrb[56].mxu1 %v10703_v4 }
 0xf70   : > { %4586 = vmatmul.mubr.bf16.vlgmr.msra.gmra.mrb[28].mxu0 %v10703_v4  ;;  %6175 = vmatpush1.bf16.msra.mxu1 %v8605_v13  ;;  %v8625_v4 = vld [vmem:[%s10299_s24 + $0x34] ss:$8 sps:$4 sm:$0xff]   ;;  %v8667_v13 = vld [vmem:[%s10299_s24 + $0xa4] ss:$8 sps:$4 sm:$0xff]  }
 0xf71   : > { %6216 = vmatpush1.bf16.msra.mxu0 %v8608_v14  ;;  %6176 = vmatprep.subr.bf16.mxu1 %v8613_v18  ;;  %v8670_v14 = vld [vmem:[%s10299_s24 + $0x1a4] ss:$8 sps:$4 sm:$0xff]   ;;  %v8665_v18 = vld [vmem:[%s10299_s24 + $0xa0] ss:$8 sps:$4 sm:$0xff]  }
 0xf72   : > { %6217 = vmatprep.subr.bf16.mxu0 %v8616_v19  ;;  %v8668_v19 = vld [vmem:[%s10299_s24 + $0x1a0] ss:$8 sps:$4 sm:$0xff]  }
 0xf74   : > { %6177 = vmatpush1.bf16.msra.mxu1 %v8611_v20  ;;  %v8673_v20 = vld [vmem:[%s10299_s24 + $0xb4] ss:$8 sps:$4 sm:$0xff]  }
 0xf75   : > { %6218 = vmatpush1.bf16.msra.mxu0 %v8614_v21  ;;  %6178 = vmatprep.subr.bf16.mxu1 %v8619_v23  ;;  %v8676_v21 = vld [vmem:[%s10299_s24 + $0x1b4] ss:$8 sps:$4 sm:$0xff]   ;;  %v8671_v23 = vld [vmem:[%s10299_s24 + $0xb0] ss:$8 sps:$4 sm:$0xff]  }
 0xf76   : > { %6219 = vmatprep.subr.bf16.mxu0 %v8622_v7  ;;  %v8674_v7 = vld [vmem:[%s10299_s24 + $0x1b0] ss:$8 sps:$4 sm:$0xff]  }
 0xf78   : > { %6179 = vmatpush1.bf16.msra.mxu1 %v8617_v25  ;;  %v8679_v25 = vld [vmem:[%s10299_s24 + $0xc4] ss:$8 sps:$4 sm:$0xff]  }
 0xf79   : > { %6220 = vmatpush1.bf16.msra.mxu0 %v8620_v27  ;;  %6180 = vmatprep.subr.bf16.mxu1 %v8625_v4  ;;  %v8682_v27 = vld [vmem:[%s10299_s24 + $0x1c4] ss:$8 sps:$4 sm:$0xff]   ;;  %v8677_v4 = vld [vmem:[%s10299_s24 + $0xc0] ss:$8 sps:$4 sm:$0xff]  }
 0xf7a   : > { %6221 = vmatprep.subr.bf16.mxu0 %v8628_v28  ;;  %v8680_v28 = vld [vmem:[%s10299_s24 + $0x1c0] ss:$8 sps:$4 sm:$0xff]  }
 0xf7c   : > { %6181 = vmatpush1.bf16.msra.mxu1 %v8623_v16  ;;  %v8685_v16 = vld [vmem:[%s10299_s24 + $0xd4] ss:$8 sps:$4 sm:$0xff]  }
 0xf7d   : > { %6222 = vmatpush1.bf16.msra.mxu0 %v8626_v6  ;;  %6182 = vmatprep.subr.bf16.mxu1 %v8631_v29  ;;  %v8688_v6 = vld [vmem:[%s10299_s24 + $0x1d4] ss:$8 sps:$4 sm:$0xff]   ;;  %v8683_v29 = vld [vmem:[%s10299_s24 + $0xd0] ss:$8 sps:$4 sm:$0xff]  }
 0xf7e   : > { %6223 = vmatprep.subr.bf16.mxu0 %v8634_v30  ;;  %v2909_v30 = vrot.slane %v10930_v33, %v10413_v11 }
 0xf80   : > { %6183 = vmatpush1.bf16.msra.mxu1 %v8629_v63  ;;  %v8686_v63 = vld [vmem:[%s10299_s24 + $0x1d0] ss:$8 sps:$4 sm:$0xff]  }
 0xf81   : > { %6224 = vmatpush1.bf16.msra.mxu0 %v8632_v31  ;;  %6184 = vmatprep.subr.bf16.mxu1 %v8637_v60  ;;  %v8691_v31 = vld [vmem:[%s10299_s24 + $0xe4] ss:$8 sps:$4 sm:$0xff]   ;;  %v2917_v60 = vrot.slane %v10930_v33, %v10407_v9 }
 0xf82   : > { %v10941_v44 = vpop.f32.mrb[44].mxu1  ;;  %v10943_v38 = vpop.f32.mrb[16].mxu0  ;;  %6225 = vmatprep.subr.bf16.mxu0 %v8640_v34  ;;  %v8694_v34 = vld [vmem:[%s10299_s24 + $0x1e4] ss:$8 sps:$4 sm:$0xff]  }
 0xf83   : > { %v4302_v41 = vpop.f32.mrb[45].mxu1  ;;  %v4343_v43 = vpop.f32.mrb[17].mxu0 }
 0xf84   : > { %v4303_v45 = vadd.f32 %v4302_v41, %v2913_v15  ;;  %v4344_v46 = vadd.f32 %v4343_v43, %v2921_v32  ;;  %6185 = vmatpush1.bf16.msra.mxu1 %v8635_v10  ;;  %v4304_v47 = vpop.f32.mrb[46].mxu1  ;;  %v4345_v48 = vpop.f32.mrb[18].mxu0  ;;  %v8689_v10 = vld [vmem:[%s10299_s24 + $0xe0] ss:$8 sps:$4 sm:$0xff]   ;;  %v4301_v15 = vadd.f32 %v10941_v44, %v2909_v30  ;;  %v8695_v41 = vld [vmem:[%s10299_s24 + $0xf0] ss:$8 sps:$4 sm:$0xff]  }
 0xf85   : > { %6226 = vmatpush1.bf16.msra.mxu0 %v8638_v22  ;;  %v4305_v50 = vpop.f32.mrb[47].mxu1  ;;  %v4346_v37 = vpop.f32.mrb[19].mxu0  ;;  %6186 = vmatprep.subr.bf16.mxu1 %v8643_v42  ;;  %v8692_v32 = vld [vmem:[%s10299_s24 + $0x1e0] ss:$8 sps:$4 sm:$0xff]   ;;  %v8697_v22 = vld [vmem:[%s10299_s24 + $0xf4] ss:$8 sps:$4 sm:$0xff]   ;;  %v4342_v42 = vadd.f32 %v10943_v38, %v2917_v60 }
 0xf86   : > { %v4595_v52 = vmax.f32 %v4303_v45, 0.0  ;;  %v4597_v53 = vmax.f32 %v4344_v46, 0.0  ;;  %6227 = vmatprep.subr.bf16.mxu0 %v8646_v40  ;;  %v8700_v40 = vld [vmem:[%s10299_s24 + $0x1f4] ss:$8 sps:$4 sm:$0xff]   ;;  %v4594_v43 = vmax.f32 %v4301_v15, 0.0 }
 0xf87   : > { %v8698_v45 = vld [vmem:[%s10299_s24 + $0x1f0] ss:$8 sps:$4 sm:$0xff]   ;;  %v8703_v44 = vld [vmem:[%s10299_s24 + $0x204] ss:$8 sps:$4 sm:$0xff]   ;;  %v4596_v46 = vmax.f32 %v4342_v42, 0.0 }
 0xf88   : > { %v4611_v55 = vpack.c.bf16 %v4595_v52, %v4595_v52  ;;  %v4613_v56 = vpack.c.bf16 %v4597_v53, %v4597_v53  ;;  %6187 = vmatpush1.bf16.msra.mxu1 %v8641_v49  ;;  %v8706_v47 = vld [vmem:[%s10299_s24 + $0x304] ss:$8 sps:$4 sm:$0xff]   ;;  %v8701_v48 = vld [vmem:[%s10299_s24 + $0x200] ss:$8 sps:$4 sm:$0xff]   ;;  %v4610_v38 = vpack.c.bf16 %v4594_v43, %v4594_v43  ;;  %v8709_v50 = vld [vmem:[%s10299_s24 + $0x214] ss:$8 sps:$4 sm:$0xff]  }
 0xf89   : > { %6228 = vmatpush1.bf16.msra.mxu0 %v8644_v51  ;;  %6188 = vmatprep.subr.bf16.mxu1 %v8649_v39  ;;  %v8704_v49 = vld [vmem:[%s10299_s24 + $0x300] ss:$8 sps:$4 sm:$0xff]   ;;  %v4612_v37 = vpack.c.bf16 %v4596_v46, %v4596_v46  ;;  %v8712_v51 = vld [vmem:[%s10299_s24 + $0x314] ss:$8 sps:$4 sm:$0xff]   ;;  %v8707_v39 = vld [vmem:[%s10299_s24 + $0x210] ss:$8 sps:$4 sm:$0xff]  }
 0xf8a   : > { %6206 = vmatprep.mubr.bf16.mxu1 %v4611_v55  ;;  %6229 = vmatprep.subr.bf16.mxu0 %v8652_v54  ;;  %v8710_v52 = vld [vmem:[%s10299_s24 + $0x310] ss:$8 sps:$4 sm:$0xff]   ;;  %v8715_v53 = vld [vmem:[%s10299_s24 + $0x224] ss:$8 sps:$4 sm:$0xff]   ;;  %v8713_v55 = vld [vmem:[%s10299_s24 + $0x220] ss:$8 sps:$4 sm:$0xff]  }
 0xf8b   : > { %6247 = vmatprep.mubr.bf16.mxu0 %v4613_v56  ;;  %v8718_v54 = vld [vmem:[%s10299_s24 + $0x324] ss:$8 sps:$4 sm:$0xff]   ;;  %v8716_v56 = vld [vmem:[%s10299_s24 + $0x320] ss:$8 sps:$4 sm:$0xff]  }
 0xf8c   : > { %6189 = vmatpush1.bf16.msra.mxu1 %v8647_v57  ;;  %v8721_v57 = vld [vmem:[%s10299_s24 + $0x234] ss:$8 sps:$4 sm:$0xff]   ;;  %v8737_v30 = vld [vmem:[%s10299_s24 + $0x260] ss:$8 sps:$4 sm:$0xff]   ;;  %v8751_v43 = vld [vmem:[%s10299_s24 + $0x284] ss:$8 sps:$4 sm:$0xff]  }
 0xf8d   : > { %6230 = vmatpush1.bf16.msra.mxu0 %v8650_v58  ;;  %6190 = vmatprep.subr.bf16.mxu1 %v8655_v59  ;;  %v8724_v58 = vld [vmem:[%s10299_s24 + $0x334] ss:$8 sps:$4 sm:$0xff]   ;;  %v8719_v59 = vld [vmem:[%s10299_s24 + $0x230] ss:$8 sps:$4 sm:$0xff]   ;;  %v8740_v60 = vld [vmem:[%s10299_s24 + $0x360] ss:$8 sps:$4 sm:$0xff]  }
 0xf8e   : > { %6231 = vmatprep.subr.bf16.mxu0 %v8658_v61  ;;  %v8722_v61 = vld [vmem:[%s10299_s24 + $0x330] ss:$8 sps:$4 sm:$0xff]   ;;  %v8752_v46 = vld [vmem:[%s10299_s24 + $0x380] ss:$8 sps:$4 sm:$0xff]  }
 0xf90   : > { %6191 = vmatpush1.bf16.msra.mxu1 %v8653_v62  ;;  %v8727_v62 = vld [vmem:[%s10299_s24 + $0x244] ss:$8 sps:$4 sm:$0xff]  }
 0xf91   : > { %6232 = vmatpush1.bf16.msra.mxu0 %v8656_v0  ;;  %6192 = vmatprep.subr.bf16.mxu1 %v8661_v1  ;;  %v8730_v0 = vld [vmem:[%s10299_s24 + $0x344] ss:$8 sps:$4 sm:$0xff]   ;;  %v8725_v1 = vld [vmem:[%s10299_s24 + $0x240] ss:$8 sps:$4 sm:$0xff]  }
 0xf92   : > { %6233 = vmatprep.subr.bf16.mxu0 %v8664_v2  ;;  %v2936_v2 = vsub.s32 7, %v10404_v8 }
 0xf94   : > { %6193 = vmatpush1.bf16.msra.mxu1 %v8659_v3  ;;  %v8728_v3 = vld [vmem:[%s10299_s24 + $0x340] ss:$8 sps:$4 sm:$0xff]  }
 0xf95   : > { %6234 = vmatpush1.bf16.msra.mxu0 %v8662_v12  ;;  %6194 = vmatprep.subr.bf16.mxu1 %v8667_v13  ;;  %v8733_v12 = vld [vmem:[%s10299_s24 + $0x254] ss:$8 sps:$4 sm:$0xff]  }
 0xf96   : > { %6235 = vmatprep.subr.bf16.mxu0 %v8670_v14  ;;  %v8736_v13 = vld [vmem:[%s10299_s24 + $0x354] ss:$8 sps:$4 sm:$0xff]   ;;  %v2929_v14 = vrot.slane %v10930_v33, %v10523_v24 }
 0xf98   : > { %6195 = vmatpush1.bf16.msra.mxu1 %v8665_v18  ;;  %v2937_v18 = vrot.slane %v10930_v33, %v2936_v2 }
 0xf99   : > { %6236 = vmatpush1.bf16.msra.mxu0 %v8668_v19  ;;  %6196 = vmatprep.subr.bf16.mxu1 %v8673_v20  ;;  %v8731_v19 = vld [vmem:[%s10299_s24 + $0x250] ss:$8 sps:$4 sm:$0xff]  }
 0xf9a   : > { %6237 = vmatprep.subr.bf16.mxu0 %v8676_v21  ;;  %v8734_v20 = vld [vmem:[%s10299_s24 + $0x350] ss:$8 sps:$4 sm:$0xff]   ;;  %v8739_v21 = vld [vmem:[%s10299_s24 + $0x264] ss:$8 sps:$4 sm:$0xff]  }
 0xf9c   : > { %6197 = vmatpush1.bf16.msra.mxu1 %v8671_v23 }
 0xf9d   : > { %6238 = vmatpush1.bf16.msra.mxu0 %v8674_v7  ;;  %6198 = vmatprep.subr.bf16.mxu1 %v8679_v25  ;;  %v8742_v25 = vld [vmem:[%s10299_s24 + $0x364] ss:$8 sps:$4 sm:$0xff]  }
 0xf9e   : > { %6239 = vmatprep.subr.bf16.mxu0 %v8682_v27 }
 0xfa0   : > { %6199 = vmatpush1.bf16.msra.mxu1 %v8677_v4 }
 0xfa1   : > { %6240 = vmatpush1.bf16.msra.mxu0 %v8680_v28  ;;  %6200 = vmatprep.subr.bf16.mxu1 %v8685_v16 }
 0xfa2   : > { %6241 = vmatprep.subr.bf16.mxu0 %v8688_v6 }
 0xfa4   : > { %6201 = vmatpush1.bf16.msra.mxu1 %v8683_v29 }
 0xfa5   : > { %6242 = vmatpush1.bf16.msra.mxu0 %v8686_v63  ;;  %6202 = vmatprep.subr.bf16.mxu1 %v8691_v31 }
 0xfa6   : > { %6243 = vmatprep.subr.bf16.mxu0 %v8694_v34  ;;  %v8745_v34 = vld [vmem:[%s10299_s24 + $0x274] ss:$8 sps:$4 sm:$0xff]  }
 0xfa8   : > { %6203 = vmatpush1.bf16.msra.mxu1 %v8689_v10 }
 0xfa9   : > { %6244 = vmatpush1.bf16.msra.mxu0 %v8692_v32  ;;  %6204 = vmatprep.subr.bf16.mxu1 %v8697_v22  ;;  %v8748_v32 = vld [vmem:[%s10299_s24 + $0x374] ss:$8 sps:$4 sm:$0xff]  }
 0xfaa   : > { %6245 = vmatprep.subr.bf16.mxu0 %v8700_v40  ;;  %v8743_v40 = vld [vmem:[%s10299_s24 + $0x270] ss:$8 sps:$4 sm:$0xff]  }
 0xfac   : > { %6205 = vmatpush1.bf16.msra.mxu1 %v8695_v41  ;;  %v8746_v41 = vld [vmem:[%s10299_s24 + $0x370] ss:$8 sps:$4 sm:$0xff]  }
 0xfad   : > { %6246 = vmatpush1.bf16.msra.mxu0 %v8698_v45  ;;  %6256 = vmatprep.subr.bf16.mxu1 %v8703_v44  ;;  %v8754_v45 = vld [vmem:[%s10299_s24 + $0x384] ss:$8 sps:$4 sm:$0xff]   ;;  %v8749_v44 = vld [vmem:[%s10299_s24 + $0x280] ss:$8 sps:$4 sm:$0xff]  }
 0xfae   : > { %6297 = vmatprep.subr.bf16.mxu0 %v8706_v47  ;;  %v8757_v47 = vld [vmem:[%s10299_s24 + $0x294] ss:$8 sps:$4 sm:$0xff]  }
 0xfaf   : > { %6207 = vmatmul.mubr.bf16.vlgmr.msra.gmra.mrb[60].mxu1 %v4610_v38  ;;  %v8755_v38 = vld [vmem:[%s10299_s24 + $0x290] ss:$8 sps:$4 sm:$0xff]  }
 0xfb0   : > { %6248 = vmatmul.mubr.bf16.vlgmr.msra.gmra.mrb[32].mxu0 %v4612_v37  ;;  %6257 = vmatpush1.bf16.msra.mxu1 %v8701_v48  ;;  %v8760_v48 = vld [vmem:[%s10299_s24 + $0x394] ss:$8 sps:$4 sm:$0xff]   ;;  %v8766_v37 = vld [vmem:[%s10299_s24 + $0x3a4] ss:$8 sps:$4 sm:$0xff]  }
 0xfb1   : > { %6298 = vmatpush1.bf16.msra.mxu0 %v8704_v49  ;;  %6258 = vmatprep.subr.bf16.mxu1 %v8709_v50  ;;  %v8758_v49 = vld [vmem:[%s10299_s24 + $0x390] ss:$8 sps:$4 sm:$0xff]   ;;  %v8763_v50 = vld [vmem:[%s10299_s24 + $0x2a4] ss:$8 sps:$4 sm:$0xff]  }
 0xfb2   : > { %6299 = vmatprep.subr.bf16.mxu0 %v8712_v51  ;;  %v8761_v51 = vld [vmem:[%s10299_s24 + $0x2a0] ss:$8 sps:$4 sm:$0xff]  }
 0xfb4   : > { %6259 = vmatpush1.bf16.msra.mxu1 %v8707_v39  ;;  %v8764_v39 = vld [vmem:[%s10299_s24 + $0x3a0] ss:$8 sps:$4 sm:$0xff]  }
 0xfb5   : > { %6300 = vmatpush1.bf16.msra.mxu0 %v8710_v52  ;;  %6260 = vmatprep.subr.bf16.mxu1 %v8715_v53  ;;  %v8769_v52 = vld [vmem:[%s10299_s24 + $0x2b4] ss:$8 sps:$4 sm:$0xff]  }
 0xfb6   : > { %6301 = vmatprep.subr.bf16.mxu0 %v8718_v54  ;;  %v8772_v53 = vld [vmem:[%s10299_s24 + $0x3b4] ss:$8 sps:$4 sm:$0xff]   ;;  %v8767_v54 = vld [vmem:[%s10299_s24 + $0x2b0] ss:$8 sps:$4 sm:$0xff]  }
 0xfb8   : > { %6261 = vmatpush1.bf16.msra.mxu1 %v8713_v55  ;;  %v8770_v55 = vld [vmem:[%s10299_s24 + $0x3b0] ss:$8 sps:$4 sm:$0xff]  }
 0xfb9   : > { %6302 = vmatpush1.bf16.msra.mxu0 %v8716_v56  ;;  %6262 = vmatprep.subr.bf16.mxu1 %v8721_v57  ;;  %v8775_v56 = vld [vmem:[%s10299_s24 + $0x2c4] ss:$8 sps:$4 sm:$0xff]  }
 0xfba   : > { %6303 = vmatprep.subr.bf16.mxu0 %v8724_v58  ;;  %v8778_v57 = vld [vmem:[%s10299_s24 + $0x3c4] ss:$8 sps:$4 sm:$0xff]   ;;  %v8773_v58 = vld [vmem:[%s10299_s24 + $0x2c0] ss:$8 sps:$4 sm:$0xff]  }
 0xfbc   : > { %6263 = vmatpush1.bf16.msra.mxu1 %v8719_v59  ;;  %v8776_v59 = vld [vmem:[%s10299_s24 + $0x3c0] ss:$8 sps:$4 sm:$0xff]  }
 0xfbd   : > { %6304 = vmatpush1.bf16.msra.mxu0 %v8722_v61  ;;  %6264 = vmatprep.subr.bf16.mxu1 %v8727_v62  ;;  %v8781_v61 = vld [vmem:[%s10299_s24 + $0x2d4] ss:$8 sps:$4 sm:$0xff]   ;;  %v2932_v62 = vsub.s32 6, %v10404_v8  ;;  %v8983_v8 = vld [vmem:[%s10299_s24 + $0x6f0] ss:$8 sps:$4 sm:$0xff]  }
 0xfbe   : > { %6305 = vmatprep.subr.bf16.mxu0 %v8730_v0  ;;  %v8784_v0 = vld [vmem:[%s10299_s24 + $0x3d4] ss:$8 sps:$4 sm:$0xff]  }
 0xfc0   : > { %6265 = vmatpush1.bf16.msra.mxu1 %v8725_v1  ;;  %v8779_v1 = vld [vmem:[%s10299_s24 + $0x2d0] ss:$8 sps:$4 sm:$0xff]  }
 0xfc1   : > { %6306 = vmatpush1.bf16.msra.mxu0 %v8728_v3  ;;  %6266 = vmatprep.subr.bf16.mxu1 %v8733_v12  ;;  %v2925_v3 = vrot.slane %v10930_v33, %v10471_v5  ;;  %v8782_v12 = vld [vmem:[%s10299_s24 + $0x3d0] ss:$8 sps:$4 sm:$0xff]  }
 0xfc2   : > { %v11021_v23 = vpop.f32.mrb[48].mxu1  ;;  %v11023_v7 = vpop.f32.mrb[20].mxu0  ;;  %6307 = vmatprep.subr.bf16.mxu0 %v8736_v13  ;;  %v8787_v13 = vld [vmem:[%s10299_s24 + $0x2e4] ss:$8 sps:$4 sm:$0xff]  }
 0xfc3   : > { %v4384_v27 = vpop.f32.mrb[49].mxu1  ;;  %v4425_v4 = vpop.f32.mrb[21].mxu0 }
 0xfc4   : > { %v4385_v28 = vadd.f32 %v4384_v27, %v2929_v14  ;;  %v4426_v16 = vadd.f32 %v4425_v4, %v2937_v18  ;;  %v4386_v6 = vpop.f32.mrb[50].mxu1  ;;  %v4427_v29 = vpop.f32.mrb[22].mxu0  ;;  %6267 = vmatpush1.bf16.msra.mxu1 %v8731_v19  ;;  %v2933_v14 = vrot.slane %v10930_v33, %v2932_v62  ;;  %v8790_v18 = vld [vmem:[%s10299_s24 + $0x3e4] ss:$8 sps:$4 sm:$0xff]   ;;  %v8785_v19 = vld [vmem:[%s10299_s24 + $0x2e0] ss:$8 sps:$4 sm:$0xff]  }
 0xfc5   : > { %6308 = vmatpush1.bf16.msra.mxu0 %v8734_v20  ;;  %v4387_v63 = vpop.f32.mrb[51].mxu1  ;;  %v4428_v31 = vpop.f32.mrb[23].mxu0  ;;  %6268 = vmatprep.subr.bf16.mxu1 %v8739_v21  ;;  %v4383_v20 = vadd.f32 %v11021_v23, %v2925_v3  ;;  %v8788_v21 = vld [vmem:[%s10299_s24 + $0x3e0] ss:$8 sps:$4 sm:$0xff]   ;;  %v8796_v4 = vld [vmem:[%s10299_s24 + $0x3f4] ss:$8 sps:$4 sm:$0xff]  }
 0xfc6   : > { %v4599_v10 = vmax.f32 %v4385_v28, 0.0  ;;  %v4601_v15 = vmax.f32 %v4426_v16, 0.0  ;;  %6309 = vmatprep.subr.bf16.mxu0 %v8742_v25  ;;  %v8793_v25 = vld [vmem:[%s10299_s24 + $0x2f4] ss:$8 sps:$4 sm:$0xff]   ;;  %v4424_v27 = vadd.f32 %v11023_v7, %v2933_v14  ;;  %v8791_v33 = vld [vmem:[%s10299_s24 + $0x2f0] ss:$8 sps:$4 sm:$0xff]  }
 0xfc7   : > { %v4598_v28 = vmax.f32 %v4383_v20, 0.0  ;;  %v8794_v16 = vld [vmem:[%s10299_s24 + $0x3f0] ss:$8 sps:$4 sm:$0xff]   ;;  %v8799_v23 = vld [vmem:[%s10299_s24 + $0x404] ss:$8 sps:$4 sm:$0xff]  }
 0xfc8   : > { %v4615_v22 = vpack.c.bf16 %v4599_v10, %v4599_v10  ;;  %v4617_v42 = vpack.c.bf16 %v4601_v15, %v4601_v15  ;;  %6269 = vmatpush1.bf16.msra.mxu1 %v8737_v30  ;;  %v4600_v6 = vmax.f32 %v4424_v27, 0.0  ;;  %v8802_v29 = vld [vmem:[%s10299_s24 + $0x504] ss:$8 sps:$4 sm:$0xff]   ;;  %v8797_v30 = vld [vmem:[%s10299_s24 + $0x400] ss:$8 sps:$4 sm:$0xff]  }
 0xfc9   : > { %6310 = vmatpush1.bf16.msra.mxu0 %v8740_v60  ;;  %6270 = vmatprep.subr.bf16.mxu1 %v8745_v34  ;;  %v4614_v7 = vpack.c.bf16 %v4598_v28, %v4598_v28  ;;  %v8800_v63 = vld [vmem:[%s10299_s24 + $0x500] ss:$8 sps:$4 sm:$0xff]   ;;  %v8805_v31 = vld [vmem:[%s10299_s24 + $0x414] ss:$8 sps:$4 sm:$0xff]   ;;  %v8803_v10 = vld [vmem:[%s10299_s24 + $0x410] ss:$8 sps:$4 sm:$0xff]  }
 0xfca   : > { %6288 = vmatprep.mubr.bf16.mxu1 %v4615_v22  ;;  %6329 = vmatprep.mubr.bf16.mxu0 %v4617_v42  ;;  %v4616_v60 = vpack.c.bf16 %v4600_v6, %v4600_v6  ;;  %v8808_v34 = vld [vmem:[%s10299_s24 + $0x514] ss:$8 sps:$4 sm:$0xff]   ;;  %v8806_v15 = vld [vmem:[%s10299_s24 + $0x510] ss:$8 sps:$4 sm:$0xff]   ;;  %v8814_v22 = vld [vmem:[%s10299_s24 + $0x524] ss:$8 sps:$4 sm:$0xff]  }
 0xfcb   : > { %6311 = vmatprep.subr.bf16.mxu0 %v8748_v32  ;;  %v8811_v32 = vld [vmem:[%s10299_s24 + $0x424] ss:$8 sps:$4 sm:$0xff]   ;;  %v8809_v42 = vld [vmem:[%s10299_s24 + $0x420] ss:$8 sps:$4 sm:$0xff]   ;;  %v8842_v28 = vld [vmem:[%s10299_s24 + $0x570] ss:$8 sps:$4 sm:$0xff]  }
 0xfcc   : > { %6271 = vmatpush1.bf16.msra.mxu1 %v8743_v40  ;;  %v8812_v40 = vld [vmem:[%s10299_s24 + $0x520] ss:$8 sps:$4 sm:$0xff]  }
 0xfcd   : > { %6312 = vmatpush1.bf16.msra.mxu0 %v8746_v41  ;;  %6272 = vmatprep.subr.bf16.mxu1 %v8751_v43  ;;  %v8817_v41 = vld [vmem:[%s10299_s24 + $0x434] ss:$8 sps:$4 sm:$0xff]   ;;  %v8836_v14 = vld [vmem:[%s10299_s24 + $0x560] ss:$8 sps:$4 sm:$0xff]  }
 0xfce   : > { %6313 = vmatprep.subr.bf16.mxu0 %v8754_v45  ;;  %v8820_v43 = vld [vmem:[%s10299_s24 + $0x534] ss:$8 sps:$4 sm:$0xff]   ;;  %v8815_v45 = vld [vmem:[%s10299_s24 + $0x430] ss:$8 sps:$4 sm:$0xff]   ;;  %v8845_v6 = vld [vmem:[%s10299_s24 + $0x480] ss:$8 sps:$4 sm:$0xff]  }
 0xfd0   : > { %6273 = vmatpush1.bf16.msra.mxu1 %v8749_v44  ;;  %v8818_v44 = vld [vmem:[%s10299_s24 + $0x530] ss:$8 sps:$4 sm:$0xff]  }
 0xfd1   : > { %6314 = vmatpush1.bf16.msra.mxu0 %v8752_v46  ;;  %6274 = vmatprep.subr.bf16.mxu1 %v8757_v47  ;;  %v8823_v46 = vld [vmem:[%s10299_s24 + $0x444] ss:$8 sps:$4 sm:$0xff]  }
 0xfd2   : > { %6315 = vmatprep.subr.bf16.mxu0 %v8760_v48  ;;  %v8826_v47 = vld [vmem:[%s10299_s24 + $0x544] ss:$8 sps:$4 sm:$0xff]   ;;  %v8821_v48 = vld [vmem:[%s10299_s24 + $0x440] ss:$8 sps:$4 sm:$0xff]  }
 0xfd4   : > { %6275 = vmatpush1.bf16.msra.mxu1 %v8755_v38  ;;  %v8824_v38 = vld [vmem:[%s10299_s24 + $0x540] ss:$8 sps:$4 sm:$0xff]  }
 0xfd5   : > { %6316 = vmatpush1.bf16.msra.mxu0 %v8758_v49  ;;  %6276 = vmatprep.subr.bf16.mxu1 %v8763_v50  ;;  %v11093_v49 = vld [vmem:[%s10293_s7 + $0x8] sm:$0xff]  ;;  %s11400_s7 = scalar_lea.vmem [#allocation19], %s10271_s14 }
 0xfd6   : > { %6317 = vmatprep.subr.bf16.mxu0 %v8766_v37  ;;  %v8829_v50 = vld [vmem:[%s10299_s24 + $0x454] ss:$8 sps:$4 sm:$0xff]  }
 0xfd7   : > { %v8832_v37 = vld [vmem:[%s10299_s24 + $0x554] ss:$8 sps:$4 sm:$0xff]  }
 0xfd8   : > { %6277 = vmatpush1.bf16.msra.mxu1 %v8761_v51  ;;  %v2945_v51 = vrot.slane %v11093_v49, %v10529_v26 }
 0xfd9   : > { %6318 = vmatpush1.bf16.msra.mxu0 %v8764_v39  ;;  %6278 = vmatprep.subr.bf16.mxu1 %v8769_v52  ;;  %v8827_v39 = vld [vmem:[%s10299_s24 + $0x450] ss:$8 sps:$4 sm:$0xff]   ;;  %v2953_v52 = vrot.slane %v11093_v49, %v10514_v17 }
 0xfda   : > { %6319 = vmatprep.subr.bf16.mxu0 %v8772_v53  ;;  %v8830_v53 = vld [vmem:[%s10299_s24 + $0x550] ss:$8 sps:$4 sm:$0xff]  }
 0xfdc   : > { %6279 = vmatpush1.bf16.msra.mxu1 %v8767_v54  ;;  %v8835_v54 = vld [vmem:[%s10299_s24 + $0x464] ss:$8 sps:$4 sm:$0xff]  }
 0xfdd   : > { %6320 = vmatpush1.bf16.msra.mxu0 %v8770_v55  ;;  %6280 = vmatprep.subr.bf16.mxu1 %v8775_v56  ;;  %v8838_v56 = vld [vmem:[%s10299_s24 + $0x564] ss:$8 sps:$4 sm:$0xff]  }
 0xfde   : > { %6321 = vmatprep.subr.bf16.mxu0 %v8778_v57 }
 0xfe0   : > { %6281 = vmatpush1.bf16.msra.mxu1 %v8773_v58 }
 0xfe1   : > { %6322 = vmatpush1.bf16.msra.mxu0 %v8776_v59  ;;  %6282 = vmatprep.subr.bf16.mxu1 %v8781_v61 }
 0xfe2   : > { %6323 = vmatprep.subr.bf16.mxu0 %v8784_v0 }
 0xfe4   : > { %6283 = vmatpush1.bf16.msra.mxu1 %v8779_v1  ;;  %v8833_v1 = vld [vmem:[%s10299_s24 + $0x460] ss:$8 sps:$4 sm:$0xff]  }
 0xfe5   : > { %6324 = vmatpush1.bf16.msra.mxu0 %v8782_v12  ;;  %6284 = vmatprep.subr.bf16.mxu1 %v8787_v13 }
 0xfe6   : > { %6325 = vmatprep.subr.bf16.mxu0 %v8790_v18  ;;  %v8841_v18 = vld [vmem:[%s10299_s24 + $0x474] ss:$8 sps:$4 sm:$0xff]  }
 0xfe8   : > { %6285 = vmatpush1.bf16.msra.mxu1 %v8785_v19 }
 0xfe9   : > { %6326 = vmatpush1.bf16.msra.mxu0 %v8788_v21  ;;  %6286 = vmatprep.subr.bf16.mxu1 %v8793_v25  ;;  %v8844_v21 = vld [vmem:[%s10299_s24 + $0x574] ss:$8 sps:$4 sm:$0xff]  }
 0xfea   : > { %6327 = vmatprep.subr.bf16.mxu0 %v8796_v4  ;;  %v8839_v4 = vld [vmem:[%s10299_s24 + $0x470] ss:$8 sps:$4 sm:$0xff]  }
 0xfec   : > { %6287 = vmatpush1.bf16.msra.mxu1 %v8791_v33 }
 0xfed   : > { %6328 = vmatpush1.bf16.msra.mxu0 %v8794_v16  ;;  %6338 = vmatprep.subr.bf16.mxu1 %v8799_v23  ;;  %v8847_v16 = vld [vmem:[%s10299_s24 + $0x484] ss:$8 sps:$4 sm:$0xff]  }
 0xfee   : > { %6379 = vmatprep.subr.bf16.mxu0 %v8802_v29  ;;  %v8850_v23 = vld [vmem:[%s10299_s24 + $0x584] ss:$8 sps:$4 sm:$0xff]   ;;  %v8848_v29 = vld [vmem:[%s10299_s24 + $0x580] ss:$8 sps:$4 sm:$0xff]  }
 0xfef   : > { %6289 = vmatmul.mubr.bf16.vlgmr.msra.gmra.mrb[64].mxu1 %v4614_v7  ;;  %v8856_v7 = vld [vmem:[%s10299_s24 + $0x594] ss:$8 sps:$4 sm:$0xff]  }
 0xff0   : > { %6330 = vmatmul.mubr.bf16.vlgmr.msra.gmra.mrb[36].mxu0 %v4616_v60  ;;  %6339 = vmatpush1.bf16.msra.mxu1 %v8797_v30  ;;  %v8853_v30 = vld [vmem:[%s10299_s24 + $0x494] ss:$8 sps:$4 sm:$0xff]   ;;  %v8859_v60 = vld [vmem:[%s10299_s24 + $0x4a4] ss:$8 sps:$4 sm:$0xff]  }
 0xff1   : > { %6380 = vmatpush1.bf16.msra.mxu0 %v8800_v63  ;;  %6340 = vmatprep.subr.bf16.mxu1 %v8805_v31  ;;  %v8851_v63 = vld [vmem:[%s10299_s24 + $0x490] ss:$8 sps:$4 sm:$0xff]  }
 0xff2   : > { %6381 = vmatprep.subr.bf16.mxu0 %v8808_v34  ;;  %v8854_v31 = vld [vmem:[%s10299_s24 + $0x590] ss:$8 sps:$4 sm:$0xff]   ;;  %v8862_v34 = vld [vmem:[%s10299_s24 + $0x5a4] ss:$8 sps:$4 sm:$0xff]  }
 0xff4   : > { %6341 = vmatpush1.bf16.msra.mxu1 %v8803_v10  ;;  %v8857_v10 = vld [vmem:[%s10299_s24 + $0x4a0] ss:$8 sps:$4 sm:$0xff]  }
 0xff5   : > { %6382 = vmatpush1.bf16.msra.mxu0 %v8806_v15  ;;  %6342 = vmatprep.subr.bf16.mxu1 %v8811_v32  ;;  %v8860_v15 = vld [vmem:[%s10299_s24 + $0x5a0] ss:$8 sps:$4 sm:$0xff]   ;;  %v8865_v32 = vld [vmem:[%s10299_s24 + $0x4b4] ss:$8 sps:$4 sm:$0xff]  }
 0xff6   : > { %6383 = vmatprep.subr.bf16.mxu0 %v8814_v22  ;;  %v8868_v22 = vld [vmem:[%s10299_s24 + $0x5b4] ss:$8 sps:$4 sm:$0xff]  }
 0xff8   : > { %6343 = vmatpush1.bf16.msra.mxu1 %v8809_v42  ;;  %v8863_v42 = vld [vmem:[%s10299_s24 + $0x4b0] ss:$8 sps:$4 sm:$0xff]  }
 0xff9   : > { %6384 = vmatpush1.bf16.msra.mxu0 %v8812_v40  ;;  %6344 = vmatprep.subr.bf16.mxu1 %v8817_v41  ;;  %v8866_v40 = vld [vmem:[%s10299_s24 + $0x5b0] ss:$8 sps:$4 sm:$0xff]   ;;  %v8871_v41 = vld [vmem:[%s10299_s24 + $0x4c4] ss:$8 sps:$4 sm:$0xff]  }
 0xffa   : > { %6385 = vmatprep.subr.bf16.mxu0 %v8820_v43  ;;  %v8874_v43 = vld [vmem:[%s10299_s24 + $0x5c4] ss:$8 sps:$4 sm:$0xff]  }
 0xffc   : > { %6345 = vmatpush1.bf16.msra.mxu1 %v8815_v45  ;;  %v8869_v45 = vld [vmem:[%s10299_s24 + $0x4c0] ss:$8 sps:$4 sm:$0xff]  }
 0xffd   : > { %6386 = vmatpush1.bf16.msra.mxu0 %v8818_v44  ;;  %6346 = vmatprep.subr.bf16.mxu1 %v8823_v46  ;;  %v8872_v44 = vld [vmem:[%s10299_s24 + $0x5c0] ss:$8 sps:$4 sm:$0xff]   ;;  %v8877_v46 = vld [vmem:[%s10299_s24 + $0x4d4] ss:$8 sps:$4 sm:$0xff]  }
 0xffe   : > { %6387 = vmatprep.subr.bf16.mxu0 %v8826_v47  ;;  %v8880_v47 = vld [vmem:[%s10299_s24 + $0x5d4] ss:$8 sps:$4 sm:$0xff]  }
0x1000   : > { %6347 = vmatpush1.bf16.msra.mxu1 %v8821_v48  ;;  %v8875_v48 = vld [vmem:[%s10299_s24 + $0x4d0] ss:$8 sps:$4 sm:$0xff]  }
0x1001   : > { %6388 = vmatpush1.bf16.msra.mxu0 %v8824_v38  ;;  %6348 = vmatprep.subr.bf16.mxu1 %v8829_v50  ;;  %v2941_v38 = vrot.slane %v11093_v49, %v10413_v11  ;;  %v8878_v50 = vld [vmem:[%s10299_s24 + $0x5d0] ss:$8 sps:$4 sm:$0xff]  }
0x1002   : > { %v11104_v55 = vpop.f32.mrb[52].mxu1  ;;  %6389 = vmatprep.subr.bf16.mxu0 %v8832_v37  ;;  %v8883_v37 = vld [vmem:[%s10299_s24 + $0x4e4] ss:$8 sps:$4 sm:$0xff]  }
0x1003   : > { %v11107_v57 = vpop.f32.mrb[24].mxu0  ;;  %v4466_v58 = vpop.f32.mrb[53].mxu1 }
0x1004   : > { %v4467_v59 = vadd.f32 %v4466_v58, %v2945_v51  ;;  %v4507_v61 = vpop.f32.mrb[25].mxu0  ;;  %v4468_v0 = vpop.f32.mrb[54].mxu1  ;;  %6349 = vmatpush1.bf16.msra.mxu1 %v8827_v39  ;;  %v2949_v51 = vrot.slane %v11093_v49, %v10407_v9  ;;  %v8886_v39 = vld [vmem:[%s10299_s24 + $0x5e4] ss:$8 sps:$4 sm:$0xff]  }
0x1005   : > { %v4508_v3 = vadd.f32 %v4507_v61, %v2953_v52  ;;  %v4509_v12 = vpop.f32.mrb[26].mxu0  ;;  %6390 = vmatpush1.bf16.msra.mxu0 %v8830_v53  ;;  %v4469_v13 = vpop.f32.mrb[55].mxu1  ;;  %6350 = vmatprep.subr.bf16.mxu1 %v8835_v54  ;;  %v8881_v52 = vld [vmem:[%s10299_s24 + $0x4e0] ss:$8 sps:$4 sm:$0xff]   ;;  %v4465_v53 = vadd.f32 %v11104_v55, %v2941_v38  ;;  %v8887_v61 = vld [vmem:[%s10299_s24 + $0x4f0] ss:$8 sps:$4 sm:$0xff]  }
0x1006   : > { %v4603_v19 = vmax.f32 %v4467_v59, 0.0  ;;  %v4510_v20 = vpop.f32.mrb[27].mxu0  ;;  %6391 = vmatprep.subr.bf16.mxu0 %v8838_v56  ;;  %v8884_v54 = vld [vmem:[%s10299_s24 + $0x5e0] ss:$8 sps:$4 sm:$0xff]   ;;  %v8889_v56 = vld [vmem:[%s10299_s24 + $0x4f4] ss:$8 sps:$4 sm:$0xff]   ;;  %v4506_v58 = vadd.f32 %v11107_v57, %v2949_v51 }
0x1007   : > { %v4605_v25 = vmax.f32 %v4508_v3, 0.0  ;;  %v8892_v59 = vld [vmem:[%s10299_s24 + $0x5f4] ss:$8 sps:$4 sm:$0xff]   ;;  %v4602_v0 = vmax.f32 %v4465_v53, 0.0  ;;  %v8895_v55 = vld [vmem:[%s10299_s24 + $0x604] ss:$8 sps:$4 sm:$0xff]  }
0x1008   : > { %v4619_v27 = vpack.c.bf16 %v4603_v19, %v4603_v19  ;;  %6351 = vmatpush1.bf16.msra.mxu1 %v8833_v1  ;;  %v8890_v1 = vld [vmem:[%s10299_s24 + $0x5f0] ss:$8 sps:$4 sm:$0xff]   ;;  %v4604_v3 = vmax.f32 %v4506_v58, 0.0  ;;  %v8898_v12 = vld [vmem:[%s10299_s24 + $0x704] ss:$8 sps:$4 sm:$0xff]  }
0x1009   : > { %v4621_v33 = vpack.c.bf16 %v4605_v25, %v4605_v25  ;;  %6392 = vmatpush1.bf16.msra.mxu0 %v8836_v14  ;;  %6352 = vmatprep.subr.bf16.mxu1 %v8841_v18  ;;  %v8893_v13 = vld [vmem:[%s10299_s24 + $0x600] ss:$8 sps:$4 sm:$0xff]   ;;  %v4618_v57 = vpack.c.bf16 %v4602_v0, %v4602_v0  ;;  %v8901_v18 = vld [vmem:[%s10299_s24 + $0x614] ss:$8 sps:$4 sm:$0xff]   ;;  %v8902_v25 = vld [vmem:[%s10299_s24 + $0x710] ss:$8 sps:$4 sm:$0xff]  }
0x100a   : > { %6370 = vmatprep.mubr.bf16.mxu1 %v4619_v27  ;;  %6393 = vmatprep.subr.bf16.mxu0 %v8844_v21  ;;  %v8896_v14 = vld [vmem:[%s10299_s24 + $0x700] ss:$8 sps:$4 sm:$0xff]   ;;  %v4620_v19 = vpack.c.bf16 %v4604_v3, %v4604_v3  ;;  %v8904_v20 = vld [vmem:[%s10299_s24 + $0x714] ss:$8 sps:$4 sm:$0xff]   ;;  %v8899_v21 = vld [vmem:[%s10299_s24 + $0x610] ss:$8 sps:$4 sm:$0xff]  }
0x100b   : > { %6411 = vmatprep.mubr.bf16.mxu0 %v4621_v33  ;;  %v8907_v27 = vld [vmem:[%s10299_s24 + $0x624] ss:$8 sps:$4 sm:$0xff]   ;;  %v8905_v33 = vld [vmem:[%s10299_s24 + $0x620] ss:$8 sps:$4 sm:$0xff]   ;;  %v8949_v3 = vld [vmem:[%s10299_s24 + $0x694] ss:$8 sps:$4 sm:$0xff]  }
0x100c   : > { %6353 = vmatpush1.bf16.msra.mxu1 %v8839_v4  ;;  %v8910_v4 = vld [vmem:[%s10299_s24 + $0x724] ss:$8 sps:$4 sm:$0xff]  }
0x100d   : > { %6394 = vmatpush1.bf16.msra.mxu0 %v8842_v28  ;;  %6354 = vmatprep.subr.bf16.mxu1 %v8847_v16  ;;  %v8908_v28 = vld [vmem:[%s10299_s24 + $0x720] ss:$8 sps:$4 sm:$0xff]   ;;  %v8913_v16 = vld [vmem:[%s10299_s24 + $0x634] ss:$8 sps:$4 sm:$0xff]   ;;  %v8946_v0 = vld [vmem:[%s10299_s24 + $0x784] ss:$8 sps:$4 sm:$0xff]  }
0x100e   : > { %6395 = vmatprep.subr.bf16.mxu0 %v8850_v23  ;;  %v8916_v23 = vld [vmem:[%s10299_s24 + $0x734] ss:$8 sps:$4 sm:$0xff]  }
0x1010   : > { %6355 = vmatpush1.bf16.msra.mxu1 %v8845_v6  ;;  %v8911_v6 = vld [vmem:[%s10299_s24 + $0x630] ss:$8 sps:$4 sm:$0xff]  }
0x1011   : > { %6396 = vmatpush1.bf16.msra.mxu0 %v8848_v29  ;;  %6356 = vmatprep.subr.bf16.mxu1 %v8853_v30  ;;  %v8914_v29 = vld [vmem:[%s10299_s24 + $0x730] ss:$8 sps:$4 sm:$0xff]   ;;  %v8919_v30 = vld [vmem:[%s10299_s24 + $0x644] ss:$8 sps:$4 sm:$0xff]  }
0x1012   : > { %6397 = vmatprep.subr.bf16.mxu0 %v8856_v7  ;;  %v8922_v7 = vld [vmem:[%s10299_s24 + $0x744] ss:$8 sps:$4 sm:$0xff]  }
0x1014   : > { %6357 = vmatpush1.bf16.msra.mxu1 %v8851_v63  ;;  %v8917_v63 = vld [vmem:[%s10299_s24 + $0x640] ss:$8 sps:$4 sm:$0xff]  }
0x1015   : > { %6398 = vmatpush1.bf16.msra.mxu0 %v8854_v31  ;;  %6358 = vmatprep.subr.bf16.mxu1 %v8859_v60  ;;  %v8920_v31 = vld [vmem:[%s10299_s24 + $0x740] ss:$8 sps:$4 sm:$0xff]   ;;  %v8925_v60 = vld [vmem:[%s10299_s24 + $0x654] ss:$8 sps:$4 sm:$0xff]  }
0x1016   : > { %6399 = vmatprep.subr.bf16.mxu0 %v8862_v34  ;;  %v8928_v34 = vld [vmem:[%s10299_s24 + $0x754] ss:$8 sps:$4 sm:$0xff]  }
0x1018   : > { %6359 = vmatpush1.bf16.msra.mxu1 %v8857_v10  ;;  %v2961_v10 = vrot.slane %v11093_v49, %v10523_v24 }
0x1019   : > { %6400 = vmatpush1.bf16.msra.mxu0 %v8860_v15  ;;  %6360 = vmatprep.subr.bf16.mxu1 %v8865_v32  ;;  %v8923_v15 = vld [vmem:[%s10299_s24 + $0x650] ss:$8 sps:$4 sm:$0xff]   ;;  %v2969_v32 = vrot.slane %v11093_v49, %v2936_v2 }
0x101a   : > { %6401 = vmatprep.subr.bf16.mxu0 %v8868_v22  ;;  %v8926_v22 = vld [vmem:[%s10299_s24 + $0x750] ss:$8 sps:$4 sm:$0xff]  }
0x101c   : > { %6361 = vmatpush1.bf16.msra.mxu1 %v8863_v42  ;;  %v8931_v42 = vld [vmem:[%s10299_s24 + $0x664] ss:$8 sps:$4 sm:$0xff]  }
0x101d   : > { %6402 = vmatpush1.bf16.msra.mxu0 %v8866_v40  ;;  %6362 = vmatprep.subr.bf16.mxu1 %v8871_v41  ;;  %v8934_v41 = vld [vmem:[%s10299_s24 + $0x764] ss:$8 sps:$4 sm:$0xff]  }
0x101e   : > { %6403 = vmatprep.subr.bf16.mxu0 %v8874_v43 }
0x1020   : > { %6363 = vmatpush1.bf16.msra.mxu1 %v8869_v45 }
0x1021   : > { %6404 = vmatpush1.bf16.msra.mxu0 %v8872_v44  ;;  %6364 = vmatprep.subr.bf16.mxu1 %v8877_v46 }
0x1022   : > { %6405 = vmatprep.subr.bf16.mxu0 %v8880_v47  ;;  %v8929_v47 = vld [vmem:[%s10299_s24 + $0x660] ss:$8 sps:$4 sm:$0xff]  }
0x1024   : > { %6365 = vmatpush1.bf16.msra.mxu1 %v8875_v48 }
0x1025   : > { %6406 = vmatpush1.bf16.msra.mxu0 %v8878_v50  ;;  %6366 = vmatprep.subr.bf16.mxu1 %v8883_v37  ;;  %v8932_v50 = vld [vmem:[%s10299_s24 + $0x760] ss:$8 sps:$4 sm:$0xff]   ;;  %v8937_v37 = vld [vmem:[%s10299_s24 + $0x674] ss:$8 sps:$4 sm:$0xff]  }
0x1026   : > { %6407 = vmatprep.subr.bf16.mxu0 %v8886_v39 }
0x1028   : > { %6367 = vmatpush1.bf16.msra.mxu1 %v8881_v52  ;;  %v8940_v52 = vld [vmem:[%s10299_s24 + $0x774] ss:$8 sps:$4 sm:$0xff]  }
0x1029   : > { %6408 = vmatpush1.bf16.msra.mxu0 %v8884_v54  ;;  %6368 = vmatprep.subr.bf16.mxu1 %v8889_v56  ;;  %v8935_v56 = vld [vmem:[%s10299_s24 + $0x670] ss:$8 sps:$4 sm:$0xff]  }
0x102a   : > { %6409 = vmatprep.subr.bf16.mxu0 %v8892_v59  ;;  %v8938_v59 = vld [vmem:[%s10299_s24 + $0x770] ss:$8 sps:$4 sm:$0xff]  }
0x102c   : > { %6369 = vmatpush1.bf16.msra.mxu1 %v8887_v61  ;;  %v8943_v61 = vld [vmem:[%s10299_s24 + $0x684] ss:$8 sps:$4 sm:$0xff]  }
0x102d   : > { %6410 = vmatpush1.bf16.msra.mxu0 %v8890_v1  ;;  %6420 = vmatprep.subr.bf16.mxu1 %v8895_v55  ;;  %v8941_v1 = vld [vmem:[%s10299_s24 + $0x680] ss:$8 sps:$4 sm:$0xff]  }
0x102e   : > { %6461 = vmatprep.subr.bf16.mxu0 %v8898_v12  ;;  %v8944_v55 = vld [vmem:[%s10299_s24 + $0x780] ss:$8 sps:$4 sm:$0xff]   ;;  %v8952_v12 = vld [vmem:[%s10299_s24 + $0x794] ss:$8 sps:$4 sm:$0xff]  }
0x102f   : > { %6371 = vmatmul.mubr.bf16.vlgmr.msra.gmra.mrb[68].mxu1 %v4618_v57  ;;  %v8950_v57 = vld [vmem:[%s10299_s24 + $0x790] ss:$8 sps:$4 sm:$0xff]  }
0x1030   : > { %6412 = vmatmul.mubr.bf16.vlgmr.msra.gmra.mrb[40].mxu0 %v4620_v19  ;;  %6421 = vmatpush1.bf16.msra.mxu1 %v8893_v13  ;;  %v8947_v13 = vld [vmem:[%s10299_s24 + $0x690] ss:$8 sps:$4 sm:$0xff]   ;;  %v8953_v19 = vld [vmem:[%s10299_s24 + $0x6a0] ss:$8 sps:$4 sm:$0xff]  }
0x1031   : > { %6462 = vmatpush1.bf16.msra.mxu0 %v8896_v14  ;;  %6422 = vmatprep.subr.bf16.mxu1 %v8901_v18  ;;  %v8955_v14 = vld [vmem:[%s10299_s24 + $0x6a4] ss:$8 sps:$4 sm:$0xff]  }
0x1032   : > { %6463 = vmatprep.subr.bf16.mxu0 %v8904_v20  ;;  %v8958_v18 = vld [vmem:[%s10299_s24 + $0x7a4] ss:$8 sps:$4 sm:$0xff]   ;;  %v8956_v20 = vld [vmem:[%s10299_s24 + $0x7a0] ss:$8 sps:$4 sm:$0xff]  }
0x1034   : > { %6423 = vmatpush1.bf16.msra.mxu1 %v8899_v21  ;;  %v8961_v21 = vld [vmem:[%s10299_s24 + $0x6b4] ss:$8 sps:$4 sm:$0xff]  }
0x1035   : > { %6464 = vmatpush1.bf16.msra.mxu0 %v8902_v25  ;;  %6424 = vmatprep.subr.bf16.mxu1 %v8907_v27  ;;  %v8964_v25 = vld [vmem:[%s10299_s24 + $0x7b4] ss:$8 sps:$4 sm:$0xff]   ;;  %v8959_v27 = vld [vmem:[%s10299_s24 + $0x6b0] ss:$8 sps:$4 sm:$0xff]  }
0x1036   : > { %6465 = vmatprep.subr.bf16.mxu0 %v8910_v4  ;;  %v8962_v4 = vld [vmem:[%s10299_s24 + $0x7b0] ss:$8 sps:$4 sm:$0xff]  }
0x1038   : > { %6425 = vmatpush1.bf16.msra.mxu1 %v8905_v33  ;;  %v8967_v33 = vld [vmem:[%s10299_s24 + $0x6c4] ss:$8 sps:$4 sm:$0xff]  }
0x1039   : > { %6466 = vmatpush1.bf16.msra.mxu0 %v8908_v28  ;;  %6426 = vmatprep.subr.bf16.mxu1 %v8913_v16  ;;  %v8970_v28 = vld [vmem:[%s10299_s24 + $0x7c4] ss:$8 sps:$4 sm:$0xff]   ;;  %v8965_v16 = vld [vmem:[%s10299_s24 + $0x6c0] ss:$8 sps:$4 sm:$0xff]  }
0x103a   : > { %6467 = vmatprep.subr.bf16.mxu0 %v8916_v23  ;;  %v8968_v23 = vld [vmem:[%s10299_s24 + $0x7c0] ss:$8 sps:$4 sm:$0xff]  }
0x103c   : > { %6427 = vmatpush1.bf16.msra.mxu1 %v8911_v6  ;;  %v8973_v6 = vld [vmem:[%s10299_s24 + $0x6d4] ss:$8 sps:$4 sm:$0xff]  }
0x103d   : > { %6468 = vmatpush1.bf16.msra.mxu0 %v8914_v29  ;;  %6428 = vmatprep.subr.bf16.mxu1 %v8919_v30  ;;  %v8976_v29 = vld [vmem:[%s10299_s24 + $0x7d4] ss:$8 sps:$4 sm:$0xff]   ;;  %v8971_v30 = vld [vmem:[%s10299_s24 + $0x6d0] ss:$8 sps:$4 sm:$0xff]  }
0x103e   : > { %6469 = vmatprep.subr.bf16.mxu0 %v8922_v7  ;;  %v2957_v7 = vrot.slane %v11093_v49, %v10471_v5  ;;  %v8980_v5 = vld [vmem:[%s10299_s24 + $0x7e0] ss:$8 sps:$4 sm:$0xff]  }
0x1040   : > { %6429 = vmatpush1.bf16.msra.mxu1 %v8917_v63  ;;  %v8974_v63 = vld [vmem:[%s10299_s24 + $0x7d0] ss:$8 sps:$4 sm:$0xff]  }
0x1041   : > { %6470 = vmatpush1.bf16.msra.mxu0 %v8920_v31  ;;  %6430 = vmatprep.subr.bf16.mxu1 %v8925_v60  ;;  %v8979_v31 = vld [vmem:[%s10299_s24 + $0x6e4] ss:$8 sps:$4 sm:$0xff]   ;;  %v2965_v60 = vrot.slane %v11093_v49, %v2932_v62  ;;  %v8986_v62 = vld [vmem:[%s10299_s24 + $0x7f0] ss:$8 sps:$4 sm:$0xff]  }
0x1042   : > { %v11183_v40 = vpop.f32.mrb[56].mxu1  ;;  %6471 = vmatprep.subr.bf16.mxu0 %v8928_v34  ;;  %v8982_v34 = vld [vmem:[%s10299_s24 + $0x7e4] ss:$8 sps:$4 sm:$0xff]  }
0x1043   : > { %v11186_v43 = vpop.f32.mrb[28].mxu0  ;;  %v4548_v45 = vpop.f32.mrb[57].mxu1 }
0x1044   : > { %v4549_v24 = vadd.f32 %v4548_v45, %v2961_v10  ;;  %v4589_v44 = vpop.f32.mrb[29].mxu0  ;;  %v4550_v46 = vpop.f32.mrb[58].mxu1  ;;  %6431 = vmatpush1.bf16.msra.mxu1 %v8923_v15  ;;  %v8977_v10 = vld [vmem:[%s10299_s24 + $0x6e0] ss:$8 sps:$4 sm:$0xff]   ;;  %v4547_v15 = vadd.f32 %v11183_v40, %v2957_v7 }
0x1045   : > { %v4590_v2 = vadd.f32 %v4589_v44, %v2969_v32  ;;  %v4591_v48 = vpop.f32.mrb[30].mxu0  ;;  %6472 = vmatpush1.bf16.msra.mxu0 %v8926_v22  ;;  %v4551_v38 = vpop.f32.mrb[59].mxu1  ;;  %6432 = vmatprep.subr.bf16.mxu1 %v8931_v42  ;;  %v8985_v32 = vld [vmem:[%s10299_s24 + $0x6f4] ss:$8 sps:$4 sm:$0xff]   ;;  %v4588_v22 = vadd.f32 %v11186_v43, %v2965_v60 }
0x1046   : > { %v4607_v51 = vmax.f32 %v4549_v24, 0.0  ;;  %v4592_v39 = vpop.f32.mrb[31].mxu0  ;;  %6473 = vmatprep.subr.bf16.mxu0 %v8934_v41  ;;  %v8988_v42 = vld [vmem:[%s10299_s24 + $0x7f4] ss:$8 sps:$4 sm:$0xff]   ;;  %v4606_v41 = vmax.f32 %v4547_v15, 0.0  ;;  %s11401_s24 = scalar_lea.vmem [#allocation20], %s10271_s14 }
0x1047   : > { %v4609_v53 = vmax.f32 %v4590_v2, 0.0  ;;  %v4608_v49 = vmax.f32 %v4588_v22, 0.0  ;;  %v4882_v24 = vld [vmem:[%s11399_s17] sm:$0x3]  ;;  %s11402_s14 = sld [smem:[#allocation36_spill]] }
0x1048   : > { %v4623_v54 = vpack.c.bf16 %v4607_v51, %v4607_v51  ;;  %6433 = vmatpush1.bf16.msra.mxu1 %v8929_v47  ;;  %v4622_v45 = vpack.c.bf16 %v4606_v41, %v4606_v41  ;;  %v4887_v43 = vrot.slane %v4882_v24, %v10413_v11  ;;  %v4891_v44 = vrot.slane %v4882_v24, %v10529_v26 }
0x1049   : > { %v4625_v58 = vpack.c.bf16 %v4609_v53, %v4609_v53  ;;  %6474 = vmatpush1.bf16.msra.mxu0 %v8932_v50  ;;  %6434 = vmatprep.subr.bf16.mxu1 %v8937_v37  ;;  %v4624_v40 = vpack.c.bf16 %v4608_v49, %v4608_v49 }
0x104a   : > { %6452 = vmatprep.mubr.bf16.mxu1 %v4623_v54  ;;  %6475 = vmatprep.subr.bf16.mxu0 %v8940_v52 }
0x104b   : > { %6493 = vmatprep.mubr.bf16.mxu0 %v4625_v58 }
0x104c   : > { %6435 = vmatpush1.bf16.msra.mxu1 %v8935_v56 }
0x104d   : > { %6476 = vmatpush1.bf16.msra.mxu0 %v8938_v59  ;;  %6436 = vmatprep.subr.bf16.mxu1 %v8943_v61  ;;  %p8105_p3 = scmp.ne.s32.totalorder %s11402_s14, 5 }
0x104e   : > { %6477 = vmatprep.subr.bf16.mxu0 %v8946_v0 }
0x1050   : > { %6437 = vmatpush1.bf16.msra.mxu1 %v8941_v1 }
0x1051   : > { %6478 = vmatpush1.bf16.msra.mxu0 %v8944_v55  ;;  %6438 = vmatprep.subr.bf16.mxu1 %v8949_v3 }
0x1052   : > { %6479 = vmatprep.subr.bf16.mxu0 %v8952_v12 }
0x1054   : > { %6439 = vmatpush1.bf16.msra.mxu1 %v8947_v13 }
0x1055   : > { %6480 = vmatpush1.bf16.msra.mxu0 %v8950_v57  ;;  %6440 = vmatprep.subr.bf16.mxu1 %v8955_v14 }
0x1056   : > { %6481 = vmatprep.subr.bf16.mxu0 %v8958_v18 }
0x1058   : > { %6441 = vmatpush1.bf16.msra.mxu1 %v8953_v19 }
0x1059   : > { %6482 = vmatpush1.bf16.msra.mxu0 %v8956_v20  ;;  %6442 = vmatprep.subr.bf16.mxu1 %v8961_v21 }
0x105a   : > { %6483 = vmatprep.subr.bf16.mxu0 %v8964_v25 }
0x105c   : > { %6443 = vmatpush1.bf16.msra.mxu1 %v8959_v27 }
0x105d   : > { %6484 = vmatpush1.bf16.msra.mxu0 %v8962_v4  ;;  %6444 = vmatprep.subr.bf16.mxu1 %v8967_v33 }
0x105e   : > { %6485 = vmatprep.subr.bf16.mxu0 %v8970_v28 }
0x1060   : > { %6445 = vmatpush1.bf16.msra.mxu1 %v8965_v16 }
0x1061   : > { %6486 = vmatpush1.bf16.msra.mxu0 %v8968_v23  ;;  %6446 = vmatprep.subr.bf16.mxu1 %v8973_v6 }
0x1062   : > { %6487 = vmatprep.subr.bf16.mxu0 %v8976_v29 }
0x1064   : > { %6447 = vmatpush1.bf16.msra.mxu1 %v8971_v30 }
0x1065   : > { %6488 = vmatpush1.bf16.msra.mxu0 %v8974_v63  ;;  %6448 = vmatprep.subr.bf16.mxu1 %v8979_v31 }
0x1066   : > { %6489 = vmatprep.subr.bf16.mxu0 %v8982_v34 }
0x1068   : > { %6449 = vmatpush1.bf16.msra.mxu1 %v8977_v10 }
0x1069   : > { %6490 = vmatpush1.bf16.msra.mxu0 %v8980_v5  ;;  %6450 = vmatprep.subr.bf16.mxu1 %v8985_v32 }
0x106a   : > { %6491 = vmatprep.subr.bf16.mxu0 %v8988_v42 }
0x106c   : > { %6451 = vmatpush1.bf16.msra.mxu1 %v8983_v8 }
0x106d   : > { %6492 = vmatpush1.bf16.msra.mxu0 %v8986_v62 }
0x106f   : > { %6453 = vmatmul.mubr.bf16.vlgmr.msra.gmra.mrb[72].mxu1 %v4622_v45 }
0x1070   : > { %6494 = vmatmul.mubr.bf16.vlgmr.msra.gmra.mrb[44].mxu0 %v4624_v40 }
0x1082   : > { %v6208_v46 = vpop.f32.mrb[60].mxu1 }
0x1083   : > { %v6209_v47 = vadd.f32 %v6208_v46, %v4887_v43  ;;  %v6249_v2 = vpop.f32.mrb[32].mxu0  ;;  %v6210_v48 = vpop.f32.mrb[61].mxu1 }
0x1084   : > { %v6211_v38 = vadd.f32 %v6210_v48, %v4891_v44  ;;  %v6251_v50 = vpop.f32.mrb[33].mxu0  ;;  %v6212_v37 = vpop.f32.mrb[62].mxu1  ;;  %v6505_v48 = vld [vmem:[%s11401_s24] sm:$0x3] }
0x1085   : > { %v6250_v51 = vadd.f32 %v6249_v2, %v6209_v47  ;;  %v6253_v39 = vpop.f32.mrb[34].mxu0  ;;  %v6213_v52 = vpop.f32.mrb[63].mxu1 }
0x1086   : > { %v6252_v53 = vadd.f32 %v6251_v50, %v6211_v38  ;;  %v6254_v54 = vpop.f32.mrb[35].mxu0  ;;  %v6541_v39 = vrot.slane %v6505_v48, %v10413_v11  ;;  %v6545_v52 = vrot.slane %v6505_v48, %v10529_v26  ;;  %v9079_v48 = vld [vmem:[#allocation22 + $0x16c] ss:$16 sps:$4 sm:$0xff] (!%p8105_p3)  }
0x10c2   : > { %v6290_v56 = vpop.f32.mrb[64].mxu1 }
0x10c3   : > { %v6291_v58 = vadd.f32 %v6290_v56, %v6250_v51  ;;  %v6331_v59 = vpop.f32.mrb[36].mxu0  ;;  %v6292_v61 = vpop.f32.mrb[65].mxu1 }
0x10c4   : > { %v6293_v0 = vadd.f32 %v6292_v61, %v6252_v53  ;;  %v6333_v1 = vpop.f32.mrb[37].mxu0  ;;  %v6294_v55 = vpop.f32.mrb[66].mxu1 }
0x10c5   : > { %v6332_v3 = vadd.f32 %v6331_v59, %v6291_v58  ;;  %v6335_v12 = vpop.f32.mrb[38].mxu0  ;;  %v6295_v13 = vpop.f32.mrb[67].mxu1  ;;  %v9013_v55 = vld [vmem:[#allocation22 + $0xc] ss:$16 sps:$4 sm:$0xff] (!%p8105_p3)  }
0x10c6   : > { %v6334_v57 = vadd.f32 %v6333_v1, %v6293_v0  ;;  %v6336_v14 = vpop.f32.mrb[39].mxu0  ;;  %v9011_v0 = vld [vmem:[#allocation22 + $0x4] ss:$16 sps:$4 sm:$0xff] (!%p8105_p3)   ;;  %v9016_v12 = vld [vmem:[#allocation22 + $0x8] ss:$16 sps:$4 sm:$0xff] (!%p8105_p3)   ;;  %7005 = vmatprep.subr.bf16.mxu1 (!%p8105_p3), %v9013_v55 }
0x10c7   : > { %6964 = vmatprep.subr.bf16.mxu0 (!%p8105_p3), %v9011_v0  ;;  %v9017_v13 = vld [vmem:[#allocation22 + $0x24] ss:$16 sps:$4 sm:$0xff] (!%p8105_p3)   ;;  %7006 = vmatpush1.bf16.msra.mxu1 (!%p8105_p3), %v9016_v12  ;;  %v9021_v14 = vld [vmem:[#allocation22 + $0x20] ss:$16 sps:$4 sm:$0xff] (!%p8105_p3)  }
0x10c8   : > { %v9099_v0 = vld [vmem:[#allocation22 + $0x1c0] ss:$16 sps:$4 sm:$0xff] (!%p8105_p3)   ;;  %v9101_v55 = vld [vmem:[#allocation22 + $0x1e4] ss:$16 sps:$4 sm:$0xff] (!%p8105_p3)  }
0x10c9   : > { %v9105_v12 = vld [vmem:[#allocation22 + $0x1e0] ss:$16 sps:$4 sm:$0xff] (!%p8105_p3)  }
0x1102   : > { %v6372_v18 = vpop.f32.mrb[68].mxu1 }
0x1103   : > { %v6373_v19 = vadd.f32 %v6372_v18, %v6332_v3  ;;  %v6413_v20 = vpop.f32.mrb[40].mxu0  ;;  %v6374_v21 = vpop.f32.mrb[69].mxu1  ;;  %v9015_v3 = vld [vmem:[#allocation22] ss:$16 sps:$4 sm:$0xff] (!%p8105_p3)   ;;  %v9022_v18 = vld [vmem:[#allocation22 + $0x28] ss:$16 sps:$4 sm:$0xff] (!%p8105_p3)  }
0x1104   : > { %v6375_v25 = vadd.f32 %v6374_v21, %v6334_v57  ;;  %v6415_v27 = vpop.f32.mrb[41].mxu0  ;;  %v6376_v4 = vpop.f32.mrb[70].mxu1  ;;  %6965 = vmatpush1.bf16.msra.mxu0 (!%p8105_p3), %v9015_v3  ;;  %v9019_v57 = vld [vmem:[#allocation22 + $0x2c] ss:$16 sps:$4 sm:$0xff] (!%p8105_p3)   ;;  %v9027_v21 = vld [vmem:[#allocation22 + $0x40] ss:$16 sps:$4 sm:$0xff] (!%p8105_p3)  }
0x1105   : > { %v6414_v33 = vadd.f32 %v6413_v20, %v6373_v19  ;;  %v6417_v28 = vpop.f32.mrb[42].mxu0  ;;  %v6377_v16 = vpop.f32.mrb[71].mxu1  ;;  %6966 = vmatprep.subr.bf16.mxu0 (!%p8105_p3), %v9017_v13  ;;  %7007 = vmatprep.subr.bf16.mxu1 (!%p8105_p3), %v9019_v57  ;;  %v9023_v19 = vld [vmem:[#allocation22 + $0x44] ss:$16 sps:$4 sm:$0xff] (!%p8105_p3)   ;;  %v9025_v20 = vld [vmem:[#allocation22 + $0x4c] ss:$16 sps:$4 sm:$0xff] (!%p8105_p3)  }
0x1106   : > { %v6416_v23 = vadd.f32 %v6415_v27, %v6375_v25  ;;  %v6418_v6 = vpop.f32.mrb[43].mxu0  ;;  %v9028_v25 = vld [vmem:[#allocation22 + $0x48] ss:$16 sps:$4 sm:$0xff] (!%p8105_p3)   ;;  %7008 = vmatpush1.bf16.msra.mxu1 (!%p8105_p3), %v9022_v18  ;;  %v9029_v27 = vld [vmem:[#allocation22 + $0x64] ss:$16 sps:$4 sm:$0xff] (!%p8105_p3)  }
0x1107   : > { %7009 = vmatprep.subr.bf16.mxu1 (!%p8105_p3), %v9025_v20  ;;  %v9031_v4 = vld [vmem:[#allocation22 + $0x6c] ss:$16 sps:$4 sm:$0xff] (!%p8105_p3)   ;;  %v9034_v28 = vld [vmem:[#allocation22 + $0x68] ss:$16 sps:$4 sm:$0xff] (!%p8105_p3)   ;;  %v9035_v16 = vld [vmem:[#allocation22 + $0x84] ss:$16 sps:$4 sm:$0xff] (!%p8105_p3)  }
0x1108   : > { %6967 = vmatpush1.bf16.msra.mxu0 (!%p8105_p3), %v9021_v14  ;;  %v9039_v6 = vld [vmem:[#allocation22 + $0x80] ss:$16 sps:$4 sm:$0xff] (!%p8105_p3)   ;;  %v9103_v3 = vld [vmem:[#allocation22 + $0x1ec] ss:$16 sps:$4 sm:$0xff] (!%p8105_p3)   ;;  %v9106_v13 = vld [vmem:[#allocation22 + $0x1e8] ss:$16 sps:$4 sm:$0xff] (!%p8105_p3)  }
0x1109   : > { %6968 = vmatprep.subr.bf16.mxu0 (!%p8105_p3), %v9023_v19  ;;  %v6622_v14 = vld [vmem:[#allocation23] sm:$0xf] (!%p8105_p3) }
0x110a   : > { %7010 = vmatpush1.bf16.msra.mxu1 (!%p8105_p3), %v9028_v25  ;;  %v6627_v18 = vrot.slane (!%p8105_p3), %v6622_v14, %v10413_v11  ;;  %v6635_v19 = vrot.slane (!%p8105_p3), %v6622_v14, %v10407_v9  ;;  %v6631_v20 = vrot.slane (!%p8105_p3), %v6622_v14, %v10529_v26 }
0x110b   : > { %7011 = vmatprep.subr.bf16.mxu1 (!%p8105_p3), %v9031_v4 }
0x110c   : > { %6969 = vmatpush1.bf16.msra.mxu0 (!%p8105_p3), %v9027_v21  ;;  %v6639_v21 = vrot.slane (!%p8105_p3), %v6622_v14, %v10514_v17 }
0x110d   : > { %6970 = vmatprep.subr.bf16.mxu0 (!%p8105_p3), %v9029_v27 }
0x110e   : > { %7012 = vmatpush1.bf16.msra.mxu1 (!%p8105_p3), %v9034_v28 }
0x1142   : > { %v6454_v29 = vpop.f32.mrb[72].mxu1 }
0x1143   : > { %v6455_v30 = vadd.f32 %v6454_v29, %v6414_v33  ;;  %v6495_v7 = vpop.f32.mrb[44].mxu0  ;;  %v6456_v63 = vpop.f32.mrb[73].mxu1  ;;  %v9033_v33 = vld [vmem:[#allocation22 + $0x60] ss:$16 sps:$4 sm:$0xff] (!%p8105_p3)   ;;  %v9040_v29 = vld [vmem:[#allocation22 + $0x88] ss:$16 sps:$4 sm:$0xff] (!%p8105_p3)  }
0x1144   : > { %v6457_v31 = vadd.f32 %v6456_v63, %v6416_v23  ;;  %v6497_v60 = vpop.f32.mrb[45].mxu0  ;;  %v6458_v34 = vpop.f32.mrb[74].mxu1  ;;  %v9037_v23 = vld [vmem:[#allocation22 + $0x8c] ss:$16 sps:$4 sm:$0xff] (!%p8105_p3)   ;;  %6971 = vmatpush1.bf16.msra.mxu0 (!%p8105_p3), %v9033_v33  ;;  %v9045_v63 = vld [vmem:[#allocation22 + $0xa0] ss:$16 sps:$4 sm:$0xff] (!%p8105_p3)  }
0x1145   : > { %v6496_v10 = vadd.f32 %v6495_v7, %v6455_v30  ;;  %v6499_v15 = vpop.f32.mrb[46].mxu0  ;;  %v6459_v5 = vpop.f32.mrb[75].mxu1  ;;  %v9041_v30 = vld [vmem:[#allocation22 + $0xa4] ss:$16 sps:$4 sm:$0xff] (!%p8105_p3)   ;;  %6972 = vmatprep.subr.bf16.mxu0 (!%p8105_p3), %v9035_v16  ;;  %7013 = vmatprep.subr.bf16.mxu1 (!%p8105_p3), %v9037_v23  ;;  %v9043_v7 = vld [vmem:[#allocation22 + $0xac] ss:$16 sps:$4 sm:$0xff] (!%p8105_p3)  }
0x1146   : > { %v6498_v32 = vadd.f32 %v6497_v60, %v6457_v31  ;;  %v6500_v22 = vpop.f32.mrb[47].mxu0  ;;  %7014 = vmatpush1.bf16.msra.mxu1 (!%p8105_p3), %v9040_v29  ;;  %v9046_v31 = vld [vmem:[#allocation22 + $0xa8] ss:$16 sps:$4 sm:$0xff] (!%p8105_p3)   ;;  %v9047_v60 = vld [vmem:[#allocation22 + $0xc4] ss:$16 sps:$4 sm:$0xff] (!%p8105_p3)  }
0x1147   : > { %v6502_v42 = vadd.f32 %v6496_v10, %v10693_v35  ;;  %v6504_v35 = vld [vmem:[%s11400_s7] sm:$0x3]  ;;  %7015 = vmatprep.subr.bf16.mxu1 (!%p8105_p3), %v9043_v7  ;;  %v9049_v34 = vld [vmem:[#allocation22 + $0xcc] ss:$16 sps:$4 sm:$0xff] (!%p8105_p3)   ;;  %v9051_v10 = vld [vmem:[#allocation22 + $0xc0] ss:$16 sps:$4 sm:$0xff] (!%p8105_p3)  }
0x1148   : > { %v6503_v8 = vadd.f32 %v6498_v32, %v10695_v36  ;;  %v6528_v50 = vrot.slane %v6504_v35, %v10413_v11  ;;  %v6532_v37 = vrot.slane %v6504_v35, %v10529_v26  ;;  %6973 = vmatpush1.bf16.msra.mxu0 (!%p8105_p3), %v9039_v6  ;;  %v9052_v15 = vld [vmem:[#allocation22 + $0xc8] ss:$16 sps:$4 sm:$0xff] (!%p8105_p3)   ;;  %v9053_v5 = vld [vmem:[#allocation22 + $0xe4] ss:$16 sps:$4 sm:$0xff] (!%p8105_p3)   ;;  %v9055_v32 = vld [vmem:[#allocation22 + $0xec] ss:$16 sps:$4 sm:$0xff] (!%p8105_p3)  }
0x1149   : > { %v6510_v62 = vmul.f32 %v6502_v42, %v6502_v42  ;;  %6974 = vmatprep.subr.bf16.mxu0 (!%p8105_p3), %v9041_v30  ;;  %v9057_v22 = vld [vmem:[#allocation22 + $0xe0] ss:$16 sps:$4 sm:$0xff] (!%p8105_p3)   ;;  %v9077_v35 = vld [vmem:[#allocation22 + $0x164] ss:$16 sps:$4 sm:$0xff] (!%p8105_p3)  }
0x114a   : > { %v6506_v41 = vadd.f32 %v6503_v8, %v6502_v42  ;;  %v6511_v49 = vmul.f32 %v6503_v8, %v6503_v8  ;;  %7016 = vmatpush1.bf16.msra.mxu1 (!%p8105_p3), %v9046_v31 }
0x114b   : > { %7017 = vmatprep.subr.bf16.mxu1 (!%p8105_p3), %v9049_v34 }
0x114c   : > { %6507 = vadd.xlane.f32.xlu0 %v6506_v41  ;;  %v6512_v45 = vadd.f32 %v6511_v49, %v6510_v62  ;;  %6975 = vmatpush1.bf16.msra.mxu0 (!%p8105_p3), %v9045_v63  ;;  %v9061_v41 = vld [vmem:[#allocation22 + $0x10c] ss:$16 sps:$4 sm:$0xff] (!%p8105_p3)   ;;  %v9063_v62 = vld [vmem:[#allocation22 + $0x100] ss:$16 sps:$4 sm:$0xff] (!%p8105_p3)   ;;  %v9064_v49 = vld [vmem:[#allocation22 + $0x108] ss:$16 sps:$4 sm:$0xff] (!%p8105_p3)  }
0x114d   : > { %6976 = vmatprep.subr.bf16.mxu0 (!%p8105_p3), %v9047_v60 }
0x114e   : > { %7018 = vmatpush1.bf16.msra.mxu1 (!%p8105_p3), %v9052_v15 }
0x114f   : > { %7019 = vmatprep.subr.bf16.mxu1 (!%p8105_p3), %v9055_v32 }
0x1150   : > { %6513 = vadd.xlane.f32.xlu0 %v6512_v45  ;;  %6977 = vmatpush1.bf16.msra.mxu0 (!%p8105_p3), %v9051_v10  ;;  %v9065_v45 = vld [vmem:[#allocation22 + $0x124] ss:$16 sps:$4 sm:$0xff] (!%p8105_p3)  }
0x1151   : > { %6978 = vmatprep.subr.bf16.mxu0 (!%p8105_p3), %v9053_v5 }
0x1154   : > { %6979 = vmatpush1.bf16.msra.mxu0 (!%p8105_p3), %v9057_v22 }
0x11d9   : > { %v6508_v40 = vpop.xlane.xlu0 %6507 }
0x11da   : > { %v6509_v24 = vmul.f32 0.007352941, %v6508_v40  ;;  %v9067_v40 = vld [vmem:[#allocation22 + $0x12c] ss:$16 sps:$4 sm:$0xff] (!%p8105_p3)  }
0x11dc   : > { %v6516_v44 = vmul.f32 %v6509_v24, %v6509_v24  ;;  %v6518_v36 = vsub.f32 %v6502_v42, %v6509_v24  ;;  %v6519_v38 = vsub.f32 %v6503_v8, %v6509_v24  ;;  %v9058_v42 = vld [vmem:[#allocation22 + $0xe8] ss:$16 sps:$4 sm:$0xff] (!%p8105_p3)   ;;  %v9059_v8 = vld [vmem:[#allocation22 + $0x104] ss:$16 sps:$4 sm:$0xff] (!%p8105_p3)   ;;  %v9069_v24 = vld [vmem:[#allocation22 + $0x120] ss:$16 sps:$4 sm:$0xff] (!%p8105_p3)  }
0x11dd   : > { %v6514_v43 = vpop.xlane.xlu0 %6513  ;;  %7020 = vmatpush1.bf16.msra.mxu1 (!%p8105_p3), %v9058_v42  ;;  %6980 = vmatprep.subr.bf16.mxu0 (!%p8105_p3), %v9059_v8 }
0x11de   : > { %v6515_v46 = vmul.f32 0.007352941, %v6514_v43  ;;  %7021 = vmatprep.subr.bf16.mxu1 (!%p8105_p3), %v9061_v41  ;;  %6981 = vmatpush1.bf16.msra.mxu0 (!%p8105_p3), %v9063_v62  ;;  %v9070_v43 = vld [vmem:[#allocation22 + $0x128] ss:$16 sps:$4 sm:$0xff] (!%p8105_p3)  }
0x11df   : > { %6982 = vmatprep.subr.bf16.mxu0 (!%p8105_p3), %v9065_v45 }
0x11e0   : > { %v6517_v47 = vsub.f32 %v6515_v46, %v6516_v44  ;;  %v9071_v44 = vld [vmem:[#allocation22 + $0x144] ss:$16 sps:$4 sm:$0xff] (!%p8105_p3)   ;;  %v9073_v46 = vld [vmem:[#allocation22 + $0x14c] ss:$16 sps:$4 sm:$0xff] (!%p8105_p3)  }
0x11e1   : > { %7022 = vmatpush1.bf16.msra.mxu1 (!%p8105_p3), %v9064_v49 }
0x11e2   : > { %v6520_v2 = vadd.f32 1e-05, %v6517_v47  ;;  %7023 = vmatprep.subr.bf16.mxu1 (!%p8105_p3), %v9067_v40  ;;  %v9075_v47 = vld [vmem:[#allocation22 + $0x140] ss:$16 sps:$4 sm:$0xff] (!%p8105_p3)   ;;  %6983 = vmatpush1.bf16.msra.mxu0 (!%p8105_p3), %v9069_v24 }
0x11e3   : > { %6984 = vmatprep.subr.bf16.mxu0 (!%p8105_p3), %v9071_v44 }
0x11e4   : > { %9007 = vrsqrt.f32 %v6520_v2  ;;  %v9076_v2 = vld [vmem:[#allocation22 + $0x148] ss:$16 sps:$4 sm:$0xff] (!%p8105_p3)  }
0x11e5   : > { %7024 = vmatpush1.bf16.msra.mxu1 (!%p8105_p3), %v9070_v43 }
0x11e6   : > { %7025 = vmatprep.subr.bf16.mxu1 (!%p8105_p3), %v9073_v46  ;;  %6985 = vmatpush1.bf16.msra.mxu0 (!%p8105_p3), %v9075_v47 }
0x11e7   : > { %6986 = vmatprep.subr.bf16.mxu0 (!%p8105_p3), %v9077_v35 }
0x11e9   : > { %7026 = vmatpush1.bf16.msra.mxu1 (!%p8105_p3), %v9076_v2 }
0x11ea   : > { %7027 = vmatprep.subr.bf16.mxu1 (!%p8105_p3), %v9079_v48 }
0x11ee   : > { %v9008_v51 = vpop.eup %9007 }
0x11ef   : > { %v6522_v53 = vmul.f32 %v9008_v51, %v6518_v36  ;;  %v6523_v54 = vmul.f32 %v9008_v51, %v6519_v38  ;;  %6555 = sbr.rel (%p8105_p3) target bundleno = 4827 (0x12db), region = 148  ;;  %v9081_v36 = vld [vmem:[#allocation22 + $0x160] ss:$16 sps:$4 sm:$0xff] (!%p8105_p3)   ;;  %v9082_v38 = vld [vmem:[#allocation22 + $0x168] ss:$16 sps:$4 sm:$0xff] (!%p8105_p3)  }
0x11f0   : > { %6987 = vmatpush1.bf16.msra.mxu0 (!%p8105_p3), %v9081_v36  ;;  %7028 = vmatpush1.bf16.msra.mxu1 (!%p8105_p3), %v9082_v38  ;;  %v9087_v51 = vld [vmem:[#allocation22 + $0x180] ss:$16 sps:$4 sm:$0xff] (!%p8105_p3)  }
0x11f1   : > { %v6535_v56 = vmul.f32 %v6528_v50, %v6522_v53  ;;  %v6536_v58 = vmul.f32 %v6532_v37, %v6523_v54  ;;  %v9083_v50 = vld [vmem:[#allocation22 + $0x184] ss:$16 sps:$4 sm:$0xff] (!%p8105_p3)   ;;  %v9085_v37 = vld [vmem:[#allocation22 + $0x18c] ss:$16 sps:$4 sm:$0xff] (!%p8105_p3)   ;;  %v9093_v54 = vld [vmem:[#allocation22 + $0x1a0] ss:$16 sps:$4 sm:$0xff] (!%p8105_p3)  }
0x11f2   : > { %6988 = vmatprep.subr.bf16.mxu0 (!%p8105_p3), %v9083_v50  ;;  %7029 = vmatprep.subr.bf16.mxu1 (!%p8105_p3), %v9085_v37  ;;  %v9091_v53 = vld [vmem:[#allocation22 + $0x1ac] ss:$16 sps:$4 sm:$0xff] (!%p8105_p3)  }
0x11f3   : > { %v11247_v59 = vadd.f32 %v6541_v39, %v6535_v56  ;;  %v6549_v61 = vadd.f32 %v6545_v52, %v6536_v58  ;;  %v9088_v39 = vld [vmem:[#allocation22 + $0x188] ss:$16 sps:$4 sm:$0xff] (!%p8105_p3)   ;;  %v9089_v52 = vld [vmem:[#allocation22 + $0x1a4] ss:$16 sps:$4 sm:$0xff] (!%p8105_p3)  }
0x11f4   : > { %6989 = vmatpush1.bf16.msra.mxu0 (!%p8105_p3), %v9087_v51  ;;  %7030 = vmatpush1.bf16.msra.mxu1 (!%p8105_p3), %v9088_v39  ;;  %v9094_v56 = vld [vmem:[#allocation22 + $0x1a8] ss:$16 sps:$4 sm:$0xff] (!%p8105_p3)   ;;  %v9095_v58 = vld [vmem:[#allocation22 + $0x1c4] ss:$16 sps:$4 sm:$0xff] (!%p8105_p3)  }
0x11f5   : > { %6550 = vst [vmem:[#allocation2] sm:$0xff] %v11247_v59  ;;  %6551 = vst [vmem:[#allocation2 + $0x8] sm:$0xff] %v6549_v61  ;;  %v6557_v1 = vpack.c.bf16 (!%p8105_p3), %v6549_v61, %v6549_v61  ;;  %6990 = vmatprep.subr.bf16.mxu0 (!%p8105_p3), %v9089_v52  ;;  %7031 = vmatprep.subr.bf16.mxu1 (!%p8105_p3), %v9091_v53  ;;  %v9097_v61 = vld [vmem:[#allocation22 + $0x1cc] ss:$16 sps:$4 sm:$0xff] (!%p8105_p3)   ;;  %v6556_v57 = vpack.c.bf16 (!%p8105_p3), %v11247_v59, %v11247_v59 }
0x11f7   : > { %6996 = vmatprep.mubr.bf16.mxu0 %v6557_v1  ;;  %7037 = vmatprep.mubr.bf16.mxu1 %v6557_v1  ;;  %v9100_v1 = vld [vmem:[#allocation22 + $0x1c8] ss:$16 sps:$4 sm:$0xff]  }
0x11f8   : > { %6991 = vmatpush1.bf16.msra.mxu0 %v9093_v54  ;;  %7032 = vmatpush1.bf16.msra.mxu1 %v9094_v56 }
0x11f9   : > { %6992 = vmatprep.subr.bf16.mxu0 %v9095_v58  ;;  %7033 = vmatprep.subr.bf16.mxu1 %v9097_v61 }
0x11fc   : > { %6993 = vmatpush1.bf16.msra.mxu0 %v9099_v0  ;;  %7034 = vmatpush1.bf16.msra.mxu1 %v9100_v1 }
0x11fd   : > { %6994 = vmatprep.subr.bf16.mxu0 %v9101_v55  ;;  %7035 = vmatprep.subr.bf16.mxu1 %v9103_v3 }
0x1200   : > { %6995 = vmatpush1.bf16.msra.mxu0 %v9105_v12  ;;  %7036 = vmatpush1.bf16.msra.mxu1 %v9106_v13 }
0x1203   : > { %6997 = vmatmul.mubr.bf16.vlgmr.msra.gmra.mrb[0].mxu0 %v6556_v57  ;;  %7038 = vmatmul.mubr.bf16.vlgmr.msra.gmra.mrb[0].mxu1 %v6556_v57 }
0x12d6   : > { %v6998_v25 = vpop.f32.mrb[0].mxu0  ;;  %v7039_v27 = vpop.f32.mrb[0].mxu1 }
0x12d7   : > { %v6999_v59 = vadd.f32 %v6998_v25, %v6627_v18  ;;  %v7040_v4 = vadd.f32 %v7039_v27, %v6635_v19  ;;  %v7000_v33 = vpop.f32.mrb[1].mxu0  ;;  %v7041_v28 = vpop.f32.mrb[1].mxu1 }
0x12d8   : > { %v7001_v16 = vadd.f32 %v7000_v33, %v6631_v20  ;;  %v7042_v23 = vadd.f32 %v7041_v28, %v6639_v21  ;;  %v7002_v6 = vpop.f32.mrb[2].mxu0  ;;  %v7043_v29 = vpop.f32.mrb[2].mxu1 }
0x12d9   : > { %7046 = vst [vmem:[%s10330_s18] sm:$0xff] %v6999_v59  ;;  %7048 = vst [vmem:[%s10330_s18 + $0x10] sm:$0xff] %v7040_v4  ;;  %v7003_v11 = vpop.f32.mrb[3].mxu0  ;;  %v7044_v9 = vpop.f32.mrb[3].mxu1 }
0x12da   : > { %7047 = vst [vmem:[%s10330_s18 + $0x8] sm:$0xff] %v7001_v16  ;;  %7049 = vst [vmem:[%s10330_s18 + $0x18] sm:$0xff] %v7042_v23 }
0x12db PF: > { %s11403_s27 = sld [smem:[#allocation39_spill]]  ;;  %s11404_s21 = sld [smem:[#allocation34_spill]] }
0x12dc   : > { %s11405_s22 = sld [smem:[#allocation35_spill]]  ;;  %s11406_s23 = sld [smem:[#allocation45_spill]] }
0x12dd   : > { %s11407_s25 = sld [smem:[#allocation38_spill]]  ;;  %s11408_s16 = sld [smem:[#allocation43_spill]] }
0x12de   : > { %s11410_s24 = smov %s9613_s26 }
0x12e1   : > { %s48_s28 = sadd.s32 1, %s11403_s27   ;;  %s11409_s27 = sld [smem:[#allocation44_spill]] }
0x12e2   : > { %p45_p2 = scmp.ge.s32.totalorder %s48_s28, 14  }
0x12e3   : > { %s11411_s26 = smov %s11408_s16 }
0x12e4   :  { %47 = sbr.rel (!%p45_p2) target bundleno = 26 (0x1a), region = 276 }
0x12eb   :  { %7071 = vsyncpa [#allocation4], 1 }
0x12ec   :  { %7073 = vsyncpa [#allocation4 + $0x1], 1 }
0x12ed   :  { %7074 = vsyncpa [#allocation6], 1 }
0x12ee   :  { %7076 = vsyncpa [#allocation6 + $0x1], 1 }
0x12ef   :  { %7077 = vsyncpa [#allocation9], 1 }
0x12f0   :  { %7079 = vsyncpa [#allocation9 + $0x1], 1 }
0x12f1   :  { %7080 = vsyncpa [#allocation12], 1 }
0x12f2   :  { %7082 = vsyncpa [#allocation12 + $0x1], 1 }
0x12f3   :  { %7083 = vsyncpa [#allocation15], 1 }
0x12f4   :  { %7085 = vsyncpa [#allocation15 + $0x1], 1 }
0x12f5   :  { %7086 = vsyncpa [#allocation18], 1 }
0x12f6   :  { %7088 = vsyncpa [#allocation18 + $0x1], 1 }
0x12f7   :  { %7089 = vsyncpa [#allocation21], 1 }
0x12f8   :  { %7091 = vsyncpa [#allocation21 + $0x1], 1 }
0x12f9   :  { %7092 = vsyncpa [#allocation24], 1 }

</bundles_post_ra>
